<compile_context>
chip_gen: v6e
topology: v6e:2x2x1
jax: 0.10.0
libtpu: 0.0.40
codegen_flags: <defaults>
</compile_context>

<pallas_src>
import functools

import jax
import jax.numpy as jnp
from jax.experimental import pallas as pl
from jax.experimental.pallas import tpu as pltpu


def _silu(x):
    return x * jax.nn.sigmoid(x)


def _round_up(x, m):
    return ((x + m - 1) // m) * m


def _pick_row_tile(H, W, max_rows=64):
    # Aim for a large matmul row count per grid step (review: ~512-2048 rows)
    # while requiring tr | H so output blocks tile the image exactly.
    target = max(1, min(H, min(max_rows, max(8, 2048 // max(W, 1)))))
    for tr in range(target, 0, -1):
        if H % tr == 0:
            return tr
    return 1


# ----------------------------------------------------------------------------
# Fused C3 kernel.  Per grid step (n, i) it consumes padded-input rows
# [i*tr, i*tr+tr+2) (main block + 2 single-row halo blocks) and produces
# output rows [i*tr, (i+1)*tr).  Channel spaces are zero-padded to 128
# multiples; the weight matrices are zero outside their true blocks so no
# channel slicing is ever needed inside the kernel.
# ----------------------------------------------------------------------------
def _c3_fused_kernel(xm_ref, xh0_ref, xh1_ref,
                     w12_ref, b12_ref, wm1_ref, bm1_ref,
                     w33_ref, bm2_ref, w3_ref, b3_ref,
                     o_ref, xs_ref, *, tr, H, W):
    i = pl.program_id(1)
    R = tr + 2
    Wp = xs_ref.shape[1]          # padded (and sublane-aligned) width
    CP = w33_ref.shape[-1]        # padded intermediate channel count

    # --- assemble the halo'd input slab (R, Wp, CIN_P) in VMEM scratch -------
    xs_ref[0:tr] = xm_ref[0]
    xs_ref[tr:tr + 1] = xh0_ref[0]
    xs_ref[tr + 1:tr + 2] = xh1_ref[0]
    xs2 = xs_ref[...].reshape(R * Wp, xs_ref.shape[-1])     # bf16

    # --- cv1 || cv2 : fused 1x1 conv + folded BN + SiLU (bf16 MXU, f32 acc) --
    y12 = jnp.dot(xs2, w12_ref[...], preferred_element_type=jnp.float32)
    y12 = _silu(y12 + b12_ref[...])                         # (R*Wp, CP) f32
    # channels [0,c_) = y1, [c_,2c_) = y2, rest exactly 0.

    # --- bottleneck m.cv1 (1x1) on the y1 channels (weight rows for y2 = 0) --
    b1 = jnp.dot(y12.astype(jnp.bfloat16), wm1_ref[...],
                 preferred_element_type=jnp.float32)
    b1 = _silu(b1 + bm1_ref[...])                           # (R*Wp, CP) f32

    # The 3x3 conv zero-pads its *input*; force b1 to 0 on every spatial pad
    # position (top/bottom halo pad rows, left/right pad + alignment columns).
    b1 = b1.reshape(R, Wp, CP)
    row = i * tr + jax.lax.broadcasted_iota(jnp.int32, (R, Wp, 1), 0)
    col = jax.lax.broadcasted_iota(jnp.int32, (R, Wp, 1), 1)
    valid = (row >= 1) & (row <= H) & (col >= 1) & (col <= W)
    b1 = jnp.where(valid, b1, 0.0).astype(jnp.bfloat16)

    # --- bottleneck m.cv2: 3x3 conv as 9 shifted VMEM views + accumulated
    #     MXU matmuls (no HBM im2col expansion) ------------------------------
    acc = jnp.zeros((tr * W, CP), jnp.float32)
    for kh in range(3):
        for kw in range(3):
            patch = b1[kh:kh + tr, kw:kw + W, :].reshape(tr * W, CP)
            acc = acc + jnp.dot(patch, w33_ref[kh, kw],
                                preferred_element_type=jnp.float32)
    z = _silu(acc + bm2_ref[...])                           # (tr*W, CP) f32

    # --- residual + implicit channel concat:
    #     channels [0,c_)   : b2 = z + y1          (bottleneck shortcut)
    #     channels [c_,2c_) : 0 + y2               (the torch.cat branch)
    y12_int = y12.reshape(R, Wp, CP)[1:tr + 1, 1:W + 1, :].reshape(tr * W, CP)
    cat = z + y12_int

    # --- cv3: 1x1 conv + folded BN + SiLU ------------------------------------
    out = jnp.dot(cat.astype(jnp.bfloat16), w3_ref[...],
                  preferred_element_type=jnp.float32)
    out = _silu(out + b3_ref[...])
    o_ref[...] = out.reshape(1, tr, W, out.shape[-1]).astype(o_ref.dtype)


# ----------------------------------------------------------------------------
# Parameter construction (deterministic, synthetic).  Conv weights stored as
# (Cin, Cout) for k=1 and (3, 3, Cin, Cout) for k=3; BatchNorm folded into
# scale = gamma / sqrt(var + eps), bias = beta - mean * scale (eval mode).
# ----------------------------------------------------------------------------
def make_conv_params(key, cin, cout, k=1):
    kw_key, g_key, b_key, m_key, v_key = jax.random.split(key, 5)
    if k == 1:
        w = 0.1 * jax.random.normal(kw_key, (cin, cout), jnp.float32)
    else:
        w = 0.1 * jax.random.normal(kw_key, (k, k, cin, cout), jnp.float32)
    gamma = 1.0 + 0.1 * jax.random.normal(g_key, (cout,), jnp.float32)
    beta = 0.1 * jax.random.normal(b_key, (cout,), jnp.float32)
    mean = 0.1 * jax.random.normal(m_key, (cout,), jnp.float32)
    var = jnp.abs(1.0 + 0.1 * jax.random.normal(v_key, (cout,), jnp.float32))
    eps = 1e-5
    scale = gamma / jnp.sqrt(var + eps)
    bias = beta - mean * scale
    return {"w": w, "scale": scale, "bias": bias}


def make_c3_params(key, c1, c2, e=0.5):
    c_ = int(c2 * e)
    k = jax.random.split(key, 5)
    return {
        "cv1": make_conv_params(k[0], c1, c_, 1),
        "cv2": make_conv_params(k[1], c1, c_, 1),
        "cv3": make_conv_params(k[2], 2 * c_, c2, 1),
        "m0_cv1": make_conv_params(k[3], c_, c_, 1),     # Bottleneck e=1.0
        "m0_cv2": make_conv_params(k[4], c_, c_, 3),
    }


# ----------------------------------------------------------------------------
# C3 forward: cv3( cat( Bottleneck(cv1(x)), cv2(x) ) )   (n=1, shortcut=True)
# ----------------------------------------------------------------------------
def c3_forward(x_nchw, p, *, max_rows=64):
    N, C1, H, W = x_nchw.shape
    c_ = p["cv1"]["w"].shape[1]
    C2 = p["cv3"]["w"].shape[1]

    CIN_P = _round_up(C1, 128)        # padded input channels (lane-dense)
    CP = _round_up(2 * c_, 128)       # padded intermediate / concat channels
    COUT_P = _round_up(C2, 128)       # padded output channels
    Wpp = _round_up(W + 2, 8)         # spatially padded width, sublane-aligned

    tr = _pick_row_tile(H, W, max_rows)
    R = tr + 2

    f32 = jnp.float32
    # ---- fold BN scale into weights, embed into zero-padded channel spaces --
    w12 = jnp.zeros((CIN_P, CP), f32)
    w12 = w12.at[:C1, :c_].set(p["cv1"]["w"] * p["cv1"]["scale"])
    w12 = w12.at[:C1, c_:2 * c_].set(p["cv2"]["w"] * p["cv2"]["scale"])
    b12 = jnp.zeros((1, CP), f32)
    b12 = b12.at[0, :c_].set(p["cv1"]["bias"]).at[0, c_:2 * c_].set(p["cv2"]["bias"])

    wm1 = jnp.zeros((CP, CP), f32).at[:c_, :c_].set(
        p["m0_cv1"]["w"] * p["m0_cv1"]["scale"])
    bm1 = jnp.zeros((1, CP), f32).at[0, :c_].set(p["m0_cv1"]["bias"])

    w33 = jnp.zeros((3, 3, CP, CP), f32).at[:, :, :c_, :c_].set(
        p["m0_cv2"]["w"] * p["m0_cv2"]["scale"])
    bm2 = jnp.zeros((1, CP), f32).at[0, :c_].set(p["m0_cv2"]["bias"])

    w3 = jnp.zeros((CP, COUT_P), f32).at[:2 * c_, :C2].set(
        p["cv3"]["w"] * p["cv3"]["scale"])
    b3 = jnp.zeros((1, COUT_P), f32).at[0, :C2].set(p["cv3"]["bias"])

    w12, wm1, w33, w3 = (a.astype(jnp.bfloat16) for a in (w12, wm1, w33, w3))

    # ---- input: NCHW -> NHWC, zero spatial pad (+ width alignment), channel
    # pad to CIN_P, cast to bf16 ----------------------------------------------
    x = jnp.transpose(x_nchw, (0, 2, 3, 1))
    xp = jnp.pad(x, ((0, 0), (1, 1), (1, Wpp - (W + 1)), (0, CIN_P - C1)))
    xp = xp.astype(jnp.bfloat16)

    def main_map(n, i):
        return (n, i, 0, 0)

    def halo0_map(n, i):
        return (n, (i + 1) * tr, 0, 0)       # block size 1 -> element row idx

    def halo1_map(n, i):
        return (n, (i + 1) * tr + 1, 0, 0)

    def full2(n, i):
        return (0, 0)

    kernel = functools.partial(_c3_fused_kernel, tr=tr, H=H, W=W)

    out = pl.pallas_call(
        kernel,
        out_shape=jax.ShapeDtypeStruct((N, H, W, COUT_P), x_nchw.dtype),
        grid=(N, H // tr),
        in_specs=[
            pl.BlockSpec((1, tr, Wpp, CIN_P), main_map),
            pl.BlockSpec((1, 1, Wpp, CIN_P), halo0_map),
            pl.BlockSpec((1, 1, Wpp, CIN_P), halo1_map),
            pl.BlockSpec((CIN_P, CP), full2),
            pl.BlockSpec((1, CP), full2),
            pl.BlockSpec((CP, CP), full2),
            pl.BlockSpec((1, CP), full2),
            pl.BlockSpec((3, 3, CP, CP), lambda n, i: (0, 0, 0, 0)),
            pl.BlockSpec((1, CP), full2),
            pl.BlockSpec((CP, COUT_P), full2),
            pl.BlockSpec((1, COUT_P), full2),
        ],
        out_specs=pl.BlockSpec((1, tr, W, COUT_P), main_map),
        scratch_shapes=[pltpu.VMEM((R, Wpp, CIN_P), jnp.bfloat16)],
        compiler_params=pltpu.CompilerParams(
            dimension_semantics=("parallel", "parallel"),
            vmem_limit_bytes=48 * 1024 * 1024),   # below v7x's 64 MiB/TC
    )(xp, xp, xp, w12, b12, wm1, bm1, w33, bm2, w3, b3)

    out = out[..., :C2]
    return jnp.transpose(out, (0, 3, 1, 2))      # NHWC -> NCHW


# ----------------------------------------------------------------------------
# Pure-JAX f32 reference (eval-mode BN), used to sanity-check the kernel.
# ----------------------------------------------------------------------------
def _conv_bn_silu_ref(x, q):
    w = q["w"]
    if w.ndim == 2:
        y = jnp.einsum("nhwc,cd->nhwd", x, w)
    else:
        N, H, W, C = x.shape
        xpad = jnp.pad(x, ((0, 0), (1, 1), (1, 1), (0, 0)))
        y = jnp.zeros(x.shape[:3] + (w.shape[-1],), jnp.float32)
        for kh in range(3):
            for kw in range(3):
                y = y + jnp.einsum("nhwc,cd->nhwd",
                                   xpad[:, kh:kh + H, kw:kw + W, :], w[kh, kw])
    y = y * q["scale"] + q["bias"]
    return y * jax.nn.sigmoid(y)


def c3_reference(x_nchw, p):
    x = jnp.transpose(x_nchw, (0, 2, 3, 1))
    y1 = _conv_bn_silu_ref(x, p["cv1"])
    y2 = _conv_bn_silu_ref(x, p["cv2"])
    b1 = _conv_bn_silu_ref(y1, p["m0_cv1"])
    b2 = y1 + _conv_bn_silu_ref(b1, p["m0_cv2"])
    cat = jnp.concatenate([b2, y2], axis=-1)
    out = _conv_bn_silu_ref(cat, p["cv3"])
    return jnp.transpose(out, (0, 3, 1, 2))


if __name__ == "__main__":
    key = jax.random.PRNGKey(0)
    kx, kp = jax.random.split(key)

    N, C1, H, W = 2, 4, 16, 16
    C2 = 8
    x = jax.random.normal(kx, (N, C1, H, W), jnp.float32)
    params = make_c3_params(kp, C1, C2, e=0.5)

    out = jax.jit(c3_forward)(x, params)
    jax.block_until_ready(out)
    assert out.shape == (N, C2, H, W), out.shape

    # Loose check against the f32 reference (kernel matmuls run in bf16).
    ref = c3_reference(x, params)
    err = float(jnp.max(jnp.abs(out - ref)))
    assert err < 5e-2, f"max abs error vs reference: {err}"
    print("KERNEL_OK")
</pallas_src>

<mosaic_0001>
module attributes {stable_mosaic.version = 11 : i64} {
  func.func @_c3_fused_kernel(%arg0: i32, %arg1: i32, %arg2: memref<1x16x24x128xbf16, #tpu.memory_space<vmem>>, %arg3: memref<1x1x24x128xbf16, #tpu.memory_space<vmem>>, %arg4: memref<1x1x24x128xbf16, #tpu.memory_space<vmem>>, %arg5: memref<128x128xbf16, #tpu.memory_space<vmem>>, %arg6: memref<1x128xf32, #tpu.memory_space<vmem>>, %arg7: memref<128x128xbf16, #tpu.memory_space<vmem>>, %arg8: memref<1x128xf32, #tpu.memory_space<vmem>>, %arg9: memref<3x3x128x128xbf16, #tpu.memory_space<vmem>>, %arg10: memref<1x128xf32, #tpu.memory_space<vmem>>, %arg11: memref<128x128xbf16, #tpu.memory_space<vmem>>, %arg12: memref<1x128xf32, #tpu.memory_space<vmem>>, %arg13: memref<1x16x16x128xf32, #tpu.memory_space<vmem>>, %arg14: memref<18x24x128xbf16, #tpu.memory_space<vmem>>) attributes {dimension_semantics = [#tpu.dimension_semantics<parallel>, #tpu.dimension_semantics<parallel>], iteration_bounds = array<i64: 2, 1>, scalar_prefetch = 0 : i64, scratch_operands = 1 : i64, tpu.core_type = #tpu.core_type<tc>, window_params = [{transform_indices = @transform_0, window_bounds = array<i64: 1, 16, 24, 128>}, {transform_indices = @transform_1, window_bounds = array<i64: 1, 1, 24, 128>}, {transform_indices = @transform_2, window_bounds = array<i64: 1, 1, 24, 128>}, {pipeline_mode = #tpu.pipeline_mode<synchronous>, transform_indices = @transform_3, window_bounds = array<i64: 128, 128>}, {pipeline_mode = #tpu.pipeline_mode<synchronous>, transform_indices = @transform_4, window_bounds = array<i64: 1, 128>}, {pipeline_mode = #tpu.pipeline_mode<synchronous>, transform_indices = @transform_5, window_bounds = array<i64: 128, 128>}, {pipeline_mode = #tpu.pipeline_mode<synchronous>, transform_indices = @transform_6, window_bounds = array<i64: 1, 128>}, {pipeline_mode = #tpu.pipeline_mode<synchronous>, transform_indices = @transform_7, window_bounds = array<i64: 3, 3, 128, 128>}, {pipeline_mode = #tpu.pipeline_mode<synchronous>, transform_indices = @transform_8, window_bounds = array<i64: 1, 128>}, {pipeline_mode = #tpu.pipeline_mode<synchronous>, transform_indices = @transform_9, window_bounds = array<i64: 128, 128>}, {pipeline_mode = #tpu.pipeline_mode<synchronous>, transform_indices = @transform_10, window_bounds = array<i64: 1, 128>}, {transform_indices = @transform_11, window_bounds = array<i64: 1, 16, 16, 128>}]} {
    %c0 = arith.constant 0 : index
    %c0_0 = arith.constant 0 : index
    %c0_1 = arith.constant 0 : index
    %c0_2 = arith.constant 0 : index
    %0 = vector.load %arg2[%c0, %c0_0, %c0_1, %c0_2] : memref<1x16x24x128xbf16, #tpu.memory_space<vmem>>, vector<1x16x24x128xbf16>
    %1 = vector.shape_cast %0 : vector<1x16x24x128xbf16> to vector<16x24x128xbf16>
    %c0_3 = arith.constant 0 : index
    %c0_4 = arith.constant 0 : index
    %c0_5 = arith.constant 0 : index
    %2 = vector.load %arg14[%c0_3, %c0_4, %c0_5] : memref<18x24x128xbf16, #tpu.memory_space<vmem>>, vector<16x24x128xbf16>
    tpu.vector_store %arg14[%c0_3, %c0_4, %c0_5], %1 {strides = array<i32>} : memref<18x24x128xbf16, #tpu.memory_space<vmem>>, vector<16x24x128xbf16>,
    %c0_6 = arith.constant 0 : index
    %c0_7 = arith.constant 0 : index
    %c0_8 = arith.constant 0 : index
    %c0_9 = arith.constant 0 : index
    %3 = vector.load %arg3[%c0_6, %c0_7, %c0_8, %c0_9] : memref<1x1x24x128xbf16, #tpu.memory_space<vmem>>, vector<1x1x24x128xbf16>
    %4 = vector.shape_cast %3 : vector<1x1x24x128xbf16> to vector<1x24x128xbf16>
    %c16 = arith.constant 16 : index
    %c0_10 = arith.constant 0 : index
    %c0_11 = arith.constant 0 : index
    %5 = vector.load %arg14[%c16, %c0_10, %c0_11] : memref<18x24x128xbf16, #tpu.memory_space<vmem>>, vector<1x24x128xbf16>
    tpu.vector_store %arg14[%c16, %c0_10, %c0_11], %4 {strides = array<i32>} : memref<18x24x128xbf16, #tpu.memory_space<vmem>>, vector<1x24x128xbf16>,
    %c0_12 = arith.constant 0 : index
    %c0_13 = arith.constant 0 : index
    %c0_14 = arith.constant 0 : index
    %c0_15 = arith.constant 0 : index
    %6 = vector.load %arg4[%c0_12, %c0_13, %c0_14, %c0_15] : memref<1x1x24x128xbf16, #tpu.memory_space<vmem>>, vector<1x1x24x128xbf16>
    %7 = vector.shape_cast %6 : vector<1x1x24x128xbf16> to vector<1x24x128xbf16>
    %c17 = arith.constant 17 : index
    %c0_16 = arith.constant 0 : index
    %c0_17 = arith.constant 0 : index
    %8 = vector.load %arg14[%c17, %c0_16, %c0_17] : memref<18x24x128xbf16, #tpu.memory_space<vmem>>, vector<1x24x128xbf16>
    tpu.vector_store %arg14[%c17, %c0_16, %c0_17], %7 {strides = array<i32>} : memref<18x24x128xbf16, #tpu.memory_space<vmem>>, vector<1x24x128xbf16>,
    %c0_18 = arith.constant 0 : index
    %c0_19 = arith.constant 0 : index
    %c0_20 = arith.constant 0 : index
    %9 = vector.load %arg14[%c0_18, %c0_19, %c0_20] : memref<18x24x128xbf16, #tpu.memory_space<vmem>>, vector<18x24x128xbf16>
    %10 = vector.shape_cast %9 : vector<18x24x128xbf16> to vector<432x128xbf16>
    %c0_21 = arith.constant 0 : index
    %c0_22 = arith.constant 0 : index
    %11 = vector.load %arg5[%c0_21, %c0_22] : memref<128x128xbf16, #tpu.memory_space<vmem>>, vector<128x128xbf16>
    %cst = arith.constant dense<0.000000e+00> : vector<432x128xf32>
    %12 = tpu.matmul %10, %11, %cst {dimension_numbers = #tpu.dot_dimension_numbers<[1], [0], [0], [1], [0, 0, 1, 1], [], []>} : vector<432x128xbf16>, vector<128x128xbf16>, vector<432x128xf32> -> vector<432x128xf32>
    %c0_23 = arith.constant 0 : index
    %c0_24 = arith.constant 0 : index
    %13 = vector.load %arg6[%c0_23, %c0_24] : memref<1x128xf32, #tpu.memory_space<vmem>>, vector<1x128xf32>
    %14 = vector.broadcast %13 : vector<1x128xf32> to vector<432x128xf32>
    %15 = arith.addf %12, %14 : vector<432x128xf32>
    %16 = arith.negf %15 : vector<432x128xf32>
    %17 = math.exp %16 : vector<432x128xf32>
    %cst_25 = arith.constant 1.000000e+00 : f32
    %18 = vector.broadcast %cst_25 : f32 to vector<432x128xf32>
    %19 = arith.addf %18, %17 : vector<432x128xf32>
    %20 = arith.divf %18, %19 : vector<432x128xf32>
    %21 = arith.mulf %15, %20 : vector<432x128xf32>
    %22 = arith.truncf %21 : vector<432x128xf32> to vector<432x128xbf16>
    %c0_26 = arith.constant 0 : index
    %c0_27 = arith.constant 0 : index
    %23 = vector.load %arg7[%c0_26, %c0_27] : memref<128x128xbf16, #tpu.memory_space<vmem>>, vector<128x128xbf16>
    %cst_28 = arith.constant dense<0.000000e+00> : vector<432x128xf32>
    %24 = tpu.matmul %22, %23, %cst_28 {dimension_numbers = #tpu.dot_dimension_numbers<[1], [0], [0], [1], [0, 0, 1, 1], [], []>} : vector<432x128xbf16>, vector<128x128xbf16>, vector<432x128xf32> -> vector<432x128xf32>
    %c0_29 = arith.constant 0 : index
    %c0_30 = arith.constant 0 : index
    %25 = vector.load %arg8[%c0_29, %c0_30] : memref<1x128xf32, #tpu.memory_space<vmem>>, vector<1x128xf32>
    %26 = vector.broadcast %25 : vector<1x128xf32> to vector<432x128xf32>
    %27 = arith.addf %24, %26 : vector<432x128xf32>
    %28 = arith.negf %27 : vector<432x128xf32>
    %29 = math.exp %28 : vector<432x128xf32>
    %cst_31 = arith.constant 1.000000e+00 : f32
    %30 = vector.broadcast %cst_31 : f32 to vector<432x128xf32>
    %31 = arith.addf %30, %29 : vector<432x128xf32>
    %32 = arith.divf %30, %31 : vector<432x128xf32>
    %33 = arith.mulf %27, %32 : vector<432x128xf32>
    %34 = vector.shape_cast %33 : vector<432x128xf32> to vector<18x24x128xf32>
    %c16_i32 = arith.constant 16 : i32
    %35 = arith.muli %arg1, %c16_i32 : i32
    %36 = tpu.iota {dimensions = array<i32: 0>} : vector<18x24x1xi32>
    %37 = vector.broadcast %35 : i32 to vector<18x24x1xi32>
    %38 = arith.addi %37, %36 : vector<18x24x1xi32>
    %39 = tpu.iota {dimensions = array<i32: 1>} : vector<18x24x1xi32>
    %c1_i32 = arith.constant 1 : i32
    %40 = vector.broadcast %c1_i32 : i32 to vector<18x24x1xi32>
    %41 = arith.cmpi sge, %38, %40 : vector<18x24x1xi32>
    %c16_i32_32 = arith.constant 16 : i32
    %42 = vector.broadcast %c16_i32_32 : i32 to vector<18x24x1xi32>
    %43 = arith.cmpi sle, %38, %42 : vector<18x24x1xi32>
    %44 = arith.andi %41, %43 : vector<18x24x1xi1>
    %c1_i32_33 = arith.constant 1 : i32
    %45 = vector.broadcast %c1_i32_33 : i32 to vector<18x24x1xi32>
    %46 = arith.cmpi sge, %39, %45 : vector<18x24x1xi32>
    %47 = arith.andi %44, %46 : vector<18x24x1xi1>
    %c16_i32_34 = arith.constant 16 : i32
    %48 = vector.broadcast %c16_i32_34 : i32 to vector<18x24x1xi32>
    %49 = arith.cmpi sle, %39, %48 : vector<18x24x1xi32>
    %50 = arith.andi %47, %49 : vector<18x24x1xi1>
    %cst_35 = arith.constant 0.000000e+00 : f32
    %51 = vector.shape_cast %50 : vector<18x24x1xi1> to vector<18x24x1xi1>
    %52 = vector.broadcast %51 : vector<18x24x1xi1> to vector<18x24x128xi1>
    %53 = vector.broadcast %cst_35 : f32 to vector<18x24x128xf32>
    %54 = arith.select %52, %34, %53 : vector<18x24x128xi1>, vector<18x24x128xf32>
    %55 = arith.truncf %54 : vector<18x24x128xf32> to vector<18x24x128xbf16>
    %cst_36 = arith.constant 0.000000e+00 : f32
    %56 = vector.broadcast %cst_36 : f32 to vector<256x128xf32>
    %57 = vector.extract_strided_slice %55 {offsets = [0, 0, 0], sizes = [16, 16, 128], strides = [1, 1, 1]} : vector<18x24x128xbf16> to vector<16x16x128xbf16>
    %58 = vector.shape_cast %57 : vector<16x16x128xbf16> to vector<256x128xbf16>
    %c0_37 = arith.constant 0 : index
    %c0_38 = arith.constant 0 : index
    %c0_39 = arith.constant 0 : index
    %c0_40 = arith.constant 0 : index
    %59 = vector.load %arg9[%c0_37, %c0_38, %c0_39, %c0_40] : memref<3x3x128x128xbf16, #tpu.memory_space<vmem>>, vector<1x1x128x128xbf16>
    %60 = vector.shape_cast %59 : vector<1x1x128x128xbf16> to vector<128x128xbf16>
    %cst_41 = arith.constant dense<0.000000e+00> : vector<256x128xf32>
    %61 = tpu.matmul %58, %60, %cst_41 {dimension_numbers = #tpu.dot_dimension_numbers<[1], [0], [0], [1], [0, 0, 1, 1], [], []>} : vector<256x128xbf16>, vector<128x128xbf16>, vector<256x128xf32> -> vector<256x128xf32>
    %62 = arith.addf %56, %61 : vector<256x128xf32>
    %63 = vector.extract_strided_slice %55 {offsets = [0, 1, 0], sizes = [16, 16, 128], strides = [1, 1, 1]} : vector<18x24x128xbf16> to vector<16x16x128xbf16>
    %64 = vector.shape_cast %63 : vector<16x16x128xbf16> to vector<256x128xbf16>
    %c0_42 = arith.constant 0 : index
    %c1 = arith.constant 1 : index
    %c0_43 = arith.constant 0 : index
    %c0_44 = arith.constant 0 : index
    %65 = vector.load %arg9[%c0_42, %c1, %c0_43, %c0_44] : memref<3x3x128x128xbf16, #tpu.memory_space<vmem>>, vector<1x1x128x128xbf16>
    %66 = vector.shape_cast %65 : vector<1x1x128x128xbf16> to vector<128x128xbf16>
    %cst_45 = arith.constant dense<0.000000e+00> : vector<256x128xf32>
    %67 = tpu.matmul %64, %66, %cst_45 {dimension_numbers = #tpu.dot_dimension_numbers<[1], [0], [0], [1], [0, 0, 1, 1], [], []>} : vector<256x128xbf16>, vector<128x128xbf16>, vector<256x128xf32> -> vector<256x128xf32>
    %68 = arith.addf %62, %67 : vector<256x128xf32>
    %69 = vector.extract_strided_slice %55 {offsets = [0, 2, 0], sizes = [16, 16, 128], strides = [1, 1, 1]} : vector<18x24x128xbf16> to vector<16x16x128xbf16>
    %70 = vector.shape_cast %69 : vector<16x16x128xbf16> to vector<256x128xbf16>
    %c0_46 = arith.constant 0 : index
    %c2 = arith.constant 2 : index
    %c0_47 = arith.constant 0 : index
    %c0_48 = arith.constant 0 : index
    %71 = vector.load %arg9[%c0_46, %c2, %c0_47, %c0_48] : memref<3x3x128x128xbf16, #tpu.memory_space<vmem>>, vector<1x1x128x128xbf16>
    %72 = vector.shape_cast %71 : vector<1x1x128x128xbf16> to vector<128x128xbf16>
    %cst_49 = arith.constant dense<0.000000e+00> : vector<256x128xf32>
    %73 = tpu.matmul %70, %72, %cst_49 {dimension_numbers = #tpu.dot_dimension_numbers<[1], [0], [0], [1], [0, 0, 1, 1], [], []>} : vector<256x128xbf16>, vector<128x128xbf16>, vector<256x128xf32> -> vector<256x128xf32>
    %74 = arith.addf %68, %73 : vector<256x128xf32>
    %75 = vector.extract_strided_slice %55 {offsets = [1, 0, 0], sizes = [16, 16, 128], strides = [1, 1, 1]} : vector<18x24x128xbf16> to vector<16x16x128xbf16>
    %76 = vector.shape_cast %75 : vector<16x16x128xbf16> to vector<256x128xbf16>
    %c1_50 = arith.constant 1 : index
    %c0_51 = arith.constant 0 : index
    %c0_52 = arith.constant 0 : index
    %c0_53 = arith.constant 0 : index
    %77 = vector.load %arg9[%c1_50, %c0_51, %c0_52, %c0_53] : memref<3x3x128x128xbf16, #tpu.memory_space<vmem>>, vector<1x1x128x128xbf16>
    %78 = vector.shape_cast %77 : vector<1x1x128x128xbf16> to vector<128x128xbf16>
    %cst_54 = arith.constant dense<0.000000e+00> : vector<256x128xf32>
    %79 = tpu.matmul %76, %78, %cst_54 {dimension_numbers = #tpu.dot_dimension_numbers<[1], [0], [0], [1], [0, 0, 1, 1], [], []>} : vector<256x128xbf16>, vector<128x128xbf16>, vector<256x128xf32> -> vector<256x128xf32>
    %80 = arith.addf %74, %79 : vector<256x128xf32>
    %81 = vector.extract_strided_slice %55 {offsets = [1, 1, 0], sizes = [16, 16, 128], strides = [1, 1, 1]} : vector<18x24x128xbf16> to vector<16x16x128xbf16>
    %82 = vector.shape_cast %81 : vector<16x16x128xbf16> to vector<256x128xbf16>
    %c1_55 = arith.constant 1 : index
    %c1_56 = arith.constant 1 : index
    %c0_57 = arith.constant 0 : index
    %c0_58 = arith.constant 0 : index
    %83 = vector.load %arg9[%c1_55, %c1_56, %c0_57, %c0_58] : memref<3x3x128x128xbf16, #tpu.memory_space<vmem>>, vector<1x1x128x128xbf16>
    %84 = vector.shape_cast %83 : vector<1x1x128x128xbf16> to vector<128x128xbf16>
    %cst_59 = arith.constant dense<0.000000e+00> : vector<256x128xf32>
    %85 = tpu.matmul %82, %84, %cst_59 {dimension_numbers = #tpu.dot_dimension_numbers<[1], [0], [0], [1], [0, 0, 1, 1], [], []>} : vector<256x128xbf16>, vector<128x128xbf16>, vector<256x128xf32> -> vector<256x128xf32>
    %86 = arith.addf %80, %85 : vector<256x128xf32>
    %87 = vector.extract_strided_slice %55 {offsets = [1, 2, 0], sizes = [16, 16, 128], strides = [1, 1, 1]} : vector<18x24x128xbf16> to vector<16x16x128xbf16>
    %88 = vector.shape_cast %87 : vector<16x16x128xbf16> to vector<256x128xbf16>
    %c1_60 = arith.constant 1 : index
    %c2_61 = arith.constant 2 : index
    %c0_62 = arith.constant 0 : index
    %c0_63 = arith.constant 0 : index
    %89 = vector.load %arg9[%c1_60, %c2_61, %c0_62, %c0_63] : memref<3x3x128x128xbf16, #tpu.memory_space<vmem>>, vector<1x1x128x128xbf16>
    %90 = vector.shape_cast %89 : vector<1x1x128x128xbf16> to vector<128x128xbf16>
    %cst_64 = arith.constant dense<0.000000e+00> : vector<256x128xf32>
    %91 = tpu.matmul %88, %90, %cst_64 {dimension_numbers = #tpu.dot_dimension_numbers<[1], [0], [0], [1], [0, 0, 1, 1], [], []>} : vector<256x128xbf16>, vector<128x128xbf16>, vector<256x128xf32> -> vector<256x128xf32>
    %92 = arith.addf %86, %91 : vector<256x128xf32>
    %93 = vector.extract_strided_slice %55 {offsets = [2, 0, 0], sizes = [16, 16, 128], strides = [1, 1, 1]} : vector<18x24x128xbf16> to vector<16x16x128xbf16>
    %94 = vector.shape_cast %93 : vector<16x16x128xbf16> to vector<256x128xbf16>
    %c2_65 = arith.constant 2 : index
    %c0_66 = arith.constant 0 : index
    %c0_67 = arith.constant 0 : index
    %c0_68 = arith.constant 0 : index
    %95 = vector.load %arg9[%c2_65, %c0_66, %c0_67, %c0_68] : memref<3x3x128x128xbf16, #tpu.memory_space<vmem>>, vector<1x1x128x128xbf16>
    %96 = vector.shape_cast %95 : vector<1x1x128x128xbf16> to vector<128x128xbf16>
    %cst_69 = arith.constant dense<0.000000e+00> : vector<256x128xf32>
    %97 = tpu.matmul %94, %96, %cst_69 {dimension_numbers = #tpu.dot_dimension_numbers<[1], [0], [0], [1], [0, 0, 1, 1], [], []>} : vector<256x128xbf16>, vector<128x128xbf16>, vector<256x128xf32> -> vector<256x128xf32>
    %98 = arith.addf %92, %97 : vector<256x128xf32>
    %99 = vector.extract_strided_slice %55 {offsets = [2, 1, 0], sizes = [16, 16, 128], strides = [1, 1, 1]} : vector<18x24x128xbf16> to vector<16x16x128xbf16>
    %100 = vector.shape_cast %99 : vector<16x16x128xbf16> to vector<256x128xbf16>
    %c2_70 = arith.constant 2 : index
    %c1_71 = arith.constant 1 : index
    %c0_72 = arith.constant 0 : index
    %c0_73 = arith.constant 0 : index
    %101 = vector.load %arg9[%c2_70, %c1_71, %c0_72, %c0_73] : memref<3x3x128x128xbf16, #tpu.memory_space<vmem>>, vector<1x1x128x128xbf16>
    %102 = vector.shape_cast %101 : vector<1x1x128x128xbf16> to vector<128x128xbf16>
    %cst_74 = arith.constant dense<0.000000e+00> : vector<256x128xf32>
    %103 = tpu.matmul %100, %102, %cst_74 {dimension_numbers = #tpu.dot_dimension_numbers<[1], [0], [0], [1], [0, 0, 1, 1], [], []>} : vector<256x128xbf16>, vector<128x128xbf16>, vector<256x128xf32> -> vector<256x128xf32>
    %104 = arith.addf %98, %103 : vector<256x128xf32>
    %105 = vector.extract_strided_slice %55 {offsets = [2, 2, 0], sizes = [16, 16, 128], strides = [1, 1, 1]} : vector<18x24x128xbf16> to vector<16x16x128xbf16>
    %106 = vector.shape_cast %105 : vector<16x16x128xbf16> to vector<256x128xbf16>
    %c2_75 = arith.constant 2 : index
    %c2_76 = arith.constant 2 : index
    %c0_77 = arith.constant 0 : index
    %c0_78 = arith.constant 0 : index
    %107 = vector.load %arg9[%c2_75, %c2_76, %c0_77, %c0_78] : memref<3x3x128x128xbf16, #tpu.memory_space<vmem>>, vector<1x1x128x128xbf16>
    %108 = vector.shape_cast %107 : vector<1x1x128x128xbf16> to vector<128x128xbf16>
    %cst_79 = arith.constant dense<0.000000e+00> : vector<256x128xf32>
    %109 = tpu.matmul %106, %108, %cst_79 {dimension_numbers = #tpu.dot_dimension_numbers<[1], [0], [0], [1], [0, 0, 1, 1], [], []>} : vector<256x128xbf16>, vector<128x128xbf16>, vector<256x128xf32> -> vector<256x128xf32>
    %110 = arith.addf %104, %109 : vector<256x128xf32>
    %c0_80 = arith.constant 0 : index
    %c0_81 = arith.constant 0 : index
    %111 = vector.load %arg10[%c0_80, %c0_81] : memref<1x128xf32, #tpu.memory_space<vmem>>, vector<1x128xf32>
    %112 = vector.broadcast %111 : vector<1x128xf32> to vector<256x128xf32>
    %113 = arith.addf %110, %112 : vector<256x128xf32>
    %114 = arith.negf %113 : vector<256x128xf32>
    %115 = math.exp %114 : vector<256x128xf32>
    %cst_82 = arith.constant 1.000000e+00 : f32
    %116 = vector.broadcast %cst_82 : f32 to vector<256x128xf32>
    %117 = arith.addf %116, %115 : vector<256x128xf32>
    %118 = arith.divf %116, %117 : vector<256x128xf32>
    %119 = arith.mulf %113, %118 : vector<256x128xf32>
    %120 = vector.shape_cast %21 : vector<432x128xf32> to vector<18x24x128xf32>
    %121 = vector.extract_strided_slice %120 {offsets = [1, 1, 0], sizes = [16, 16, 128], strides = [1, 1, 1]} : vector<18x24x128xf32> to vector<16x16x128xf32>
    %122 = vector.shape_cast %121 : vector<16x16x128xf32> to vector<256x128xf32>
    %123 = arith.addf %119, %122 : vector<256x128xf32>
    %124 = arith.truncf %123 : vector<256x128xf32> to vector<256x128xbf16>
    %c0_83 = arith.constant 0 : index
    %c0_84 = arith.constant 0 : index
    %125 = vector.load %arg11[%c0_83, %c0_84] : memref<128x128xbf16, #tpu.memory_space<vmem>>, vector<128x128xbf16>
    %cst_85 = arith.constant dense<0.000000e+00> : vector<256x128xf32>
    %126 = tpu.matmul %124, %125, %cst_85 {dimension_numbers = #tpu.dot_dimension_numbers<[1], [0], [0], [1], [0, 0, 1, 1], [], []>} : vector<256x128xbf16>, vector<128x128xbf16>, vector<256x128xf32> -> vector<256x128xf32>
    %c0_86 = arith.constant 0 : index
    %c0_87 = arith.constant 0 : index
    %127 = vector.load %arg12[%c0_86, %c0_87] : memref<1x128xf32, #tpu.memory_space<vmem>>, vector<1x128xf32>
    %128 = vector.broadcast %127 : vector<1x128xf32> to vector<256x128xf32>
    %129 = arith.addf %126, %128 : vector<256x128xf32>
    %130 = arith.negf %129 : vector<256x128xf32>
    %131 = math.exp %130 : vector<256x128xf32>
    %cst_88 = arith.constant 1.000000e+00 : f32
    %132 = vector.broadcast %cst_88 : f32 to vector<256x128xf32>
    %133 = arith.addf %132, %131 : vector<256x128xf32>
    %134 = arith.divf %132, %133 : vector<256x128xf32>
    %135 = arith.mulf %129, %134 : vector<256x128xf32>
    %136 = vector.shape_cast %135 : vector<256x128xf32> to vector<1x16x16x128xf32>
    %c0_89 = arith.constant 0 : index
    %c0_90 = arith.constant 0 : index
    %c0_91 = arith.constant 0 : index
    %c0_92 = arith.constant 0 : index
    %137 = vector.load %arg13[%c0_89, %c0_90, %c0_91, %c0_92] : memref<1x16x16x128xf32, #tpu.memory_space<vmem>>, vector<1x16x16x128xf32>
    tpu.vector_store %arg13[%c0_89, %c0_90, %c0_91, %c0_92], %136 {strides = array<i32>} : memref<1x16x16x128xf32, #tpu.memory_space<vmem>>, vector<1x16x16x128xf32>,
    return
  }
  func.func @transform_0(%arg0: i32, %arg1: i32) -> (i32, i32, i32, i32) {
    %c0_i32 = arith.constant 0 : i32
    %c0_i32_0 = arith.constant 0 : i32
    %c0_i32_1 = arith.constant 0 : i32
    return %arg0, %arg1, %c0_i32, %c0_i32_0 : i32, i32, i32, i32
  }
  func.func @transform_1(%arg0: i32, %arg1: i32) -> (i32, i32, i32, i32) {
    %c1_i32 = arith.constant 1 : i32
    %0 = arith.addi %arg1, %c1_i32 : i32
    %c16_i32 = arith.constant 16 : i32
    %1 = arith.muli %0, %c16_i32 : i32
    %c0_i32 = arith.constant 0 : i32
    %c0_i32_0 = arith.constant 0 : i32
    %c0_i32_1 = arith.constant 0 : i32
    return %arg0, %1, %c0_i32, %c0_i32_0 : i32, i32, i32, i32
  }
  func.func @transform_2(%arg0: i32, %arg1: i32) -> (i32, i32, i32, i32) {
    %c1_i32 = arith.constant 1 : i32
    %0 = arith.addi %arg1, %c1_i32 : i32
    %c16_i32 = arith.constant 16 : i32
    %1 = arith.muli %0, %c16_i32 : i32
    %c1_i32_0 = arith.constant 1 : i32
    %2 = arith.addi %1, %c1_i32_0 : i32
    %c0_i32 = arith.constant 0 : i32
    %c0_i32_1 = arith.constant 0 : i32
    %c0_i32_2 = arith.constant 0 : i32
    return %arg0, %2, %c0_i32, %c0_i32_1 : i32, i32, i32, i32
  }
  func.func @transform_3(%arg0: i32, %arg1: i32) -> (i32, i32) {
    %c0_i32 = arith.constant 0 : i32
    %c0_i32_0 = arith.constant 0 : i32
    %c0_i32_1 = arith.constant 0 : i32
    return %c0_i32, %c0_i32_0 : i32, i32
  }
  func.func @transform_4(%arg0: i32, %arg1: i32) -> (i32, i32) {
    %c0_i32 = arith.constant 0 : i32
    %c0_i32_0 = arith.constant 0 : i32
    %c0_i32_1 = arith.constant 0 : i32
    return %c0_i32, %c0_i32_0 : i32, i32
  }
  func.func @transform_5(%arg0: i32, %arg1: i32) -> (i32, i32) {
    %c0_i32 = arith.constant 0 : i32
    %c0_i32_0 = arith.constant 0 : i32
    %c0_i32_1 = arith.constant 0 : i32
    return %c0_i32, %c0_i32_0 : i32, i32
  }
  func.func @transform_6(%arg0: i32, %arg1: i32) -> (i32, i32) {
    %c0_i32 = arith.constant 0 : i32
    %c0_i32_0 = arith.constant 0 : i32
    %c0_i32_1 = arith.constant 0 : i32
    return %c0_i32, %c0_i32_0 : i32, i32
  }
  func.func @transform_7(%arg0: i32, %arg1: i32) -> (i32, i32, i32, i32) {
    %c0_i32 = arith.constant 0 : i32
    %c0_i32_0 = arith.constant 0 : i32
    %c0_i32_1 = arith.constant 0 : i32
    %c0_i32_2 = arith.constant 0 : i32
    %c0_i32_3 = arith.constant 0 : i32
    return %c0_i32, %c0_i32_0, %c0_i32_1, %c0_i32_2 : i32, i32, i32, i32
  }
  func.func @transform_8(%arg0: i32, %arg1: i32) -> (i32, i32) {
    %c0_i32 = arith.constant 0 : i32
    %c0_i32_0 = arith.constant 0 : i32
    %c0_i32_1 = arith.constant 0 : i32
    return %c0_i32, %c0_i32_0 : i32, i32
  }
  func.func @transform_9(%arg0: i32, %arg1: i32) -> (i32, i32) {
    %c0_i32 = arith.constant 0 : i32
    %c0_i32_0 = arith.constant 0 : i32
    %c0_i32_1 = arith.constant 0 : i32
    return %c0_i32, %c0_i32_0 : i32, i32
  }
  func.func @transform_10(%arg0: i32, %arg1: i32) -> (i32, i32) {
    %c0_i32 = arith.constant 0 : i32
    %c0_i32_0 = arith.constant 0 : i32
    %c0_i32_1 = arith.constant 0 : i32
    return %c0_i32, %c0_i32_0 : i32, i32
  }
  func.func @transform_11(%arg0: i32, %arg1: i32) -> (i32, i32, i32, i32) {
    %c0_i32 = arith.constant 0 : i32
    %c0_i32_0 = arith.constant 0 : i32
    %c0_i32_1 = arith.constant 0 : i32
    return %arg0, %arg1, %c0_i32, %c0_i32_0 : i32, i32, i32, i32
  }
}

</mosaic_0001>

<bundles_post_ra>
// kernel: c3_forward.1
= control target key start
LH: loop header
LB: loop body
LE: loop exit
PB: predicated region body
PF: predicated region fallthrough
CT: control target
= control target key end

     0   :  { %s8927_s17 = smov 0   ;;  %s8929_s18 = smov 0   ;;  %s11503_s0 = inlined_call_operand.vmem [shape: bf16[2,18,24,128], index: 0, kind: input, shape index: {}, may-alias: {0,1,2}]   ;;  %s11504_s1 = inlined_call_operand.vmem [shape: bf16[2,18,24,128], index: 1, kind: input, shape index: {}, may-alias: {0,1,2}]   ;;  %s11505_s2 = inlined_call_operand.vmem [shape: bf16[2,18,24,128], index: 2, kind: input, shape index: {}, may-alias: {0,1,2}]   ;;  %s11506_s3 = inlined_call_operand.vmem [shape: bf16[128,128], index: 3, kind: input, shape index: {}]   ;;  %s11507_s4 = inlined_call_operand.vmem [shape: f32[1,128], index: 4, kind: input, shape index: {}]   ;;  %s11508_s5 = inlined_call_operand.vmem [shape: bf16[128,128], index: 5, kind: input, shape index: {}]   ;;  %s11509_s6 = inlined_call_operand.vmem [shape: f32[1,128], index: 6, kind: input, shape index: {}]   ;;  %s11510_s7 = inlined_call_operand.vmem [shape: bf16[3,3,128,128], index: 7, kind: input, shape index: {}]   ;;  %s11511_s8 = inlined_call_operand.vmem [shape: f32[1,128], index: 8, kind: input, shape index: {}]   ;;  %s11512_s9 = inlined_call_operand.vmem [shape: bf16[128,128], index: 9, kind: input, shape index: {}]   ;;  %s11513_s10 = inlined_call_operand.vmem [shape: f32[1,128], index: 10, kind: input, shape index: {}]   ;;  %s11514_s11 = inlined_call_operand.vmem [shape: f32[2,16,16,128], index: 11, kind: output, shape index: {}]  }
   0x1   :  { %s8931_s19 = smov 0  }
   0x2 LB: > { %s33_s20 = sadd.s32 1, %s8856_s18  ;;  %p6401_p0 = scmp.ge.s32.totalorder %s8860_s19, 1  ;;  %s8860_s19 = sphi %s8931_s19, %s21_s19   ;;  %s8856_s18 = sphi %s8929_s18, %s11705_s18   ;;  %s8852_s17 = sphi %s8927_s17, %s11704_s17  }
   0x3   : > { %p35_p1 = scmp.ge.s32.totalorder %s33_s20, 2  ;;  %p421_p2 = scmp.lt.s32.totalorder %s8860_s19, 3 }
   0x5   : > { %s11707_s20 = smov (%p35_p1, %s33_s20), 0  ;;  %p422_p3 = pnand %p6401_p0, %p421_p2 }
   0x7   : > { %425 = sbr.rel (%p422_p3) target bundleno = 1447 (0x5a7), region = 64 }
   0xc   : > { %v8049_v0 = vld [vmem:[%s11506_s3 + $0x38] sm:$0xff]   ;;  %v8862_v1 = vmov 0.0   ;;  %v8050_v2 = vld [vmem:[%s11506_s3 + $0x30] sm:$0xff]   ;;  %vm8863_vm0 = vmmov 0   ;;  %p505_p4 = scmp.lt.s32.totalorder %s8852_s17, 1  ;;  %v8051_v3 = vld [vmem:[%s11506_s3 + $0x28] sm:$0xff]  }
   0xd   : > { %7289 = vmatprep.subr.bf16.mxu0 %v8862_v1  ;;  %7413 = vmatprep.subr.bf16.mxu1 %v8862_v1  ;;  %v8052_v4 = vld [vmem:[%s11506_s3 + $0x20] sm:$0xff]   ;;  %v8053_v14 = vld [vmem:[%s11506_s3 + $0x18] sm:$0xff]   ;;  %v8054_v22 = vld [vmem:[%s11506_s3 + $0x10] sm:$0xff]   ;;  %vm3390_vm1 = vcmask 1046528   ;;  %vm8866_vm3 = vmmov 1  }
   0xe   : > { %7290 = vmatpush3.bf16.msra.mxu0 %v8049_v0  ;;  %7305 = vmatprep.mubr.msk.bf16.mxu0 %vm8863_vm0, %v8862_v1  ;;  %s11709_s17 = smov (!%p505_p4, %s8852_s17), 1  ;;  %v8055_v23 = vld [vmem:[%s11506_s3 + $0x8] sm:$0xff]   ;;  %v8056_v24 = vld [vmem:[%s11506_s3] sm:$0xff]   ;;  %v8081_v43 = vld [vmem:[%s11508_s5 + $0x38] sm:$0xff]   ;;  %vm2714_vm6 = vsmask.f32 7424 }
   0xf   : > { %7291 = vmatprep.subr.bf16.mxu0 %v8862_v1  ;;  %7429 = vmatprep.mubr.msk.bf16.mxu1 %vm8863_vm0, %v8862_v1  ;;  %s8964_s27 = smul.u32 216, %s11709_s17  ;;  %v8082_v45 = vld [vmem:[%s11508_s5 + $0x30] sm:$0xff]   ;;  %v8083_v46 = vld [vmem:[%s11508_s5 + $0x28] sm:$0xff]   ;;  %v8084_v49 = vld [vmem:[%s11508_s5 + $0x20] sm:$0xff]   ;;  %s6978_s29 = sshll.u32 %s11709_s17, 8 }
  0x10   : > { %7414 = vmatpush3.bf16.msra.mxu1 %v8081_v43  ;;  %v8085_v50 = vld [vmem:[%s11508_s5 + $0x18] sm:$0xff]   ;;  %v8087_v52 = vld [vmem:[%s11508_s5 + $0x10] sm:$0xff]   ;;  %v8088_v55 = vld [vmem:[%s11508_s5 + $0x8] sm:$0xff]   ;;  %s11367_s12 = scalar_lea.vmem %s11514_s11, %s6978_s29 }
  0x11   : > { %s8974_s13 = scalar_lea.vmem %s11503_s0, %s8964_s27  ;;  %7415 = vmatprep.subr.bf16.mxu1 %v8862_v1  ;;  %s6975_s14 = sadd.s32 192, %s8964_s27  ;;  %v8090_v58 = vld [vmem:[%s11508_s5] sm:$0xff]  }
  0x12   : > { %7292 = vmatpush3.bf16.msra.mxu0 %v8050_v2  ;;  %v560_v5 = vld [vmem:[%s8974_s13] sm:$0xff]   ;;  %v562_v6 = vld [vmem:[%s8974_s13 + $0x8] sm:$0xff]   ;;  %v564_v7 = vld [vmem:[%s8974_s13 + $0x10] sm:$0xff]   ;;  %s530_s21 = scalar_lea.vmem %s11504_s1, %s6975_s14  ;;  %s6977_s26 = sadd.s32 204, %s8964_s27 }
  0x13   : > { %7293 = vmatprep.subr.bf16.mxu0 %v8862_v1  ;;  %608 = vst [vmem:[#allocation2] sm:$0xff] %v560_v5   ;;  %610 = vst [vmem:[#allocation2 + $0x8] sm:$0xff] %v562_v6   ;;  %v566_v8 = vld [vmem:[%s8974_s13 + $0x18] sm:$0xff]   ;;  %v568_v9 = vld [vmem:[%s8974_s13 + $0x20] sm:$0xff]   ;;  %s544_s30 = scalar_lea.vmem %s11505_s2, %s6977_s26 }
  0x14   : > { %612 = vst [vmem:[#allocation2 + $0x10] sm:$0xff] %v564_v7   ;;  %v570_v10 = vld [vmem:[%s8974_s13 + $0x28] sm:$0xff]   ;;  %614 = vst [vmem:[#allocation2 + $0x18] sm:$0xff] %v566_v8   ;;  %v572_v11 = vld [vmem:[%s8974_s13 + $0x30] sm:$0xff]   ;;  %7416 = vmatpush3.bf16.msra.mxu1 %v8082_v45 }
  0x15   : > { %616 = vst [vmem:[#allocation2 + $0x20] sm:$0xff] %v568_v9   ;;  %618 = vst [vmem:[#allocation2 + $0x28] sm:$0xff] %v570_v10   ;;  %v574_v12 = vld [vmem:[%s8974_s13 + $0x38] sm:$0xff]   ;;  %v576_v13 = vld [vmem:[%s8974_s13 + $0x40] sm:$0xff]   ;;  %7417 = vmatprep.subr.bf16.mxu1 %v8862_v1 }
  0x16   : > { %7294 = vmatpush3.bf16.msra.mxu0 %v8051_v3  ;;  %620 = vst [vmem:[#allocation2 + $0x30] sm:$0xff] %v572_v11   ;;  %622 = vst [vmem:[#allocation2 + $0x38] sm:$0xff] %v574_v12   ;;  %v578_v15 = vld [vmem:[%s8974_s13 + $0x48] sm:$0xff]   ;;  %v580_v16 = vld [vmem:[%s8974_s13 + $0x50] sm:$0xff]  }
  0x17   : > { %7295 = vmatprep.subr.bf16.mxu0 %v8862_v1  ;;  %624 = vst [vmem:[#allocation2 + $0x40] sm:$0xff] %v576_v13   ;;  %v582_v17 = vld [vmem:[%s8974_s13 + $0x58] sm:$0xff]   ;;  %626 = vst [vmem:[#allocation2 + $0x48] sm:$0xff] %v578_v15   ;;  %v584_v18 = vld [vmem:[%s8974_s13 + $0x60] sm:$0xff]  }
  0x18   : > { %628 = vst [vmem:[#allocation2 + $0x50] sm:$0xff] %v580_v16   ;;  %630 = vst [vmem:[#allocation2 + $0x58] sm:$0xff] %v582_v17   ;;  %v586_v19 = vld [vmem:[%s8974_s13 + $0x68] sm:$0xff]   ;;  %v588_v20 = vld [vmem:[%s8974_s13 + $0x70] sm:$0xff]   ;;  %7418 = vmatpush3.bf16.msra.mxu1 %v8083_v46 }
  0x19   : > { %632 = vst [vmem:[#allocation2 + $0x60] sm:$0xff] %v584_v18   ;;  %634 = vst [vmem:[#allocation2 + $0x68] sm:$0xff] %v586_v19   ;;  %v590_v21 = vld [vmem:[%s8974_s13 + $0x78] sm:$0xff]   ;;  %v592_v26 = vld [vmem:[%s8974_s13 + $0x80] sm:$0xff]   ;;  %7419 = vmatprep.subr.bf16.mxu1 %v8862_v1 }
  0x1a   : > { %7296 = vmatpush3.bf16.msra.mxu0 %v8052_v4  ;;  %636 = vst [vmem:[#allocation2 + $0x70] sm:$0xff] %v588_v20   ;;  %638 = vst [vmem:[#allocation2 + $0x78] sm:$0xff] %v590_v21   ;;  %v8057_v25 = vld [vmem:[#allocation2] sm:$0xff]   ;;  %v594_v27 = vld [vmem:[%s8974_s13 + $0x88] sm:$0xff]  }
  0x1b   : > { %7297 = vmatprep.subr.bf16.mxu0 %v8862_v1  ;;  %640 = vst [vmem:[#allocation2 + $0x80] sm:$0xff] %v592_v26   ;;  %642 = vst [vmem:[#allocation2 + $0x88] sm:$0xff] %v594_v27   ;;  %v8058_v28 = vld [vmem:[#allocation2 + $0x8] sm:$0xff]   ;;  %v596_v29 = vld [vmem:[%s8974_s13 + $0x90] sm:$0xff]  }
  0x1c   : > { %644 = vst [vmem:[#allocation2 + $0x90] sm:$0xff] %v596_v29   ;;  %v8059_v30 = vld [vmem:[#allocation2 + $0x10] sm:$0xff]   ;;  %v598_v31 = vld [vmem:[%s8974_s13 + $0x98] sm:$0xff]   ;;  %v600_v33 = vld [vmem:[%s8974_s13 + $0xa0] sm:$0xff]   ;;  %7420 = vmatpush3.bf16.msra.mxu1 %v8084_v49 }
  0x1d   : > { %646 = vst [vmem:[#allocation2 + $0x98] sm:$0xff] %v598_v31   ;;  %v8060_v32 = vld [vmem:[#allocation2 + $0x18] sm:$0xff]   ;;  %648 = vst [vmem:[#allocation2 + $0xa0] sm:$0xff] %v600_v33   ;;  %v8061_v34 = vld [vmem:[#allocation2 + $0x20] sm:$0xff]   ;;  %7421 = vmatprep.subr.bf16.mxu1 %v8862_v1 }
  0x1e   : > { %7298 = vmatpush3.bf16.msra.mxu0 %v8053_v14  ;;  %v602_v35 = vld [vmem:[%s8974_s13 + $0xa8] sm:$0xff]   ;;  %v604_v37 = vld [vmem:[%s8974_s13 + $0xb0] sm:$0xff]   ;;  %v606_v39 = vld [vmem:[%s8974_s13 + $0xb8] sm:$0xff]  }
  0x1f   : > { %7299 = vmatprep.subr.bf16.mxu0 %v8862_v1  ;;  %650 = vst [vmem:[#allocation2 + $0xa8] sm:$0xff] %v602_v35   ;;  %v8062_v36 = vld [vmem:[#allocation2 + $0x28] sm:$0xff]   ;;  %652 = vst [vmem:[#allocation2 + $0xb0] sm:$0xff] %v604_v37   ;;  %v8063_v38 = vld [vmem:[#allocation2 + $0x30] sm:$0xff]  }
  0x20   : > { %654 = vst [vmem:[#allocation2 + $0xb8] sm:$0xff] %v606_v39   ;;  %v8064_v40 = vld [vmem:[#allocation2 + $0x38] sm:$0xff]   ;;  %v8065_v41 = vld [vmem:[#allocation2 + $0x40] sm:$0xff]   ;;  %v8066_v42 = vld [vmem:[#allocation2 + $0x48] sm:$0xff]   ;;  %7422 = vmatpush3.bf16.msra.mxu1 %v8085_v50 }
  0x21   : > { %v8067_v44 = vld [vmem:[#allocation2 + $0x50] sm:$0xff]   ;;  %v8068_v47 = vld [vmem:[#allocation2 + $0x58] sm:$0xff]   ;;  %v656_v48 = vld [vmem:[%s530_s21] sm:$0xff]   ;;  %7423 = vmatprep.subr.bf16.mxu1 %v8862_v1 }
  0x22   : > { %7300 = vmatpush3.bf16.msra.mxu0 %v8054_v22  ;;  %660 = vst [vmem:[#allocation2 + $0xc0] sm:$0xff] %v656_v48   ;;  %v8069_v51 = vld [vmem:[#allocation2 + $0x60] sm:$0xff]   ;;  %v658_v53 = vld [vmem:[%s530_s21 + $0x8] sm:$0xf]  ;;  %v8071_v59 = vld [vmem:[#allocation2 + $0x70] sm:$0xff]  }
  0x23   : > { %7301 = vmatprep.subr.bf16.mxu0 %v8862_v1  ;;  %v663_v54 = vld [vmem:[%s544_s30] sm:$0xff]   ;;  %662 = vst [vmem:[#allocation2 + $0xc8] sm:$0xf] %v658_v53  ;;  %v8070_v56 = vld [vmem:[#allocation2 + $0x68] sm:$0xff]   ;;  %v8072_v60 = vld [vmem:[#allocation2 + $0x78] sm:$0xff]  }
  0x24   : > { %667 = vst [vmem:[#allocation2 + $0xcc] sm:$0xff] %v663_v54   ;;  %7424 = vmatpush3.bf16.msra.mxu1 %v8087_v52  ;;  %v665_v57 = vld [vmem:[%s544_s30 + $0x8] sm:$0xf]  ;;  %v8073_v61 = vld [vmem:[#allocation2 + $0x80] sm:$0xff]   ;;  %v8075_v63 = vld [vmem:[#allocation2 + $0x90] sm:$0xff]  }
  0x25   : > { %7425 = vmatprep.subr.bf16.mxu1 %v8862_v1  ;;  %669 = vst [vmem:[#allocation2 + $0xd4] sm:$0xf] %v665_v57  ;;  %v8074_v62 = vld [vmem:[#allocation2 + $0x88] sm:$0xff]   ;;  %v8076_v0 = vld [vmem:[#allocation2 + $0x98] sm:$0xff]   ;;  %v8077_v2 = vld [vmem:[#allocation2 + $0xa0] sm:$0xff]  }
  0x26   : > { %7302 = vmatpush3.bf16.msra.mxu0 %v8055_v23  ;;  %v8078_v3 = vld [vmem:[#allocation2 + $0xa8] sm:$0xff]   ;;  %v8079_v4 = vld [vmem:[#allocation2 + $0xb0] sm:$0xff]   ;;  %v9107_v7 = vld [vmem:[%s11507_s4] ss:$0 sm:$0xff] }
  0x27   : > { %7303 = vmatprep.subr.bf16.mxu0 %v8862_v1  ;;  %v8080_v5 = vld [vmem:[#allocation2 + $0xb8] sm:$0xff]  }
  0x28   : > { %7426 = vmatpush3.bf16.msra.mxu1 %v8088_v55 }
  0x29   : > { %7427 = vmatprep.subr.bf16.mxu1 %v8862_v1  ;;  %v8086_v6 = vld [vmem:[#allocation2 + $0xc0] sm:$0xff]  }
  0x2a   : > { %7304 = vmatpush3.bf16.msra.mxu0 %v8056_v24 }
  0x2b   : > { %v8089_v13 = vld [vmem:[#allocation2 + $0xc8] sm:$0xff]  }
  0x2c   : > { %7428 = vmatpush3.bf16.msra.mxu1 %v8090_v58  ;;  %v8091_v22 = vld [vmem:[#allocation2 + $0xd0] sm:$0xff]  }
  0x2d   : > { %7306 = vmatmul.mubr.bf16.vlgmr.msra.gmra.mxu0 %v8057_v25 }
  0x2e   : > { %7309 = vmatprep.mubr.msk.bf16.mxu0 %vm8863_vm0, %v8862_v1 }
  0x35   : > { %7310 = vmatmul.mubr.bf16.gmra.mxu0 %v8058_v28 }
  0x36   : > { %7313 = vmatprep.mubr.msk.bf16.mxu0 %vm8863_vm0, %v8862_v1 }
  0x3d   : > { %7314 = vmatmul.mubr.bf16.gmra.mxu0 %v8059_v30 }
  0x3e   : > { %7317 = vmatprep.mubr.msk.bf16.mxu0 %vm8863_vm0, %v8862_v1 }
  0x45   : > { %7318 = vmatmul.mubr.bf16.gmra.mxu0 %v8060_v32 }
  0x46   : > { %7321 = vmatprep.mubr.msk.bf16.mxu0 %vm8863_vm0, %v8862_v1 }
  0x4d   : > { %7322 = vmatmul.mubr.bf16.gmra.mxu0 %v8061_v34 }
  0x4e   : > { %7325 = vmatprep.mubr.msk.bf16.mxu0 %vm8863_vm0, %v8862_v1 }
  0x55   : > { %7326 = vmatmul.mubr.bf16.gmra.mxu0 %v8062_v36 }
  0x56   : > { %7329 = vmatprep.mubr.msk.bf16.mxu0 %vm8863_vm0, %v8862_v1 }
  0x5d   : > { %7330 = vmatmul.mubr.bf16.gmra.mxu0 %v8063_v38 }
  0x5e   : > { %7333 = vmatprep.mubr.msk.bf16.mxu0 %vm8863_vm0, %v8862_v1 }
  0x65   : > { %7334 = vmatmul.mubr.bf16.gmra.mxu0 %v8064_v40 }
  0x66   : > { %7337 = vmatprep.mubr.msk.bf16.mxu0 %vm8863_vm0, %v8862_v1 }
  0x6d   : > { %7338 = vmatmul.mubr.bf16.gmra.mxu0 %v8065_v41 }
  0x6e   : > { %7341 = vmatprep.mubr.msk.bf16.mxu0 %vm8863_vm0, %v8862_v1 }
  0x75   : > { %7342 = vmatmul.mubr.bf16.gmra.mxu0 %v8066_v42 }
  0x76   : > { %7345 = vmatprep.mubr.msk.bf16.mxu0 %vm8863_vm0, %v8862_v1 }
  0x7d   : > { %7346 = vmatmul.mubr.bf16.gmra.mxu0 %v8067_v44 }
  0x7e   : > { %7349 = vmatprep.mubr.msk.bf16.mxu0 %vm8863_vm0, %v8862_v1 }
  0x85   : > { %7350 = vmatmul.mubr.bf16.gmra.mxu0 %v8068_v47 }
  0x86   : > { %7353 = vmatprep.mubr.msk.bf16.mxu0 %vm8863_vm0, %v8862_v1 }
  0x8d   : > { %7354 = vmatmul.mubr.bf16.gmra.mxu0 %v8069_v51 }
  0x8e   : > { %7357 = vmatprep.mubr.msk.bf16.mxu0 %vm8863_vm0, %v8862_v1 }
  0x95   : > { %7358 = vmatmul.mubr.bf16.gmra.mxu0 %v8070_v56 }
  0x96   : > { %7361 = vmatprep.mubr.msk.bf16.mxu0 %vm8863_vm0, %v8862_v1 }
  0x9d   : > { %7362 = vmatmul.mubr.bf16.gmra.mxu0 %v8071_v59 }
  0x9e   : > { %7365 = vmatprep.mubr.msk.bf16.mxu0 %vm8863_vm0, %v8862_v1 }
  0xa5   : > { %7366 = vmatmul.mubr.bf16.gmra.mxu0 %v8072_v60 }
  0xa6   : > { %7369 = vmatprep.mubr.msk.bf16.mxu0 %vm8863_vm0, %v8862_v1 }
  0xad   : > { %7370 = vmatmul.mubr.bf16.gmra.mxu0 %v8073_v61 }
  0xae   : > { %7373 = vmatprep.mubr.msk.bf16.mxu0 %vm8863_vm0, %v8862_v1 }
  0xb5   : > { %7374 = vmatmul.mubr.bf16.gmra.mxu0 %v8074_v62 }
  0xb6   : > { %7377 = vmatprep.mubr.msk.bf16.mxu0 %vm8863_vm0, %v8862_v1 }
  0xbd   : > { %7378 = vmatmul.mubr.bf16.gmra.mxu0 %v8075_v63 }
  0xbe   : > { %7381 = vmatprep.mubr.msk.bf16.mxu0 %vm8863_vm0, %v8862_v1 }
  0xc5   : > { %7382 = vmatmul.mubr.bf16.gmra.mxu0 %v8076_v0 }
  0xc6   : > { %7385 = vmatprep.mubr.msk.bf16.mxu0 %vm8863_vm0, %v8862_v1 }
  0xcd   : > { %7386 = vmatmul.mubr.bf16.gmra.mxu0 %v8077_v2 }
  0xce   : > { %7389 = vmatprep.mubr.msk.bf16.mxu0 %vm8863_vm0, %v8862_v1 }
  0xd5   : > { %7390 = vmatmul.mubr.bf16.gmra.mxu0 %v8078_v3 }
  0xd6   : > { %7393 = vmatprep.mubr.msk.bf16.mxu0 %vm8863_vm0, %v8862_v1 }
  0xdd   : > { %7394 = vmatmul.mubr.bf16.gmra.mxu0 %v8079_v4 }
  0xde   : > { %7397 = vmatprep.mubr.msk.bf16.mxu0 %vm8863_vm0, %v8862_v1 }
  0xe5   : > { %7398 = vmatmul.mubr.bf16.gmra.mxu0 %v8080_v5 }
  0xe6   : > { %7401 = vmatprep.mubr.msk.bf16.mxu0 %vm8863_vm0, %v8862_v1 }
  0xed   : > { %v991_v8 = vpop.f32.mrf.mxu0  ;;  %7402 = vmatmul.mubr.bf16.gmra.mxu0 %v8086_v6 }
  0xee   : > { %v9110_v9 = vadd.f32 %v9107_v7, %v991_v8  ;;  %7405 = vmatprep.mubr.msk.bf16.mxu0 %vm8863_vm0, %v8862_v1 }
  0xef   : > { %v7307_v10 = vpop.f32.mrf.mxu0 }
  0xf0   : > { %v6443_v11 = vmul.f32 -1.442695, %v9110_v9 }
  0xf1   : > { %v994_v12 = vpop.f32.mrf.mxu0 }
  0xf2   : > { %8172 = vpow2.f32 %v6443_v11  ;;  %v9116_v14 = vadd.f32 %v9107_v7, %v994_v12 }
  0xf3   : > { %v7308_v15 = vpop.f32.mrf.mxu0 }
  0xf4   : > { %v6444_v16 = vmul.f32 -1.442695, %v9116_v14 }
  0xf5   : > { %v999_v17 = vpop.f32.mrf.mxu0  ;;  %7406 = vmatmul.mubr.bf16.gmra.mxu0 %v8089_v13 }
  0xf6   : > { %8174 = vpow2.f32 %v6444_v16  ;;  %v9120_v18 = vadd.f32 %v9107_v7, %v999_v17  ;;  %7409 = vmatprep.mubr.msk.bf16.mxu0 %vm8863_vm0, %v8862_v1 }
  0xf7   : > { %v7311_v19 = vpop.f32.mrf.mxu0 }
  0xf8   : > { %v6445_v20 = vmul.f32 -1.442695, %v9120_v18 }
  0xf9   : > { %v1002_v21 = vpop.f32.mrf.mxu0 }
  0xfa   : > { %8176 = vpow2.f32 %v6445_v20  ;;  %v9126_v23 = vadd.f32 %v9107_v7, %v1002_v21 }
  0xfb   : > { %v7312_v24 = vpop.f32.mrf.mxu0 }
  0xfc   : > { %v6446_v25 = vmul.f32 -1.442695, %v9126_v23 }
  0xfd   : > { %v1007_v26 = vpop.f32.mrf.mxu0  ;;  %7410 = vmatmul.mubr.bf16.gmra.mxu0 %v8091_v22 }
  0xfe   : > { %8178 = vpow2.f32 %v6446_v25  ;;  %v9130_v27 = vadd.f32 %v9107_v7, %v1007_v26 }
  0xff   : > { %v8173_v28 = vpop.eup %8172  ;;  %v7315_v29 = vpop.f32.mrf.mxu0 }
 0x100   : > { %v1368_v30 = vadd.f32 1.0, %v8173_v28  ;;  %v6447_v31 = vmul.f32 -1.442695, %v9130_v27 }
 0x101   : > { %v1010_v32 = vpop.f32.mrf.mxu0 }
 0x102   : > { %v9134_v33 = vadd.f32 %v9107_v7, %v1010_v32  ;;  %8180 = vpow2.f32 %v6447_v31 }
 0x103   : > { %v8175_v34 = vpop.eup %8174  ;;  %v7316_v35 = vpop.f32.mrf.mxu0  ;;  %8182 = vrcp.f32 %v1368_v30 }
 0x104   : > { %v1369_v36 = vadd.f32 1.0, %v8175_v34  ;;  %v6448_v37 = vmul.f32 -1.442695, %v9134_v33 }
 0x105   : > { %v1015_v38 = vpop.f32.mrf.mxu0 }
 0x106   : > { %8184 = vrcp.f32 %v1369_v36  ;;  %v9138_v39 = vadd.f32 %v9107_v7, %v1015_v38 }
 0x107   : > { %v8177_v40 = vpop.eup %8176  ;;  %8186 = vpow2.f32 %v6448_v37  ;;  %v7319_v41 = vpop.f32.mrf.mxu0 }
 0x108   : > { %v1370_v42 = vadd.f32 1.0, %v8177_v40  ;;  %v6449_v43 = vmul.f32 -1.442695, %v9138_v39 }
 0x109   : > { %v1018_v44 = vpop.f32.mrf.mxu0 }
 0x10a   : > { %v9142_v45 = vadd.f32 %v9107_v7, %v1018_v44  ;;  %8188 = vpow2.f32 %v6449_v43 }
 0x10b   : > { %v8179_v46 = vpop.eup %8178  ;;  %v7320_v47 = vpop.f32.mrf.mxu0  ;;  %8190 = vrcp.f32 %v1370_v42 }
 0x10c   : > { %v1371_v48 = vadd.f32 1.0, %v8179_v46  ;;  %v6450_v49 = vmul.f32 -1.442695, %v9142_v45 }
 0x10d   : > { %v1023_v50 = vpop.f32.mrf.mxu0 }
 0x10e   : > { %8192 = vrcp.f32 %v1371_v48  ;;  %v9146_v51 = vadd.f32 %v9107_v7, %v1023_v50 }
 0x10f   : > { %8194 = vpow2.f32 %v6450_v49  ;;  %v7323_v52 = vpop.f32.mrf.mxu0  ;;  %v8181_v53 = vpop.eup %8180 }
 0x110   : > { %v6451_v54 = vmul.f32 -1.442695, %v9146_v51  ;;  %v8183_v55 = vpop.eup %8182  ;;  %v1372_v56 = vadd.f32 1.0, %v8181_v53 }
 0x111   : > { %v1026_v57 = vpop.f32.mrf.mxu0  ;;  %v1530_v62 = vmul.f32 %v8183_v55, %v9110_v9 }
 0x112   : > { %8196 = vpow2.f32 %v6451_v54  ;;  %v9150_v58 = vadd.f32 %v9107_v7, %v1026_v57 }
 0x113   : > { %v8185_v59 = vpop.eup %8184  ;;  %8198 = vrcp.f32 %v1372_v56  ;;  %v7324_v60 = vpop.f32.mrf.mxu0 }
 0x114   : > { %v8187_v61 = vpop.eup %8186  ;;  %v1531_v63 = vmul.f32 %v8185_v59, %v9116_v14  ;;  %v6452_v0 = vmul.f32 -1.442695, %v9150_v58 }
 0x115   : > { %v1373_v2 = vadd.f32 1.0, %v8187_v61  ;;  %v1031_v3 = vpop.f32.mrf.mxu0 }
 0x116   : > { %8200 = vpow2.f32 %v6452_v0  ;;  %v9156_v4 = vadd.f32 %v9107_v7, %v1031_v3  ;;  %v1584_v5 = vpack.c.bf16 %v1531_v63, %v1530_v62 }
 0x117   : > { %8202 = vrcp.f32 %v1373_v2  ;;  %v7327_v6 = vpop.f32.mrf.mxu0  ;;  %v8189_v8 = vpop.eup %8188 }
 0x118   : > { %v6453_v10 = vmul.f32 -1.442695, %v9156_v4  ;;  %7430 = vmatmul.mubr.bf16.vlgmr.msra.gmra.mxu1 %v1584_v5  ;;  %v8191_v11 = vpop.eup %8190  ;;  %v1374_v12 = vadd.f32 1.0, %v8189_v8 }
 0x119   : > { %v1034_v9 = vpop.f32.mrf.mxu0  ;;  %7433 = vmatprep.mubr.msk.bf16.mxu1 %vm8863_vm0, %v8862_v1  ;;  %v1532_v17 = vmul.f32 %v8191_v11, %v9120_v18 }
 0x11a   : > { %8204 = vpow2.f32 %v6453_v10  ;;  %v9162_v13 = vadd.f32 %v9107_v7, %v1034_v9 }
 0x11b   : > { %v8193_v14 = vpop.eup %8192  ;;  %8206 = vrcp.f32 %v1374_v12  ;;  %v7328_v15 = vpop.f32.mrf.mxu0 }
 0x11c   : > { %v8195_v16 = vpop.eup %8194  ;;  %v1533_v19 = vmul.f32 %v8193_v14, %v9126_v23  ;;  %v6454_v20 = vmul.f32 -1.442695, %v9162_v13 }
 0x11d   : > { %v1375_v21 = vadd.f32 1.0, %v8195_v16  ;;  %v1039_v22 = vpop.f32.mrf.mxu0 }
 0x11e   : > { %8208 = vpow2.f32 %v6454_v20  ;;  %v9168_v24 = vadd.f32 %v9107_v7, %v1039_v22  ;;  %v1585_v25 = vpack.c.bf16 %v1533_v19, %v1532_v17  ;;  %v5611_v35 = vrot.slane %v1533_v19, 1 }
 0x11f   : > { %v8197_v26 = vpop.eup %8196  ;;  %8210 = vrcp.f32 %v1375_v21  ;;  %v7331_v28 = vpop.f32.mrf.mxu0 }
 0x120   : > { %v8199_v29 = vpop.eup %8198  ;;  %v1376_v30 = vadd.f32 1.0, %v8197_v26  ;;  %v6455_v31 = vmul.f32 -1.442695, %v9168_v24  ;;  %7434 = vmatmul.mubr.bf16.gmra.mxu1 %v1585_v25 }
 0x121   : > { %v1534_v18 = vmul.f32 %v8199_v29, %v9130_v27  ;;  %v1042_v23 = vpop.f32.mrf.mxu0  ;;  %7437 = vmatprep.mubr.msk.bf16.mxu1 %vm8863_vm0, %v8862_v1 }
 0x122   : > { %8212 = vrcp.f32 %v1376_v30  ;;  %v9175_v32 = vadd.f32 %v9107_v7, %v1042_v23 }
 0x123   : > { %v8201_v34 = vpop.eup %8200  ;;  %v5612_v36 = vrot.slane %v1534_v18, 1  ;;  %8214 = vpow2.f32 %v6455_v31  ;;  %v7332_v37 = vpop.f32.mrf.mxu0 }
 0x124   : > { %v8203_v38 = vpop.eup %8202  ;;  %v1377_v40 = vadd.f32 1.0, %v8201_v34  ;;  %v6456_v41 = vmul.f32 -1.442695, %v9175_v32 }
 0x125   : > { %v1535_v27 = vmul.f32 %v8203_v38, %v9134_v33  ;;  %v1047_v42 = vpop.f32.mrf.mxu0  ;;  %v9180_v43 = vsel %vm3390_vm1, %v5611_v35, %v5612_v36 }
 0x126   : > { %11545 = vst [vmem:[#allocation3_spill] sm:$0xff] %v9180_v43  ;;  %8216 = vrcp.f32 %v1377_v40  ;;  %v9183_v44 = vadd.f32 %v9107_v7, %v1047_v42 }
 0x127   : > { %v8205_v46 = vpop.eup %8204  ;;  %v5614_v47 = vrot.slane %v1535_v27, 1  ;;  %8218 = vpow2.f32 %v6456_v41  ;;  %v7335_v48 = vpop.f32.mrf.mxu0  ;;  %v1586_v49 = vpack.c.bf16 %v1535_v27, %v1534_v18 }
 0x128   : > { %v8207_v50 = vpop.eup %8206  ;;  %v1378_v52 = vadd.f32 1.0, %v8205_v46  ;;  %v6457_v53 = vmul.f32 -1.442695, %v9183_v44 }
 0x129   : > { %7438 = vmatmul.mubr.bf16.gmra.mxu1 %v1586_v49  ;;  %v1050_v54 = vpop.f32.mrf.mxu0  ;;  %v9187_v33 = vsel %vm3390_vm1, %v5612_v36, %v5614_v47  ;;  %v1536_v57 = vmul.f32 %v8207_v50, %v9138_v39 }
 0x12a   : > { %11546 = vst [vmem:[#allocation4_spill] sm:$0xff] %v9187_v33  ;;  %8220 = vrcp.f32 %v1378_v52  ;;  %v9190_v55 = vadd.f32 %v9107_v7, %v1050_v54  ;;  %7441 = vmatprep.mubr.msk.bf16.mxu1 %vm8863_vm0, %v8862_v1 }
 0x12b   : > { %v8209_v56 = vpop.eup %8208  ;;  %8222 = vpow2.f32 %v6457_v53  ;;  %v7336_v59 = vpop.f32.mrf.mxu0  ;;  %v5616_v5 = vrot.slane %v1536_v57, 1 }
 0x12c   : > { %v8211_v60 = vpop.eup %8210  ;;  %v1379_v61 = vadd.f32 1.0, %v8209_v56  ;;  %v6458_v62 = vmul.f32 -1.442695, %v9190_v55 }
 0x12d   : > { %v1537_v63 = vmul.f32 %v8211_v60, %v9142_v45  ;;  %v1055_v0 = vpop.f32.mrf.mxu0 }
 0x12e   : > { %8224 = vrcp.f32 %v1379_v61  ;;  %v9198_v2 = vadd.f32 %v9107_v7, %v1055_v0 }
 0x12f   : > { %v8213_v3 = vpop.eup %8212  ;;  %v5617_v6 = vrot.slane %v1537_v63, 1  ;;  %8226 = vpow2.f32 %v6458_v62  ;;  %v7339_v8 = vpop.f32.mrf.mxu0  ;;  %v1587_v10 = vpack.c.bf16 %v1537_v63, %v1536_v57 }
 0x130   : > { %v8215_v39 = vpop.eup %8214  ;;  %v1538_v11 = vmul.f32 %v8213_v3, %v9146_v51  ;;  %v6459_v12 = vmul.f32 -1.442695, %v9198_v2 }
 0x131   : > { %v1380_v9 = vadd.f32 1.0, %v8215_v39  ;;  %7442 = vmatmul.mubr.bf16.gmra.mxu1 %v1587_v10  ;;  %v1058_v14 = vpop.f32.mrf.mxu0  ;;  %v9203_v45 = vsel %vm3390_vm1, %v5616_v5, %v5617_v6 }
 0x132   : > { %11547 = vst [vmem:[#allocation5_spill] sm:$0xff] %v9203_v45  ;;  %v5619_v15 = vrot.slane %v1538_v11, 1  ;;  %8228 = vpow2.f32 %v6459_v12  ;;  %v9206_v16 = vadd.f32 %v9107_v7, %v1058_v14  ;;  %7445 = vmatprep.mubr.msk.bf16.mxu1 %vm8863_vm0, %v8862_v1 }
 0x133   : > { %v8217_v17 = vpop.eup %8216  ;;  %8230 = vrcp.f32 %v1380_v9  ;;  %v7340_v19 = vpop.f32.mrf.mxu0 }
 0x134   : > { %v8219_v51 = vpop.eup %8218  ;;  %v1539_v20 = vmul.f32 %v8217_v17, %v9150_v58  ;;  %v6460_v21 = vmul.f32 -1.442695, %v9206_v16  ;;  %v9213_v22 = vsel %vm3390_vm1, %v5617_v6, %v5619_v15 }
 0x135   : > { %11548 = vst [vmem:[#allocation6_spill] sm:$0xff] %v9213_v22  ;;  %v1381_v25 = vadd.f32 1.0, %v8219_v51  ;;  %v1063_v26 = vpop.f32.mrf.mxu0 }
 0x136   : > { %8232 = vpow2.f32 %v6460_v21  ;;  %v9216_v28 = vadd.f32 %v9107_v7, %v1063_v26  ;;  %v1588_v29 = vpack.c.bf16 %v1539_v20, %v1538_v11  ;;  %v5621_v36 = vrot.slane %v1539_v20, 1 }
 0x137   : > { %v8221_v30 = vpop.eup %8220  ;;  %8234 = vrcp.f32 %v1381_v25  ;;  %v7343_v31 = vpop.f32.mrf.mxu0 }
 0x138   : > { %v8223_v18 = vpop.eup %8222  ;;  %v1540_v23 = vmul.f32 %v8221_v30, %v9156_v4  ;;  %v6461_v58 = vmul.f32 -1.442695, %v9216_v28 }
 0x139   : > { %v1382_v34 = vadd.f32 1.0, %v8223_v18  ;;  %7446 = vmatmul.mubr.bf16.gmra.mxu1 %v1588_v29  ;;  %v1066_v35 = vpop.f32.mrf.mxu0 }
 0x13a   : > { %v5622_v37 = vrot.slane %v1540_v23, 1  ;;  %8236 = vpow2.f32 %v6461_v58  ;;  %v9221_v38 = vadd.f32 %v9107_v7, %v1066_v35  ;;  %7449 = vmatprep.mubr.msk.bf16.mxu1 %vm8863_vm0, %v8862_v1 }
 0x13b   : > { %v8225_v40 = vpop.eup %8224  ;;  %8238 = vrcp.f32 %v1382_v34  ;;  %v7344_v41 = vpop.f32.mrf.mxu0 }
 0x13c   : > { %v8227_v27 = vpop.eup %8226  ;;  %v1541_v4 = vmul.f32 %v8225_v40, %v9162_v13  ;;  %v6462_v42 = vmul.f32 -1.442695, %v9221_v38  ;;  %v9228_v46 = vsel %vm3390_vm1, %v5621_v36, %v5622_v37  ;;  %v8092_v40 = vld [vmem:[%s11510_s7 + $0x78] sm:$0xff]  }
 0x13d   : > { %11549 = vst [vmem:[#allocation7_spill] sm:$0xff] %v9228_v46  ;;  %v1383_v47 = vadd.f32 1.0, %v8227_v27  ;;  %v1071_v48 = vpop.f32.mrf.mxu0  ;;  %7537 = vmatprep.subr.bf16.mxu0 %v8092_v40 }
 0x13e   : > { %v5624_v49 = vrot.slane %v1541_v4, 1  ;;  %8240 = vpow2.f32 %v6462_v42  ;;  %v9231_v50 = vadd.f32 %v9107_v7, %v1071_v48  ;;  %v1589_v52 = vpack.c.bf16 %v1541_v4, %v1540_v23  ;;  %7538 = vmatpush3.bf16.msra.mxu0 %v8092_v40 }
 0x13f   : > { %v8229_v53 = vpop.eup %8228  ;;  %8242 = vrcp.f32 %v1383_v47  ;;  %v7347_v54 = vpop.f32.mrf.mxu0 }
 0x140   : > { %v8231_v56 = vpop.eup %8230  ;;  %v1384_v57 = vadd.f32 1.0, %v8229_v53  ;;  %v6463_v13 = vmul.f32 -1.442695, %v9231_v50  ;;  %v9235_v59 = vsel %vm3390_vm1, %v5622_v37, %v5624_v49 }
 0x141   : > { %11550 = vst [vmem:[#allocation8_spill] sm:$0xff] %v9235_v59  ;;  %7450 = vmatmul.mubr.bf16.gmra.mxu1 %v1589_v52  ;;  %v1074_v60 = vpop.f32.mrf.mxu0  ;;  %v1542_v63 = vmul.f32 %v8231_v56, %v9168_v24 }
 0x142   : > { %8244 = vrcp.f32 %v1384_v57  ;;  %v9238_v61 = vadd.f32 %v9107_v7, %v1074_v60  ;;  %7453 = vmatprep.mubr.msk.bf16.mxu1 %vm8863_vm0, %v8862_v1 }
 0x143   : > { %v8233_v62 = vpop.eup %8232  ;;  %8246 = vpow2.f32 %v6463_v13  ;;  %v7348_v0 = vpop.f32.mrf.mxu0  ;;  %v5626_v12 = vrot.slane %v1542_v63, 1 }
 0x144   : > { %v8235_v3 = vpop.eup %8234  ;;  %v1385_v5 = vadd.f32 1.0, %v8233_v62  ;;  %v6464_v6 = vmul.f32 -1.442695, %v9238_v61 }
 0x145   : > { %v1543_v8 = vmul.f32 %v8235_v3, %v9175_v32  ;;  %v1079_v10 = vpop.f32.mrf.mxu0 }
 0x146   : > { %8248 = vrcp.f32 %v1385_v5  ;;  %v9246_v39 = vadd.f32 %v9107_v7, %v1079_v10 }
 0x147   : > { %v8237_v11 = vpop.eup %8236  ;;  %v5627_v9 = vrot.slane %v1543_v8, 1  ;;  %8250 = vpow2.f32 %v6464_v6  ;;  %v7351_v14 = vpop.f32.mrf.mxu0  ;;  %v1590_v15 = vpack.c.bf16 %v1543_v8, %v1542_v63 }
 0x148   : > { %v8239_v24 = vpop.eup %8238  ;;  %v1386_v17 = vadd.f32 1.0, %v8237_v11  ;;  %v6465_v19 = vmul.f32 -1.442695, %v9246_v39 }
 0x149   : > { %v1544_v51 = vmul.f32 %v8239_v24, %v9183_v44  ;;  %7454 = vmatmul.mubr.bf16.gmra.mxu1 %v1590_v15  ;;  %v1082_v20 = vpop.f32.mrf.mxu0  ;;  %v9251_v32 = vsel %vm3390_vm1, %v5626_v12, %v5627_v9 }
 0x14a   : > { %11551 = vst [vmem:[#allocation9_spill] sm:$0xff] %v9251_v32  ;;  %8252 = vrcp.f32 %v1386_v17  ;;  %v9254_v21 = vadd.f32 %v9107_v7, %v1082_v20  ;;  %7457 = vmatprep.mubr.msk.bf16.mxu1 %vm8863_vm0, %v8862_v1 }
 0x14b   : > { %v8241_v25 = vpop.eup %8240  ;;  %v5629_v26 = vrot.slane %v1544_v51, 1  ;;  %8254 = vpow2.f32 %v6465_v19  ;;  %v7352_v29 = vpop.f32.mrf.mxu0 }
 0x14c   : > { %v8243_v30 = vpop.eup %8242  ;;  %v1387_v31 = vadd.f32 1.0, %v8241_v25  ;;  %v6466_v44 = vmul.f32 -1.442695, %v9254_v21 }
 0x14d   : > { %v1545_v18 = vmul.f32 %v8243_v30, %v9190_v55  ;;  %v1087_v23 = vpop.f32.mrf.mxu0  ;;  %v9261_v58 = vsel %vm3390_vm1, %v5627_v9, %v5629_v26  ;;  %v8093_v55 = vld [vmem:[%s11510_s7 + $0x70] sm:$0xff]  }
 0x14e   : > { %11552 = vst [vmem:[#allocation10_spill] sm:$0xff] %v9261_v58  ;;  %8256 = vrcp.f32 %v1387_v31  ;;  %v9264_v34 = vadd.f32 %v9107_v7, %v1087_v23  ;;  %7539 = vmatprep.subr.bf16.mxu0 %v8093_v55 }
 0x14f   : > { %v8245_v35 = vpop.eup %8244  ;;  %8258 = vpow2.f32 %v6466_v44  ;;  %v7355_v36 = vpop.f32.mrf.mxu0  ;;  %v1591_v37 = vpack.c.bf16 %v1545_v18, %v1544_v51  ;;  %v5631_v48 = vrot.slane %v1545_v18, 1  ;;  %7540 = vmatpush3.bf16.msra.mxu0 %v8093_v55 }
 0x150   : > { %v8247_v41 = vpop.eup %8246  ;;  %v1546_v27 = vmul.f32 %v8245_v35, %v9198_v2  ;;  %v6467_v4 = vmul.f32 -1.442695, %v9264_v34 }
 0x151   : > { %v1388_v42 = vadd.f32 1.0, %v8247_v41  ;;  %7458 = vmatmul.mubr.bf16.gmra.mxu1 %v1591_v37  ;;  %v1090_v47 = vpop.f32.mrf.mxu0 }
 0x152   : > { %v5632_v49 = vrot.slane %v1546_v27, 1  ;;  %8260 = vpow2.f32 %v6467_v4  ;;  %v9275_v52 = vadd.f32 %v9107_v7, %v1090_v47  ;;  %7461 = vmatprep.mubr.msk.bf16.mxu1 %vm8863_vm0, %v8862_v1 }
 0x153   : > { %v8249_v53 = vpop.eup %8248  ;;  %8262 = vrcp.f32 %v1388_v42  ;;  %v7356_v54 = vpop.f32.mrf.mxu0 }
 0x154   : > { %v8251_v2 = vpop.eup %8250  ;;  %v1547_v56 = vmul.f32 %v8249_v53, %v9206_v16  ;;  %v6468_v57 = vmul.f32 -1.442695, %v9275_v52  ;;  %v9282_v13 = vsel %vm3390_vm1, %v5631_v48, %v5632_v49 }
 0x155   : > { %11553 = vst [vmem:[#allocation11_spill] sm:$0xff] %v9282_v13  ;;  %v1389_v60 = vadd.f32 1.0, %v8251_v2  ;;  %v1095_v62 = vpop.f32.mrf.mxu0 }
 0x156   : > { %v5634_v63 = vrot.slane %v1547_v56, 1  ;;  %8264 = vpow2.f32 %v6468_v57  ;;  %v9285_v0 = vadd.f32 %v9107_v7, %v1095_v62  ;;  %v1592_v3 = vpack.c.bf16 %v1547_v56, %v1546_v27 }
 0x157   : > { %v8253_v5 = vpop.eup %8252  ;;  %8266 = vrcp.f32 %v1389_v60  ;;  %v7359_v6 = vpop.f32.mrf.mxu0 }
 0x158   : > { %v8255_v8 = vpop.eup %8254  ;;  %v6469_v16 = vmul.f32 -1.442695, %v9285_v0  ;;  %v9289_v10 = vsel %vm3390_vm1, %v5632_v49, %v5634_v63  ;;  %v1548_v11 = vmul.f32 %v8253_v5, %v9216_v28 }
 0x159   : > { %11554 = vst [vmem:[#allocation12_spill] sm:$0xff] %v9289_v10  ;;  %v1390_v12 = vadd.f32 1.0, %v8255_v8  ;;  %7462 = vmatmul.mubr.bf16.gmra.mxu1 %v1592_v3  ;;  %v1098_v9 = vpop.f32.mrf.mxu0 }
 0x15a   : > { %8268 = vpow2.f32 %v6469_v16  ;;  %v9293_v14 = vadd.f32 %v9107_v7, %v1098_v9  ;;  %7465 = vmatprep.mubr.msk.bf16.mxu1 %vm8863_vm0, %v8862_v1  ;;  %v5636_v20 = vrot.slane %v1548_v11, 1 }
 0x15b   : > { %v8257_v15 = vpop.eup %8256  ;;  %8270 = vrcp.f32 %v1390_v12  ;;  %v7360_v24 = vpop.f32.mrf.mxu0 }
 0x15c   : > { %v8259_v17 = vpop.eup %8258  ;;  %v1549_v19 = vmul.f32 %v8257_v15, %v9221_v38  ;;  %v6470_v51 = vmul.f32 -1.442695, %v9293_v14 }
 0x15d   : > { %v1391_v28 = vadd.f32 1.0, %v8259_v17  ;;  %v1103_v25 = vpop.f32.mrf.mxu0 }
 0x15e   : > { %v5637_v26 = vrot.slane %v1549_v19, 1  ;;  %8272 = vpow2.f32 %v6470_v51  ;;  %v9300_v29 = vadd.f32 %v9107_v7, %v1103_v25  ;;  %v1593_v30 = vpack.c.bf16 %v1549_v19, %v1548_v11  ;;  %v8095_v19 = vld [vmem:[%s11510_s7 + $0x38] sm:$0xff]  }
 0x15f   : > { %v8261_v31 = vpop.eup %8260  ;;  %8274 = vrcp.f32 %v1391_v28  ;;  %v7363_v44 = vpop.f32.mrf.mxu0  ;;  %7585 = vmatprep.subr.bf16.mxu1 %v8095_v19 }
 0x160   : > { %v8263_v18 = vpop.eup %8262  ;;  %v1392_v23 = vadd.f32 1.0, %v8261_v31  ;;  %v6471_v35 = vmul.f32 -1.442695, %v9300_v29  ;;  %v9304_v38 = vsel %vm3390_vm1, %v5636_v20, %v5637_v26  ;;  %7586 = vmatpush3.bf16.msra.mxu1 %v8095_v19 }
 0x161   : > { %11555 = vst [vmem:[#allocation13_spill] sm:$0xff] %v9304_v38  ;;  %v1550_v36 = vmul.f32 %v8263_v18, %v9231_v50  ;;  %7466 = vmatmul.mubr.bf16.gmra.mxu1 %v1593_v30  ;;  %v1106_v37 = vpop.f32.mrf.mxu0 }
 0x162   : > { %8276 = vrcp.f32 %v1392_v23  ;;  %v9308_v40 = vadd.f32 %v9107_v7, %v1106_v37  ;;  %7469 = vmatprep.mubr.msk.bf16.mxu1 %vm8863_vm0, %v8862_v1 }
 0x163   : > { %v8265_v55 = vpop.eup %8264  ;;  %v5639_v41 = vrot.slane %v1550_v36, 1  ;;  %8278 = vpow2.f32 %v6471_v35  ;;  %v7364_v27 = vpop.f32.mrf.mxu0  ;;  %v8096_v35 = vld [vmem:[%s11510_s7 + $0x30] sm:$0xff]  }
 0x164   : > { %v8267_v4 = vpop.eup %8266  ;;  %v1393_v42 = vadd.f32 1.0, %v8265_v55  ;;  %v6472_v47 = vmul.f32 -1.442695, %v9308_v40  ;;  %7587 = vmatprep.subr.bf16.mxu1 %v8096_v35 }
 0x165   : > { %v1551_v48 = vmul.f32 %v8267_v4, %v9238_v61  ;;  %v1111_v50 = vpop.f32.mrf.mxu0  ;;  %v9315_v49 = vsel %vm3390_vm1, %v5637_v26, %v5639_v41  ;;  %7588 = vmatpush3.bf16.msra.mxu1 %v8096_v35 }
 0x166   : > { %11556 = vst [vmem:[#allocation14_spill] sm:$0xff] %v9315_v49  ;;  %8280 = vrcp.f32 %v1393_v42  ;;  %v9318_v53 = vadd.f32 %v9107_v7, %v1111_v50 }
 0x167   : > { %v8269_v54 = vpop.eup %8268  ;;  %8282 = vpow2.f32 %v6472_v47  ;;  %v7367_v2 = vpop.f32.mrf.mxu0  ;;  %v1594_v56 = vpack.c.bf16 %v1551_v48, %v1550_v36  ;;  %v5641_v6 = vrot.slane %v1551_v48, 1 }
 0x168   : > { %v8271_v57 = vpop.eup %8270  ;;  %v1394_v60 = vadd.f32 1.0, %v8269_v54  ;;  %v6473_v62 = vmul.f32 -1.442695, %v9318_v53  ;;  %v8097_v54 = vld [vmem:[%s11510_s7 + $0x28] sm:$0xff]  }
 0x169   : > { %v1552_v63 = vmul.f32 %v8271_v57, %v9246_v39  ;;  %7470 = vmatmul.mubr.bf16.gmra.mxu1 %v1594_v56  ;;  %v1114_v61 = vpop.f32.mrf.mxu0  ;;  %7589 = vmatprep.subr.bf16.mxu1 %v8097_v54 }
 0x16a   : > { %8284 = vrcp.f32 %v1394_v60  ;;  %v9323_v3 = vadd.f32 %v9107_v7, %v1114_v61  ;;  %7473 = vmatprep.mubr.msk.bf16.mxu1 %vm8863_vm0, %v8862_v1  ;;  %7590 = vmatpush3.bf16.msra.mxu1 %v8097_v54  ;;  %v8100_v54 = vld [vmem:[%s11510_s7 + $0x60] sm:$0xff]  }
 0x16b   : > { %v8273_v5 = vpop.eup %8272  ;;  %v5642_v8 = vrot.slane %v1552_v63, 1  ;;  %8286 = vpow2.f32 %v6473_v62  ;;  %v7368_v16 = vpop.f32.mrf.mxu0 }
 0x16c   : > { %v8275_v11 = vpop.eup %8274  ;;  %v1395_v12 = vadd.f32 1.0, %v8273_v5  ;;  %v6474_v9 = vmul.f32 -1.442695, %v9323_v3  ;;  %v8098_v16 = vld [vmem:[%s11510_s7 + $0x20] sm:$0xff]  }
 0x16d   : > { %v1553_v39 = vmul.f32 %v8275_v11, %v9254_v21  ;;  %v1119_v15 = vpop.f32.mrf.mxu0  ;;  %v9330_v24 = vsel %vm3390_vm1, %v5641_v6, %v5642_v8  ;;  %7591 = vmatprep.subr.bf16.mxu1 %v8098_v16 }
 0x16e   : > { %11557 = vst [vmem:[#allocation15_spill] sm:$0xff] %v9330_v24  ;;  %8288 = vrcp.f32 %v1395_v12  ;;  %v9333_v17 = vadd.f32 %v9107_v7, %v1119_v15  ;;  %7592 = vmatpush3.bf16.msra.mxu1 %v8098_v16  ;;  %v8103_v16 = vld [vmem:[%s11510_s7 + $0x58] sm:$0xff]  }
 0x16f   : > { %v8277_v51 = vpop.eup %8276  ;;  %v5644_v20 = vrot.slane %v1553_v39, 1  ;;  %8290 = vpow2.f32 %v6474_v9  ;;  %v7371_v28 = vpop.f32.mrf.mxu0  ;;  %v1595_v25 = vpack.c.bf16 %v1553_v39, %v1552_v63 }
 0x170   : > { %v8279_v26 = vpop.eup %8278  ;;  %v6475_v21 = vmul.f32 -1.442695, %v9333_v17  ;;  %v1554_v30 = vmul.f32 %v8277_v51, %v9264_v34 }
 0x171   : > { %v1396_v31 = vadd.f32 1.0, %v8279_v26  ;;  %7474 = vmatmul.mubr.bf16.gmra.mxu1 %v1595_v25  ;;  %v1122_v44 = vpop.f32.mrf.mxu0  ;;  %v9341_v18 = vsel %vm3390_vm1, %v5642_v8, %v5644_v20 }
 0x172   : > { %11558 = vst [vmem:[#allocation16_spill] sm:$0xff] %v9341_v18  ;;  %8292 = vpow2.f32 %v6475_v21  ;;  %v9344_v23 = vadd.f32 %v9107_v7, %v1122_v44  ;;  %7477 = vmatprep.mubr.msk.bf16.mxu1 %vm8863_vm0, %v8862_v1  ;;  %v5646_v27 = vrot.slane %v1554_v30, 1 }
 0x173   : > { %v8281_v36 = vpop.eup %8280  ;;  %8294 = vrcp.f32 %v1396_v31  ;;  %v7372_v34 = vpop.f32.mrf.mxu0  ;;  %v8094_v31 = vld [vmem:[%s11510_s7 + $0x68] sm:$0xff]  }
 0x174   : > { %v8283_v37 = vpop.eup %8282  ;;  %v1555_v55 = vmul.f32 %v8281_v36, %v9275_v52  ;;  %v6476_v41 = vmul.f32 -1.442695, %v9344_v23  ;;  %7541 = vmatprep.subr.bf16.mxu0 %v8094_v31 }
 0x175   : > { %v1397_v4 = vadd.f32 1.0, %v8283_v37  ;;  %v1127_v42 = vpop.f32.mrf.mxu0  ;;  %7542 = vmatpush3.bf16.msra.mxu0 %v8094_v31 }
 0x176   : > { %v5647_v47 = vrot.slane %v1555_v55, 1  ;;  %8296 = vpow2.f32 %v6476_v41  ;;  %v9354_v48 = vadd.f32 %v9107_v7, %v1127_v42  ;;  %v1596_v50 = vpack.c.bf16 %v1555_v55, %v1554_v30  ;;  %7543 = vmatprep.subr.bf16.mxu0 %v8100_v54 }
 0x177   : > { %v8285_v2 = vpop.eup %8284  ;;  %8298 = vrcp.f32 %v1397_v4  ;;  %v7375_v52 = vpop.f32.mrf.mxu0 }
 0x178   : > { %v8287_v56 = vpop.eup %8286  ;;  %v1556_v57 = vmul.f32 %v8285_v2, %v9285_v0  ;;  %v6477_v60 = vmul.f32 -1.442695, %v9354_v48  ;;  %v9362_v62 = vsel %vm3390_vm1, %v5646_v27, %v5647_v47 }
 0x179   : > { %11559 = vst [vmem:[#allocation17_spill] sm:$0xff] %v9362_v62  ;;  %v1398_v63 = vadd.f32 1.0, %v8287_v56  ;;  %7478 = vmatmul.mubr.bf16.gmra.mxu1 %v1596_v50  ;;  %v1130_v61 = vpop.f32.mrf.mxu0  ;;  %7544 = vmatpush3.bf16.msra.mxu0 %v8100_v54 }
 0x17a   : > { %v5649_v5 = vrot.slane %v1556_v57, 1  ;;  %8300 = vpow2.f32 %v6477_v60  ;;  %v9365_v6 = vadd.f32 %v9107_v7, %v1130_v61  ;;  %7481 = vmatprep.mubr.msk.bf16.mxu1 %vm8863_vm0, %v8862_v1  ;;  %7545 = vmatprep.subr.bf16.mxu0 %v8103_v16 }
 0x17b   : > { %v8289_v8 = vpop.eup %8288  ;;  %8302 = vrcp.f32 %v1398_v63  ;;  %v7376_v0 = vpop.f32.mrf.mxu0 }
 0x17c   : > { %v8291_v11 = vpop.eup %8290  ;;  %v1557_v12 = vmul.f32 %v8289_v8, %v9293_v14  ;;  %v6478_v9 = vmul.f32 -1.442695, %v9365_v6  ;;  %v9375_v39 = vsel %vm3390_vm1, %v5647_v47, %v5649_v5  ;;  %v8099_v14 = vld [vmem:[%s11510_s7 + $0x18] sm:$0xff]  }
 0x17d   : > { %11560 = vst [vmem:[#allocation18_spill] sm:$0xff] %v9375_v39  ;;  %v1399_v15 = vadd.f32 1.0, %v8291_v11  ;;  %v1135_v19 = vpop.f32.mrf.mxu0  ;;  %7593 = vmatprep.subr.bf16.mxu1 %v8099_v14  ;;  %7546 = vmatpush3.bf16.msra.mxu0 %v8103_v16 }
 0x17e   : > { %8304 = vpow2.f32 %v6478_v9  ;;  %v9378_v51 = vadd.f32 %v9107_v7, %v1135_v19  ;;  %v1597_v20 = vpack.c.bf16 %v1557_v12, %v1556_v57  ;;  %v5651_v37 = vrot.slane %v1557_v12, 1  ;;  %7594 = vmatpush3.bf16.msra.mxu1 %v8099_v14 }
 0x17f   : > { %v8293_v28 = vpop.eup %8292  ;;  %8306 = vrcp.f32 %v1399_v15  ;;  %v7379_v25 = vpop.f32.mrf.mxu0 }
 0x180   : > { %v8295_v26 = vpop.eup %8294  ;;  %v1400_v21 = vadd.f32 1.0, %v8293_v28  ;;  %v6479_v30 = vmul.f32 -1.442695, %v9378_v51 }
 0x181   : > { %v1558_v44 = vmul.f32 %v8295_v26, %v9300_v29  ;;  %7482 = vmatmul.mubr.bf16.gmra.mxu1 %v1597_v20  ;;  %v1138_v35 = vpop.f32.mrf.mxu0  ;;  %v8101_v29 = vld [vmem:[%s11510_s7 + $0x10] sm:$0xff]   ;;  %v8104_v20 = vld [vmem:[%s11510_s7] sm:$0xff]  }
 0x182   : > { %8308 = vrcp.f32 %v1400_v21  ;;  %v9389_v36 = vadd.f32 %v9107_v7, %v1138_v35  ;;  %7485 = vmatprep.mubr.msk.bf16.mxu1 %vm8863_vm0, %v8862_v1  ;;  %7595 = vmatprep.subr.bf16.mxu1 %v8101_v29 }
 0x183   : > { %v8297_v34 = vpop.eup %8296  ;;  %v5652_v55 = vrot.slane %v1558_v44, 1  ;;  %8310 = vpow2.f32 %v6479_v30  ;;  %v7380_v41 = vpop.f32.mrf.mxu0  ;;  %7596 = vmatpush3.bf16.msra.mxu1 %v8101_v29  ;;  %v8105_v30 = vld [vmem:[%s11510_s7 + $0x50] sm:$0xff]  }
 0x184   : > { %v8299_v27 = vpop.eup %8298  ;;  %v1401_v4 = vadd.f32 1.0, %v8297_v34  ;;  %v6480_v42 = vmul.f32 -1.442695, %v9389_v36  ;;  %7547 = vmatprep.subr.bf16.mxu0 %v8105_v30 }
 0x185   : > { %v1559_v47 = vmul.f32 %v8299_v27, %v9308_v40  ;;  %v1143_v50 = vpop.f32.mrf.mxu0  ;;  %v9402_v2 = vsel %vm3390_vm1, %v5651_v37, %v5652_v55  ;;  %v8102_v40 = vld [vmem:[%s11510_s7 + $0x8] sm:$0xff]   ;;  %7548 = vmatpush3.bf16.msra.mxu0 %v8105_v30 }
 0x186   : > { %11561 = vst [vmem:[#allocation19_spill] sm:$0xff] %v9402_v2  ;;  %8312 = vrcp.f32 %v1401_v4  ;;  %v9405_v52 = vadd.f32 %v9107_v7, %v1143_v50  ;;  %7597 = vmatprep.subr.bf16.mxu1 %v8102_v40 }
 0x187   : > { %v8301_v56 = vpop.eup %8300  ;;  %v5654_v57 = vrot.slane %v1559_v47, 1  ;;  %8314 = vpow2.f32 %v6480_v42  ;;  %v7383_v60 = vpop.f32.mrf.mxu0  ;;  %v1598_v63 = vpack.c.bf16 %v1559_v47, %v1558_v44  ;;  %7598 = vmatpush3.bf16.msra.mxu1 %v8102_v40  ;;  %v9442_v42 = vld [vmem:[%s11507_s4] ss:$0 sm:$0xff] }
 0x188   : > { %v8303_v61 = vpop.eup %8302  ;;  %v1402_v5 = vadd.f32 1.0, %v8301_v56  ;;  %v6481_v8 = vmul.f32 -1.442695, %v9405_v52  ;;  %7599 = vmatprep.subr.bf16.mxu1 %v8104_v20 }
 0x189   : > { %7486 = vmatmul.mubr.bf16.gmra.mxu1 %v1598_v63  ;;  %v1146_v0 = vpop.f32.mrf.mxu0  ;;  %v9415_v11 = vsel %vm3390_vm1, %v5652_v55, %v5654_v57  ;;  %v1560_v15 = vmul.f32 %v8303_v61, %v9318_v53 }
 0x18a   : > { %11562 = vst [vmem:[#allocation20_spill] sm:$0xff] %v9415_v11  ;;  %8316 = vrcp.f32 %v1402_v5  ;;  %v9418_v12 = vadd.f32 %v9107_v7, %v1146_v0  ;;  %7489 = vmatprep.mubr.msk.bf16.mxu1 %vm8863_vm0, %v8862_v1  ;;  %v8107_v0 = vld [vmem:[%s11510_s7 + $0x40] sm:$0xff]  }
 0x18b   : > { %v8305_v9 = vpop.eup %8304  ;;  %8318 = vpow2.f32 %v6481_v8  ;;  %v7384_v19 = vpop.f32.mrf.mxu0  ;;  %v5656_v44 = vrot.slane %v1560_v15, 1  ;;  %7600 = vmatpush3.bf16.msra.mxu1 %v8104_v20 }
 0x18c   : > { %v8307_v28 = vpop.eup %8306  ;;  %v1403_v25 = vadd.f32 1.0, %v8305_v9  ;;  %v6482_v14 = vmul.f32 -1.442695, %v9418_v12 }
 0x18d   : > { %v1561_v26 = vmul.f32 %v8307_v28, %v9323_v3  ;;  %v1151_v21 = vpop.f32.mrf.mxu0 }
 0x18e   : > { %8320 = vrcp.f32 %v1403_v25  ;;  %v9429_v53 = vadd.f32 %v9107_v7, %v1151_v21  ;;  %v8864_v25 = vmov 0  }
 0x18f   : > { %v8309_v31 = vpop.eup %8308  ;;  %v5657_v35 = vrot.slane %v1561_v26, 1  ;;  %8322 = vpow2.f32 %v6482_v14  ;;  %v7387_v34 = vpop.f32.mrf.mxu0  ;;  %v1599_v37 = vpack.c.bf16 %v1561_v26, %v1560_v15  ;;  %v9465_v14 = vrot.slane %v8864_v25, 1 }
 0x190   : > { %v8311_v55 = vpop.eup %8310  ;;  %v1562_v3 = vmul.f32 %v8309_v31, %v9333_v17  ;;  %v6483_v41 = vmul.f32 -1.442695, %v9429_v53  ;;  %v8106_v17 = vld [vmem:[%s11510_s7 + $0x48] sm:$0xff]  }
 0x191   : > { %v1404_v29 = vadd.f32 1.0, %v8311_v55  ;;  %7490 = vmatmul.mubr.bf16.gmra.mxu1 %v1599_v37  ;;  %v1154_v7 = vpop.f32.mrf.mxu0  ;;  %v9437_v27 = vsel %vm3390_vm1, %v5656_v44, %v5657_v35  ;;  %7549 = vmatprep.subr.bf16.mxu0 %v8106_v17  ;;  %11565 = vst [vmem:[#allocation23_spill] sm:$0xff] %v9465_v14 }
 0x192   : > { %11563 = vst [vmem:[#allocation21_spill] sm:$0xff] %v9437_v27  ;;  %v5659_v4 = vrot.slane %v1562_v3, 1  ;;  %8324 = vpow2.f32 %v6483_v41  ;;  %v9445_v47 = vadd.f32 %v9442_v42, %v1154_v7  ;;  %7493 = vmatprep.mubr.msk.bf16.mxu1 %vm8863_vm0, %v8862_v1  ;;  %7550 = vmatpush3.bf16.msra.mxu0 %v8106_v17 }
 0x193   : > { %v8313_v50 = vpop.eup %8312  ;;  %8326 = vrcp.f32 %v1404_v29  ;;  %v7388_v54 = vpop.f32.mrf.mxu0  ;;  %7551 = vmatprep.subr.bf16.mxu0 %v8107_v0  ;;  %7553 = vmatprep.mubr.bf16.mxu0 %v9465_v14 }
 0x194   : > { %v8315_v56 = vpop.eup %8314  ;;  %v1563_v57 = vmul.f32 %v8313_v50, %v9344_v23  ;;  %v6484_v60 = vmul.f32 -1.442695, %v9445_v47  ;;  %v9455_v63 = vsel %vm3390_vm1, %v5657_v35, %v5659_v4 }
 0x195   : > { %11564 = vst [vmem:[#allocation22_spill] sm:$0xff] %v9455_v63  ;;  %v1405_v40 = vadd.f32 1.0, %v8315_v56  ;;  %v1159_v61 = vpop.f32.mrf.mxu0 }
 0x196   : > { %8328 = vpow2.f32 %v6484_v60  ;;  %v9458_v5 = vadd.f32 %v9442_v42, %v1159_v61  ;;  %v1600_v8 = vpack.c.bf16 %v1563_v57, %v1562_v3  ;;  %7552 = vmatpush3.bf16.msra.mxu0 %v8107_v0  ;;  %v5661_v26 = vrot.slane %v1563_v57, 1 }
 0x197   : > { %v8317_v16 = vpop.eup %8316  ;;  %8330 = vrcp.f32 %v1405_v40  ;;  %v7391_v23 = vpop.f32.mrf.mxu0 }
 0x198   : > { %v8319_v9 = vpop.eup %8318  ;;  %v1564_v15 = vmul.f32 %v8317_v16, %v9354_v48  ;;  %v6485_v19 = vmul.f32 -1.442695, %v9458_v5 }
 0x199   : > { %v1406_v20 = vadd.f32 1.0, %v8319_v9  ;;  %7494 = vmatmul.mubr.bf16.gmra.mxu1 %v1600_v8  ;;  %v1162_v28 = vpop.f32.mrf.mxu0 }
 0x19a   : > { %v5662_v21 = vrot.slane %v1564_v15, 1  ;;  %8332 = vpow2.f32 %v6485_v19  ;;  %v9468_v30 = vadd.f32 %v9442_v42, %v1162_v28  ;;  %7497 = vmatprep.mubr.msk.bf16.mxu1 %vm8863_vm0, %v8862_v1 }
 0x19b   : > { %v8321_v48 = vpop.eup %8320  ;;  %8334 = vrcp.f32 %v1406_v20  ;;  %v7392_v31 = vpop.f32.mrf.mxu0 }
 0x19c   : > { %v8323_v44 = vpop.eup %8322  ;;  %v1565_v35 = vmul.f32 %v8321_v48, %v9365_v6  ;;  %v6486_v34 = vmul.f32 -1.442695, %v9468_v30  ;;  %v9476_v37 = vsel %vm3390_vm1, %v5661_v26, %v5662_v21 }
 0x19d   : > { %11566 = vst [vmem:[#allocation24_spill] sm:$0xff] %v9476_v37  ;;  %v1407_v55 = vadd.f32 1.0, %v8323_v44  ;;  %v1167_v3 = vpop.f32.mrf.mxu0 }
 0x19e   : > { %v5664_v41 = vrot.slane %v1565_v35, 1  ;;  %8336 = vpow2.f32 %v6486_v34  ;;  %v9479_v29 = vadd.f32 %v9442_v42, %v1167_v3  ;;  %v1601_v7 = vpack.c.bf16 %v1565_v35, %v1564_v15 }
 0x19f   : > { %v8325_v4 = vpop.eup %8324  ;;  %8338 = vrcp.f32 %v1407_v55  ;;  %v7395_v17 = vpop.f32.mrf.mxu0 }
 0x1a0   : > { %v8327_v50 = vpop.eup %8326  ;;  %v1408_v54 = vadd.f32 1.0, %v8325_v4  ;;  %v6487_v6 = vmul.f32 -1.442695, %v9479_v29  ;;  %v9483_v56 = vsel %vm3390_vm1, %v5662_v21, %v5664_v41 }
 0x1a1   : > { %11567 = vst [vmem:[#allocation25_spill] sm:$0xff] %v9483_v56  ;;  %7498 = vmatmul.mubr.bf16.gmra.mxu1 %v1601_v7  ;;  %v1170_v57 = vpop.f32.mrf.mxu0  ;;  %v1566_v61 = vmul.f32 %v8327_v50, %v9378_v51 }
 0x1a2   : > { %8340 = vrcp.f32 %v1408_v54  ;;  %v9486_v60 = vadd.f32 %v9442_v42, %v1170_v57  ;;  %7501 = vmatprep.mubr.msk.bf16.mxu1 %vm8863_vm0, %v8862_v1 }
 0x1a3   : > { %v8329_v40 = vpop.eup %8328  ;;  %8342 = vpow2.f32 %v6487_v6  ;;  %v7396_v8 = vpop.f32.mrf.mxu0  ;;  %v5666_v28 = vrot.slane %v1566_v61, 1 }
 0x1a4   : > { %v8331_v0 = vpop.eup %8330  ;;  %v1409_v16 = vadd.f32 1.0, %v8329_v40  ;;  %v6488_v23 = vmul.f32 -1.442695, %v9486_v60 }
 0x1a5   : > { %v1567_v9 = vmul.f32 %v8331_v0, %v9389_v36  ;;  %v1175_v15 = vpop.f32.mrf.mxu0 }
 0x1a6   : > { %8344 = vrcp.f32 %v1409_v16  ;;  %v9494_v19 = vadd.f32 %v9442_v42, %v1175_v15 }
 0x1a7   : > { %v8333_v20 = vpop.eup %8332  ;;  %v5667_v25 = vrot.slane %v1567_v9, 1  ;;  %8346 = vpow2.f32 %v6488_v23  ;;  %v7399_v26 = vpop.f32.mrf.mxu0  ;;  %v1602_v21 = vpack.c.bf16 %v1567_v9, %v1566_v61 }
 0x1a8   : > { %v8335_v51 = vpop.eup %8334  ;;  %v1410_v48 = vadd.f32 1.0, %v8333_v20  ;;  %v6489_v31 = vmul.f32 -1.442695, %v9494_v19 }
 0x1a9   : > { %v1568_v44 = vmul.f32 %v8335_v51, %v9405_v52  ;;  %7502 = vmatmul.mubr.bf16.gmra.mxu1 %v1602_v21  ;;  %v1178_v35 = vpop.f32.mrf.mxu0  ;;  %v9499_v36 = vsel %vm3390_vm1, %v5666_v28, %v5667_v25 }
 0x1aa   : > { %11568 = vst [vmem:[#allocation26_spill] sm:$0xff] %v9499_v36  ;;  %8348 = vrcp.f32 %v1410_v48  ;;  %v9502_v34 = vadd.f32 %v9442_v42, %v1178_v35  ;;  %7505 = vmatprep.mubr.msk.bf16.mxu1 %vm8863_vm0, %v8862_v1 }
 0x1ab   : > { %v8337_v55 = vpop.eup %8336  ;;  %v5669_v3 = vrot.slane %v1568_v44, 1  ;;  %8350 = vpow2.f32 %v6489_v31  ;;  %v7400_v41 = vpop.f32.mrf.mxu0 }
 0x1ac   : > { %v8339_v7 = vpop.eup %8338  ;;  %v1411_v4 = vadd.f32 1.0, %v8337_v55  ;;  %v6490_v52 = vmul.f32 -1.442695, %v9502_v34 }
 0x1ad   : > { %v1569_v17 = vmul.f32 %v8339_v7, %v9418_v12  ;;  %v1183_v50 = vpop.f32.mrf.mxu0  ;;  %v9509_v54 = vsel %vm3390_vm1, %v5667_v25, %v5669_v3 }
 0x1ae   : > { %11569 = vst [vmem:[#allocation27_spill] sm:$0xff] %v9509_v54  ;;  %8352 = vrcp.f32 %v1411_v4  ;;  %v9512_v6 = vadd.f32 %v9442_v42, %v1183_v50 }
 0x1af   : > { %v8341_v57 = vpop.eup %8340  ;;  %8354 = vpow2.f32 %v6490_v52  ;;  %v1603_v40 = vpack.c.bf16 %v1569_v17, %v1568_v44  ;;  %v7403_v61 = vpop.f32.mrf.mxu0  ;;  %v5671_v9 = vrot.slane %v1569_v17, 1 }
 0x1b0   : > { %v8343_v8 = vpop.eup %8342  ;;  %v1570_v0 = vmul.f32 %v8341_v57, %v9429_v53  ;;  %v6491_v16 = vmul.f32 -1.442695, %v9512_v6 }
 0x1b1   : > { %v1412_v23 = vadd.f32 1.0, %v8343_v8  ;;  %7506 = vmatmul.mubr.bf16.gmra.mxu1 %v1603_v40  ;;  %v1186_v12 = vpop.f32.mrf.mxu0 }
 0x1b2   : > { %v5672_v15 = vrot.slane %v1570_v0, 1  ;;  %7509 = vmatprep.mubr.msk.bf16.mxu1 %vm8863_vm0, %v8862_v1  ;;  %8356 = vpow2.f32 %v6491_v16  ;;  %v9519_v20 = vadd.f32 %v9442_v42, %v1186_v12 }
 0x1b3   : > { %v8345_v28 = vpop.eup %8344  ;;  %8358 = vrcp.f32 %v1412_v23  ;;  %v7404_v25 = vpop.f32.mrf.mxu0 }
 0x1b4   : > { %v8347_v26 = vpop.eup %8346  ;;  %v1571_v53 = vmul.f32 %v8345_v28, %v9445_v47  ;;  %v6492_v21 = vmul.f32 -1.442695, %v9519_v20  ;;  %v9524_v51 = vsel %vm3390_vm1, %v5671_v9, %v5672_v15 }
 0x1b5   : > { %11570 = vst [vmem:[#allocation28_spill] sm:$0xff] %v9524_v51  ;;  %v1413_v48 = vadd.f32 1.0, %v8347_v26  ;;  %v1191_v31 = vpop.f32.mrf.mxu0 }
 0x1b6   : > { %v5674_v44 = vrot.slane %v1571_v53, 1  ;;  %v1604_v35 = vpack.c.bf16 %v1571_v53, %v1570_v0  ;;  %8360 = vpow2.f32 %v6492_v21  ;;  %v9527_v55 = vadd.f32 %v9442_v42, %v1191_v31 }
 0x1b7   : > { %v8349_v3 = vpop.eup %8348  ;;  %8362 = vrcp.f32 %v1413_v48  ;;  %v7407_v41 = vpop.f32.mrf.mxu0 }
 0x1b8   : > { %v8351_v7 = vpop.eup %8350  ;;  %v6493_v4 = vmul.f32 -1.442695, %v9527_v55  ;;  %v9531_v47 = vsel %vm3390_vm1, %v5672_v15, %v5674_v44  ;;  %v1572_v52 = vmul.f32 %v8349_v3, %v9458_v5 }
 0x1b9   : > { %11571 = vst [vmem:[#allocation29_spill] sm:$0xff] %v9531_v47  ;;  %v1414_v17 = vadd.f32 1.0, %v8351_v7  ;;  %7510 = vmatmul.mubr.bf16.gmra.mxu1 %v1604_v35  ;;  %v1194_v50 = vpop.f32.mrf.mxu0 }
 0x1ba   : > { %7513 = vmatprep.mubr.msk.bf16.mxu1 %vm8863_vm0, %v8862_v1  ;;  %8364 = vpow2.f32 %v6493_v4  ;;  %v9537_v57 = vadd.f32 %v9442_v42, %v1194_v50  ;;  %v5676_v23 = vrot.slane %v1572_v52, 1 }
 0x1bb   : > { %v8353_v40 = vpop.eup %8352  ;;  %8366 = vrcp.f32 %v1414_v17  ;;  %v7408_v61 = vpop.f32.mrf.mxu0 }
 0x1bc   : > { %v8355_v8 = vpop.eup %8354  ;;  %v1573_v0 = vmul.f32 %v8353_v40, %v9468_v30  ;;  %v6494_v16 = vmul.f32 -1.442695, %v9537_v57 }
 0x1bd   : > { %v1415_v5 = vadd.f32 1.0, %v8355_v8  ;;  %v1199_v12 = vpop.f32.mrf.mxu0 }
 0x1be   : > { %v5677_v9 = vrot.slane %v1573_v0, 1  ;;  %v1605_v15 = vpack.c.bf16 %v1573_v0, %v1572_v52  ;;  %8368 = vpow2.f32 %v6494_v16  ;;  %v9542_v28 = vadd.f32 %v9442_v42, %v1199_v12 }
 0x1bf   : > { %v8357_v25 = vpop.eup %8356  ;;  %8370 = vrcp.f32 %v1415_v5  ;;  %v7411_v26 = vpop.f32.mrf.mxu0 }
 0x1c0   : > { %v8359_v53 = vpop.eup %8358  ;;  %v1416_v21 = vadd.f32 1.0, %v8357_v25  ;;  %v6495_v48 = vmul.f32 -1.442695, %v9542_v28  ;;  %v9546_v30 = vsel %vm3390_vm1, %v5676_v23, %v5677_v9 }
 0x1c1   : > { %11572 = vst [vmem:[#allocation30_spill] sm:$0xff] %v9546_v30  ;;  %v1574_v31 = vmul.f32 %v8359_v53, %v9479_v29  ;;  %7514 = vmatmul.mubr.bf16.gmra.mxu1 %v1605_v15  ;;  %v1202_v44 = vpop.f32.mrf.mxu0 }
 0x1c2   : > { %7517 = vmatprep.mubr.msk.bf16.mxu1 %vm8863_vm0, %v8862_v1  ;;  %8372 = vrcp.f32 %v1416_v21  ;;  %v9552_v35 = vadd.f32 %v9442_v42, %v1202_v44 }
 0x1c3   : > { %v8361_v3 = vpop.eup %8360  ;;  %v5679_v41 = vrot.slane %v1574_v31, 1  ;;  %8374 = vpow2.f32 %v6495_v48  ;;  %v7412_v7 = vpop.f32.mrf.mxu0 }
 0x1c4   : > { %v8363_v4 = vpop.eup %8362  ;;  %v1417_v52 = vadd.f32 1.0, %v8361_v3  ;;  %v6496_v17 = vmul.f32 -1.442695, %v9552_v35 }
 0x1c5   : > { %v1575_v50 = vmul.f32 %v8363_v4, %v9486_v60  ;;  %v9557_v29 = vsel %vm3390_vm1, %v5677_v9, %v5679_v41 }
 0x1c6   : > { %11573 = vst [vmem:[#allocation31_spill] sm:$0xff] %v9557_v29  ;;  %8376 = vrcp.f32 %v1417_v52 }
 0x1c7   : > { %v8365_v40 = vpop.eup %8364  ;;  %v1606_v61 = vpack.c.bf16 %v1575_v50, %v1574_v31  ;;  %8378 = vpow2.f32 %v6496_v17  ;;  %v5681_v23 = vrot.slane %v1575_v50, 1 }
 0x1c8   : > { %v8367_v8 = vpop.eup %8366  ;;  %v1418_v42 = vadd.f32 1.0, %v8365_v40 }
 0x1c9   : > { %v1576_v0 = vmul.f32 %v8367_v8, %v9494_v19  ;;  %7518 = vmatmul.mubr.bf16.gmra.mxu1 %v1606_v61 }
 0x1ca   : > { %7521 = vmatprep.mubr.msk.bf16.mxu1 %vm8863_vm0, %v8862_v1  ;;  %8380 = vrcp.f32 %v1418_v42 }
 0x1cb   : > { %v8369_v16 = vpop.eup %8368  ;;  %v5682_v5 = vrot.slane %v1576_v0, 1 }
 0x1cc   : > { %v8371_v60 = vpop.eup %8370  ;;  %v1419_v12 = vadd.f32 1.0, %v8369_v16 }
 0x1cd   : > { %v1577_v9 = vmul.f32 %v8371_v60, %v9502_v34  ;;  %v9564_v15 = vsel %vm3390_vm1, %v5681_v23, %v5682_v5 }
 0x1ce   : > { %11574 = vst [vmem:[#allocation32_spill] sm:$0xff] %v9564_v15  ;;  %8382 = vrcp.f32 %v1419_v12 }
 0x1cf   : > { %v8373_v25 = vpop.eup %8372  ;;  %v5684_v26 = vrot.slane %v1577_v9, 1  ;;  %v1607_v53 = vpack.c.bf16 %v1577_v9, %v1576_v0  ;;  %v9586_v9 = vld [vmem:[%s11509_s6] ss:$0 sm:$0xff] }
 0x1d0   : > { %v8375_v19 = vpop.eup %8374  ;;  %v1578_v31 = vmul.f32 %v8373_v25, %v9512_v6 }
 0x1d1   : > { %7522 = vmatmul.mubr.bf16.gmra.mxu1 %v1607_v53  ;;  %v1420_v21 = vadd.f32 1.0, %v8375_v19  ;;  %v9567_v48 = vsel %vm3390_vm1, %v5682_v5, %v5684_v26 }
 0x1d2   : > { %11575 = vst [vmem:[#allocation33_spill] sm:$0xff] %v9567_v48  ;;  %7525 = vmatprep.mubr.msk.bf16.mxu1 %vm8863_vm0, %v8862_v1  ;;  %v5686_v3 = vrot.slane %v1578_v31, 1 }
 0x1d3   : > { %v8377_v44 = vpop.eup %8376  ;;  %8384 = vrcp.f32 %v1420_v21 }
 0x1d4   : > { %v8379_v34 = vpop.eup %8378  ;;  %v1579_v41 = vmul.f32 %v8377_v44, %v9519_v20 }
 0x1d5   : > { %v1421_v7 = vadd.f32 1.0, %v8379_v34 }
 0x1d6   : > { %v5687_v4 = vrot.slane %v1579_v41, 1  ;;  %v1608_v52 = vpack.c.bf16 %v1579_v41, %v1578_v31 }
 0x1d7   : > { %v8381_v17 = vpop.eup %8380  ;;  %8386 = vrcp.f32 %v1421_v7 }
 0x1d8   : > { %v1580_v50 = vmul.f32 %v8381_v17, %v9527_v55  ;;  %v1716_v40 = vpop.f32.mrf.mxu1  ;;  %v9575_v61 = vsel %vm3390_vm1, %v5686_v3, %v5687_v4 }
 0x1d9   : > { %11576 = vst [vmem:[#allocation34_spill] sm:$0xff] %v9575_v61  ;;  %7526 = vmatmul.mubr.bf16.gmra.mxu1 %v1608_v52 }
 0x1da   : > { %v5689_v6 = vrot.slane %v1580_v50, 1  ;;  %v7431_v8 = vpop.f32.mrf.mxu1  ;;  %7529 = vmatprep.mubr.msk.bf16.mxu1 %vm8863_vm0, %v8862_v1 }
 0x1db   : > { %v8383_v42 = vpop.eup %8382 }
 0x1dc   : > { %v1581_v20 = vmul.f32 %v8383_v42, %v9537_v57  ;;  %v1719_v0 = vpop.f32.mrf.mxu1  ;;  %v9581_v16 = vsel %vm3390_vm1, %v5687_v4, %v5689_v6 }
 0x1dd   : > { %11577 = vst [vmem:[#allocation35_spill] sm:$0xff] %v9581_v16 }
 0x1de   : > { %v7432_v23 = vpop.f32.mrf.mxu1  ;;  %v1609_v5 = vpack.c.bf16 %v1581_v20, %v1580_v50 }
 0x1e0   : > { %v8385_v55 = vpop.eup %8384  ;;  %v1724_v60 = vpop.f32.mrf.mxu1 }
 0x1e1   : > { %7530 = vmatmul.mubr.bf16.gmra.mxu1 %v1609_v5  ;;  %v1582_v57 = vmul.f32 %v8385_v55, %v9542_v28 }
 0x1e2   : > { %v7435_v12 = vpop.f32.mrf.mxu1  ;;  %7533 = vmatprep.mubr.msk.bf16.mxu1 %vm8863_vm0, %v8862_v1  ;;  %v11515_v1 = vmov 0.0|0.0  }
 0x1e4   : > { %v8387_v25 = vpop.eup %8386  ;;  %v1727_v26 = vpop.f32.mrf.mxu1 }
 0x1e5   : > { %v1583_v53 = vmul.f32 %v8387_v25, %v9552_v35  ;;  %v9593_v19 = vadd.f32 %v9586_v9, %v1727_v26 }
 0x1e6   : > { %v7436_v21 = vpop.f32.mrf.mxu1 }
 0x1e7   : > { %v6509_v31 = vmul.f32 -1.442695, %v9593_v19  ;;  %v1610_v44 = vpack.c.bf16 %v1583_v53, %v1582_v57 }
 0x1e9   : > { %8388 = vpow2.f32 %v6509_v31  ;;  %v1732_v34 = vpop.f32.mrf.mxu1  ;;  %7534 = vmatmul.mubr.bf16.gmra.mxu1 %v1610_v44 }
 0x1ea   : > { %v9597_v3 = vadd.f32 %v9586_v9, %v1732_v34  ;;  %7601 = vmatprep.mubr.bf16.mxu1 %v11515_v1 }
 0x1eb   : > { %v7439_v28 = vpop.f32.mrf.mxu1 }
 0x1ec   : > { %v6510_v41 = vmul.f32 -1.442695, %v9597_v3 }
 0x1ed   : > { %v1735_v35 = vpop.f32.mrf.mxu1 }
 0x1ee   : > { %8390 = vpow2.f32 %v6510_v41  ;;  %v9602_v7 = vadd.f32 %v9586_v9, %v1735_v35  ;;  %v2328_v35 = vlaneseq }
 0x1ef   : > { %v7440_v4 = vpop.f32.mrf.mxu1 }
 0x1f0   : > { %v6511_v52 = vmul.f32 -1.442695, %v9602_v7 }
 0x1f1   : > { %v1740_v17 = vpop.f32.mrf.mxu1 }
 0x1f2   : > { %8392 = vpow2.f32 %v6511_v52  ;;  %v9606_v50 = vadd.f32 %v9586_v9, %v1740_v17 }
 0x1f3   : > { %v7443_v40 = vpop.f32.mrf.mxu1 }
 0x1f4   : > { %v6512_v6 = vmul.f32 -1.442695, %v9606_v50 }
 0x1f5   : > { %v1743_v8 = vpop.f32.mrf.mxu1 }
 0x1f6   : > { %v8389_v42 = vpop.eup %8388  ;;  %8394 = vpow2.f32 %v6512_v6  ;;  %v9610_v20 = vadd.f32 %v9586_v9, %v1743_v8 }
 0x1f7   : > { %v2096_v0 = vadd.f32 1.0, %v8389_v42  ;;  %v7444_v23 = vpop.f32.mrf.mxu1 }
 0x1f8   : > { %v6513_v5 = vmul.f32 -1.442695, %v9610_v20 }
 0x1f9   : > { %8396 = vrcp.f32 %v2096_v0  ;;  %v1748_v55 = vpop.f32.mrf.mxu1  ;;  %v9625_v0 = vshrl.u32 %v2328_v35, 7 }
 0x1fa   : > { %8398 = vpow2.f32 %v6513_v5  ;;  %v9614_v60 = vadd.f32 %v9586_v9, %v1748_v55 }
 0x1fb   : > { %v8391_v12 = vpop.eup %8390  ;;  %v7447_v57 = vpop.f32.mrf.mxu1  ;;  %vm2386_vm2 = vcmp.ge.s32.totalorder %v9625_v0, 1 }
 0x1fc   : > { %v2097_v25 = vadd.f32 1.0, %v8391_v12  ;;  %v6514_v26 = vmul.f32 -1.442695, %v9614_v60  ;;  %vm9645_vm4 = vmpackc.low %vm8866_vm3, %vm2386_vm2 }
 0x1fd   : > { %v1751_v53 = vpop.f32.mrf.mxu1 }
 0x1fe   : > { %8400 = vrcp.f32 %v2097_v25  ;;  %v9618_v21 = vadd.f32 %v9586_v9, %v1751_v53 }
 0x1ff   : > { %v8393_v31 = vpop.eup %8392  ;;  %8402 = vpow2.f32 %v6514_v26  ;;  %v7448_v44 = vpop.f32.mrf.mxu1 }
 0x200   : > { %v2098_v34 = vadd.f32 1.0, %v8393_v31  ;;  %v6515_v28 = vmul.f32 -1.442695, %v9618_v21  ;;  %v9637_v44 = vadd.s32 16, %v9625_v0 }
 0x201   : > { %v1756_v41 = vpop.f32.mrf.mxu1 }
 0x202   : > { %8404 = vrcp.f32 %v2098_v34  ;;  %v9622_v4 = vadd.f32 %v9586_v9, %v1756_v41  ;;  %vm2445_vm5 = vcmp.le.s32.totalorder %v9637_v44, 16 }
 0x203   : > { %v8395_v52 = vpop.eup %8394  ;;  %8406 = vpow2.f32 %v6515_v28  ;;  %v7451_v17 = vpop.f32.mrf.mxu1 }
 0x204   : > { %v2099_v40 = vadd.f32 1.0, %v8395_v52  ;;  %v6516_v6 = vmul.f32 -1.442695, %v9622_v4 }
 0x205   : > { %v1759_v8 = vpop.f32.mrf.mxu1 }
 0x206   : > { %v8397_v42 = vpop.eup %8396  ;;  %8408 = vrcp.f32 %v2099_v40  ;;  %v9628_v23 = vadd.f32 %v9586_v9, %v1759_v8 }
 0x207   : > { %v8399_v5 = vpop.eup %8398  ;;  %8410 = vpow2.f32 %v6516_v6  ;;  %v7452_v55 = vpop.f32.mrf.mxu1  ;;  %v2258_v25 = vmul.f32 %v8397_v42, %v9593_v19 }
 0x208   : > { %v2100_v12 = vadd.f32 1.0, %v8399_v5  ;;  %v6517_v57 = vmul.f32 -1.442695, %v9628_v23 }
 0x209   : > { %v1764_v26 = vpop.f32.mrf.mxu1  ;;  %v2611_v19 = vsel %vm2386_vm2, %v2258_v25, 0.0 }
 0x20a   : > { %8412 = vrcp.f32 %v2100_v12  ;;  %v9634_v53 = vadd.f32 %v9586_v9, %v1764_v26 }
 0x20b   : > { %v8401_v31 = vpop.eup %8400  ;;  %8414 = vpow2.f32 %v6517_v57  ;;  %v7455_v34 = vpop.f32.mrf.mxu1 }
 0x20c   : > { %v8403_v28 = vpop.eup %8402  ;;  %v2259_v41 = vmul.f32 %v8401_v31, %v9597_v3  ;;  %v6518_v35 = vmul.f32 -1.442695, %v9634_v53 }
 0x20d   : > { %v2101_v52 = vadd.f32 1.0, %v8403_v28  ;;  %v1767_v17 = vpop.f32.mrf.mxu1 }
 0x20e   : > { %v2664_v6 = vpack.c.bf16 %v2259_v41, %v2611_v19  ;;  %v9649_v8 = vpack.c.bf16 %v2259_v41, %v2258_v25  ;;  %8416 = vpow2.f32 %v6518_v35  ;;  %v9652_v3 = vadd.f32 %v9586_v9, %v1767_v17 }
 0x20f   : > { %v8405_v42 = vpop.eup %8404  ;;  %8418 = vrcp.f32 %v2101_v52  ;;  %v7456_v5 = vpop.f32.mrf.mxu1 }
 0x210   : > { %v8407_v55 = vpop.eup %8406  ;;  %v2730_v12 = vshll.u32 %v2664_v6, 16  ;;  %v2260_v57 = vmul.f32 %v8405_v42, %v9602_v7  ;;  %7602 = vmatmul.mubr.msk.bf16.vlgmr.msra.gmra.mxu1 %vm9645_vm4, %v9649_v8  ;;  %v6519_v25 = vmul.f32 -1.442695, %v9652_v3  ;;  %v2728_v17 = vshrl.u32 %v2664_v6, 16 }
 0x211   : > { %v2102_v26 = vadd.f32 1.0, %v8407_v55  ;;  %v1772_v31 = vpop.f32.mrf.mxu1  ;;  %v3394_v42 = vrot.slane %v2664_v6, 1 }
 0x212   : > { %v2613_v34 = vsel %vm2445_vm5, %v2260_v57, 0.0  ;;  %v9663_v28 = vadd.f32 %v9586_v9, %v1772_v31  ;;  %v2732_v35 = vrot.slane %v2730_v12, 1 }
 0x213   : > { %v8409_v41 = vpop.eup %8408  ;;  %v2665_v19 = vpack.c.bf16 %v2613_v34, %v2613_v34  ;;  %8420 = vrcp.f32 %v2102_v26  ;;  %v7459_v52 = vpop.f32.mrf.mxu1 }
 0x214   : > { %v8411_v7 = vpop.eup %8410  ;;  %8422 = vpow2.f32 %v6519_v25  ;;  %v6520_v5 = vmul.f32 -1.442695, %v9663_v28  ;;  %v2261_v48 = vmul.f32 %v8409_v41, %v9606_v50  ;;  %v2733_v52 = vor.u32 %v2732_v35, %v2728_v17 }
 0x215   : > { %v2735_v55 = vshll.u32 %v2665_v19, 16  ;;  %v3395_v1 = vrot.slane %v2665_v19, 1  ;;  %v2103_v16 = vadd.f32 1.0, %v8411_v7  ;;  %v1775_v57 = vpop.f32.mrf.mxu1 }
 0x216   : > { %8424 = vpow2.f32 %v6520_v5  ;;  %v9668_v31 = vadd.f32 %v9586_v9, %v1775_v57  ;;  %v2614_v41 = vsel %vm2386_vm2, %v2261_v48, 0.0 }
 0x217   : > { %v8413_v12 = vpop.eup %8412  ;;  %v2737_v26 = vrot.slane %v2735_v55, 1  ;;  %8426 = vrcp.f32 %v2103_v16  ;;  %v7460_v34 = vpop.f32.mrf.mxu1  ;;  %v9671_v6 = vsel %vm3390_vm1, %v3394_v42, %v3395_v1 }
 0x218   : > { %v8415_v25 = vpop.eup %8414  ;;  %v2262_v19 = vmul.f32 %v8413_v12, %v9610_v20  ;;  %v6521_v50 = vmul.f32 -1.442695, %v9668_v31 }
 0x219   : > { %v2104_v7 = vadd.f32 1.0, %v8415_v25  ;;  %v1780_v5 = vpop.f32.mrf.mxu1  ;;  %v9678_v57 = vsel %vm2714_vm6, %v2733_v52, %v2737_v26 }
 0x21a   : > { %v2666_v55 = vpack.c.bf16 %v2262_v19, %v2614_v41  ;;  %v9680_v16 = vpack.c.bf16 %v2262_v19, %v2261_v48  ;;  %8428 = vpow2.f32 %v6521_v50  ;;  %v9683_v1 = vadd.f32 %v9586_v9, %v1780_v5  ;;  %7554 = vmatmul.mubr.bf16.vlgmr.msra.gmra.mxu0 %v9678_v57 }
 0x21b   : > { %v8417_v20 = vpop.eup %8416  ;;  %8430 = vrcp.f32 %v2104_v7  ;;  %v7463_v35 = vpop.f32.mrf.mxu1 }
 0x21c   : > { %v8419_v17 = vpop.eup %8418  ;;  %v2105_v42 = vadd.f32 1.0, %v8417_v20  ;;  %v6522_v12 = vmul.f32 -1.442695, %v9683_v1  ;;  %7605 = vmatprep.mubr.msk.bf16.mxu1 %vm9645_vm4, %v9680_v16  ;;  %v2742_v26 = vshll.u32 %v2666_v55, 16 }
 0x21d   : > { %v2263_v48 = vmul.f32 %v8419_v17, %v9614_v60  ;;  %v1783_v34 = vpop.f32.mrf.mxu1  ;;  %v2740_v60 = vshrl.u32 %v2666_v55, 16  ;;  %v8111_v17 = vld [vmem:[%s11510_s7 + $0xf8] sm:$0xff]  }
 0x21e   : > { %8432 = vrcp.f32 %v2105_v42  ;;  %v9692_v52 = vadd.f32 %v9586_v9, %v1783_v34  ;;  %v2744_v50 = vrot.slane %v2742_v26, 1  ;;  %7681 = vmatprep.subr.bf16.mxu1 %v8111_v17 }
 0x21f   : > { %v2616_v25 = vsel %vm2445_vm5, %v2263_v48, 0.0  ;;  %8434 = vpow2.f32 %v6522_v12  ;;  %v7464_v19 = vpop.f32.mrf.mxu1  ;;  %7682 = vmatpush3.bf16.msra.mxu1 %v8111_v17 }
 0x220   : > { %v8421_v41 = vpop.eup %8420  ;;  %v2667_v7 = vpack.c.bf16 %v2616_v25, %v2616_v25  ;;  %v6523_v5 = vmul.f32 -1.442695, %v9692_v52  ;;  %v2745_v25 = vor.u32 %v2744_v50, %v2740_v60  ;;  %v3397_v19 = vrot.slane %v2666_v55, 1 }
 0x221   : > { %v8423_v20 = vpop.eup %8422  ;;  %v2264_v35 = vmul.f32 %v8421_v41, %v9618_v21  ;;  %v1788_v15 = vpop.f32.mrf.mxu1 }
 0x222   : > { %v2106_v42 = vadd.f32 1.0, %v8423_v20  ;;  %8436 = vpow2.f32 %v6523_v5  ;;  %v9702_v48 = vadd.f32 %v9586_v9, %v1788_v15  ;;  %v2747_v12 = vshll.u32 %v2667_v7, 16  ;;  %v8113_v15 = vld [vmem:[%s11510_s7 + $0xf0] sm:$0xff]  }
 0x223   : > { %v8425_v26 = vpop.eup %8424  ;;  %v7467_v34 = vpop.f32.mrf.mxu1  ;;  %v3398_v61 = vrot.slane %v2667_v7, 1  ;;  %v2617_v55 = vsel %vm2386_vm2, %v2264_v35, 0.0  ;;  %7683 = vmatprep.subr.bf16.mxu1 %v8113_v15 }
 0x224   : > { %v8427_v47 = vpop.eup %8426  ;;  %8438 = vrcp.f32 %v2106_v42  ;;  %v2107_v21 = vadd.f32 1.0, %v8425_v26  ;;  %v6524_v41 = vmul.f32 -1.442695, %v9702_v48  ;;  %v2749_v29 = vrot.slane %v2747_v12, 1  ;;  %7684 = vmatpush3.bf16.msra.mxu1 %v8113_v15 }
 0x225   : > { %v2265_v20 = vmul.f32 %v8427_v47, %v9622_v4  ;;  %v1791_v5 = vpop.f32.mrf.mxu1  ;;  %v9710_v34 = vsel %vm3390_vm1, %v3397_v19, %v3398_v61 }
 0x226   : > { %8440 = vrcp.f32 %v2107_v21  ;;  %v9715_v50 = vadd.f32 %v9586_v9, %v1791_v5  ;;  %v9718_v7 = vsel %vm2714_vm6, %v2745_v25, %v2749_v29 }
 0x227   : > { %v8429_v60 = vpop.eup %8428  ;;  %v2668_v47 = vpack.c.bf16 %v2265_v20, %v2617_v55  ;;  %v9720_v4 = vpack.c.bf16 %v2265_v20, %v2264_v35  ;;  %8442 = vpow2.f32 %v6524_v41  ;;  %7557 = vmatprep.mubr.bf16.mxu0 %v9718_v7  ;;  %v7468_v17 = vpop.f32.mrf.mxu1  ;;  %v8114_v35 = vld [vmem:[%s11510_s7 + $0xe8] sm:$0xff]  }
 0x228   : > { %v8431_v61 = vpop.eup %8430  ;;  %v2108_v42 = vadd.f32 1.0, %v8429_v60  ;;  %v6525_v12 = vmul.f32 -1.442695, %v9715_v50  ;;  %7685 = vmatprep.subr.bf16.mxu1 %v8114_v35 }
 0x229   : > { %v2754_v26 = vshll.u32 %v2668_v47, 16  ;;  %v2266_v19 = vmul.f32 %v8431_v61, %v9628_v23  ;;  %7606 = vmatmul.mubr.msk.bf16.gmra.mxu1 %vm9645_vm4, %v9720_v4  ;;  %v1796_v29 = vpop.f32.mrf.mxu1  ;;  %v8108_v23 = vld [vmem:[%s11510_s7 + $0xb8] sm:$0xff]   ;;  %v2752_v17 = vshrl.u32 %v2668_v47, 16 }
 0x22a   : > { %8444 = vrcp.f32 %v2108_v42  ;;  %v9732_v25 = vadd.f32 %v9586_v9, %v1796_v29  ;;  %7686 = vmatpush3.bf16.msra.mxu1 %v8114_v35  ;;  %7633 = vmatprep.subr.bf16.mxu0 %v8108_v23 }
 0x22b   : > { %v8433_v21 = vpop.eup %8432  ;;  %v2619_v41 = vsel %vm2445_vm5, %v2266_v19, 0.0  ;;  %8446 = vpow2.f32 %v6525_v12  ;;  %v7471_v20 = vpop.f32.mrf.mxu1  ;;  %v2756_v15 = vrot.slane %v2754_v26, 1  ;;  %v8116_v12 = vld [vmem:[%s11510_s7 + $0xe0] sm:$0xff]   ;;  %7634 = vmatpush3.bf16.msra.mxu0 %v8108_v23 }
 0x22c   : > { %v8435_v5 = vpop.eup %8434  ;;  %v2669_v55 = vpack.c.bf16 %v2619_v41, %v2619_v41  ;;  %v6526_v60 = vmul.f32 -1.442695, %v9732_v25  ;;  %v3400_v20 = vrot.slane %v2668_v47, 1  ;;  %v2267_v26 = vmul.f32 %v8433_v21, %v9634_v53  ;;  %7687 = vmatprep.subr.bf16.mxu1 %v8116_v12 }
 0x22d   : > { %v2109_v61 = vadd.f32 1.0, %v8435_v5  ;;  %v1799_v42 = vpop.f32.mrf.mxu1  ;;  %v8109_v5 = vld [vmem:[%s11510_s7 + $0xb0] sm:$0xff]   ;;  %v2757_v54 = vor.u32 %v2756_v15, %v2752_v17 }
 0x22e   : > { %v2759_v19 = vshll.u32 %v2669_v55, 16  ;;  %v3401_v29 = vrot.slane %v2669_v55, 1  ;;  %8448 = vpow2.f32 %v6526_v60  ;;  %v9745_v41 = vadd.f32 %v9586_v9, %v1799_v42  ;;  %7688 = vmatpush3.bf16.msra.mxu1 %v8116_v12  ;;  %7635 = vmatprep.subr.bf16.mxu0 %v8109_v5  ;;  %v8117_v55 = vld [vmem:[%s11510_s7 + $0xd8] sm:$0xff]  }
 0x22f   : > { %v8437_v51 = vpop.eup %8436  ;;  %8450 = vrcp.f32 %v2109_v61  ;;  %v7472_v35 = vpop.f32.mrf.mxu1  ;;  %7636 = vmatpush3.bf16.msra.mxu0 %v8109_v5  ;;  %v2620_v17 = vsel %vm2386_vm2, %v2267_v26, 0.0  ;;  %7689 = vmatprep.subr.bf16.mxu1 %v8117_v55 }
 0x230   : > { %v2761_v30 = vrot.slane %v2759_v19, 1  ;;  %v2110_v56 = vadd.f32 1.0, %v8437_v51  ;;  %v9751_v23 = vsel %vm3390_vm1, %v3400_v20, %v3401_v29  ;;  %v6527_v53 = vmul.f32 -1.442695, %v9745_v41  ;;  %v8119_v35 = vld [vmem:[%s11510_s7 + $0xd0] sm:$0xff]  }
 0x231   : > { %v8439_v47 = vpop.eup %8438  ;;  %v1804_v21 = vpop.f32.mrf.mxu1 }
 0x232   : > { %v2268_v60 = vmul.f32 %v8439_v47, %v9652_v3  ;;  %8452 = vrcp.f32 %v2110_v56  ;;  %v9759_v61 = vadd.f32 %v9586_v9, %v1804_v21  ;;  %v9762_v51 = vsel %vm2714_vm6, %v2757_v54, %v2761_v30  ;;  %v8110_v3 = vld [vmem:[%s11510_s7 + $0xa8] sm:$0xff]   ;;  %7690 = vmatpush3.bf16.msra.mxu1 %v8117_v55  ;;  %v8112_v55 = vld [vmem:[%s11510_s7 + $0xa0] sm:$0xff]  }
 0x233   : > { %v8441_v15 = vpop.eup %8440  ;;  %8454 = vpow2.f32 %v6527_v53  ;;  %7558 = vmatmul.mubr.bf16.gmra.mxu0 %v9762_v51  ;;  %v7475_v42 = vpop.f32.mrf.mxu1  ;;  %7637 = vmatprep.subr.bf16.mxu0 %v8110_v3 }
 0x234   : > { %v8443_v56 = vpop.eup %8442  ;;  %v2670_v12 = vpack.c.bf16 %v2268_v60, %v2620_v17  ;;  %v9770_v19 = vpack.c.bf16 %v2268_v60, %v2267_v26  ;;  %v2269_v54 = vmul.f32 %v8441_v15, %v9663_v28  ;;  %v6528_v30 = vmul.f32 -1.442695, %v9759_v61  ;;  %7638 = vmatpush3.bf16.msra.mxu0 %v8110_v3  ;;  %7691 = vmatprep.subr.bf16.mxu1 %v8119_v35 }
 0x235   : > { %v2111_v29 = vadd.f32 1.0, %v8443_v56  ;;  %v1807_v20 = vpop.f32.mrf.mxu1  ;;  %7639 = vmatprep.subr.bf16.mxu0 %v8112_v55 }
 0x236   : > { %v2622_v5 = vsel %vm2445_vm5, %v2269_v54, 0.0  ;;  %8456 = vpow2.f32 %v6528_v30  ;;  %7609 = vmatprep.mubr.msk.bf16.mxu1 %vm9645_vm4, %v9770_v19  ;;  %v9783_v28 = vadd.f32 %v9586_v9, %v1807_v20  ;;  %v2766_v21 = vshll.u32 %v2670_v12, 16  ;;  %7692 = vmatpush3.bf16.msra.mxu1 %v8119_v35 }
 0x237   : > { %v8445_v26 = vpop.eup %8444  ;;  %v2671_v47 = vpack.c.bf16 %v2622_v5, %v2622_v5  ;;  %8458 = vrcp.f32 %v2111_v29  ;;  %v7476_v53 = vpop.f32.mrf.mxu1  ;;  %v2764_v17 = vshrl.u32 %v2670_v12, 16  ;;  %v3403_v42 = vrot.slane %v2670_v12, 1  ;;  %v8120_v29 = vld [vmem:[%s11510_s7 + $0xc8] sm:$0xff]  }
 0x238   : > { %v8447_v60 = vpop.eup %8446  ;;  %v6529_v15 = vmul.f32 -1.442695, %v9783_v28  ;;  %v2768_v30 = vrot.slane %v2766_v21, 1  ;;  %v2270_v5 = vmul.f32 %v8445_v26, %v9668_v31  ;;  %7640 = vmatpush3.bf16.msra.mxu0 %v8112_v55  ;;  %v8115_v21 = vld [vmem:[%s11510_s7 + $0x98] sm:$0xff]   ;;  %7693 = vmatprep.subr.bf16.mxu1 %v8120_v29 }
 0x239   : > { %v2112_v56 = vadd.f32 1.0, %v8447_v60  ;;  %v1812_v54 = vpop.f32.mrf.mxu1  ;;  %v2771_v3 = vshll.u32 %v2671_v47, 16  ;;  %v3404_v20 = vrot.slane %v2671_v47, 1  ;;  %7641 = vmatprep.subr.bf16.mxu0 %v8115_v21 }
 0x23a   : > { %8460 = vpow2.f32 %v6529_v15  ;;  %v9794_v53 = vadd.f32 %v9586_v9, %v1812_v54  ;;  %v2769_v35 = vor.u32 %v2768_v30, %v2764_v17  ;;  %7694 = vmatpush3.bf16.msra.mxu1 %v8120_v29  ;;  %v8122_v17 = vld [vmem:[%s11510_s7 + $0xc0] sm:$0xff]   ;;  %v8118_v29 = vld [vmem:[%s11510_s7 + $0x90] sm:$0xff]  }
 0x23b   : > { %v8449_v37 = vpop.eup %8448  ;;  %8462 = vrcp.f32 %v2112_v56  ;;  %v7479_v12 = vpop.f32.mrf.mxu1  ;;  %v2773_v60 = vrot.slane %v2771_v3, 1  ;;  %v9800_v36 = vsel %vm3390_vm1, %v3403_v42, %v3404_v20  ;;  %v2623_v42 = vsel %vm2386_vm2, %v2270_v5, 0.0  ;;  %7695 = vmatprep.subr.bf16.mxu1 %v8122_v17 }
 0x23c   : > { %v8451_v47 = vpop.eup %8450  ;;  %v2113_v31 = vadd.f32 1.0, %v8449_v37  ;;  %v6530_v26 = vmul.f32 -1.442695, %v9794_v53  ;;  %7642 = vmatpush3.bf16.msra.mxu0 %v8115_v21 }
 0x23d   : > { %v2271_v55 = vmul.f32 %v8451_v47, %v9683_v1  ;;  %v1815_v15 = vpop.f32.mrf.mxu1  ;;  %v9805_v56 = vsel %vm2714_vm6, %v2769_v35, %v2773_v60  ;;  %v8121_v60 = vld [vmem:[%s11510_s7 + $0x88] sm:$0xff]   ;;  %7643 = vmatprep.subr.bf16.mxu0 %v8118_v29 }
 0x23e   : > { %11580 = vst [vmem:[#allocation36_spill] sm:$0xff] %v9805_v56  ;;  %8464 = vrcp.f32 %v2113_v31  ;;  %v9813_v37 = vadd.f32 %v9586_v9, %v1815_v15  ;;  %7561 = vmatprep.mubr.bf16.mxu0 %v9805_v56  ;;  %7696 = vmatpush3.bf16.msra.mxu1 %v8122_v17 }
 0x23f   : > { %v8453_v1 = vpop.eup %8452  ;;  %v2672_v54 = vpack.c.bf16 %v2271_v55, %v2623_v42  ;;  %v9816_v30 = vpack.c.bf16 %v2271_v55, %v2270_v5  ;;  %8466 = vpow2.f32 %v6530_v26  ;;  %v7480_v3 = vpop.f32.mrf.mxu1 }
 0x240   : > { %v8455_v20 = vpop.eup %8454  ;;  %v2272_v12 = vmul.f32 %v8453_v1, %v9692_v52  ;;  %v6531_v35 = vmul.f32 -1.442695, %v9813_v37  ;;  %7644 = vmatpush3.bf16.msra.mxu0 %v8118_v29 }
 0x241   : > { %v2778_v21 = vshll.u32 %v2672_v54, 16  ;;  %v2114_v5 = vadd.f32 1.0, %v8455_v20  ;;  %7610 = vmatmul.mubr.msk.bf16.gmra.mxu1 %vm9645_vm4, %v9816_v30  ;;  %v1820_v47 = vpop.f32.mrf.mxu1  ;;  %7645 = vmatprep.subr.bf16.mxu0 %v8121_v60  ;;  %v2776_v20 = vshrl.u32 %v2672_v54, 16 }
 0x242   : > { %v2625_v31 = vsel %vm2445_vm5, %v2272_v12, 0.0  ;;  %8468 = vpow2.f32 %v6531_v35  ;;  %v9832_v52 = vadd.f32 %v9586_v9, %v1820_v47  ;;  %v3406_v12 = vrot.slane %v2672_v54, 1 }
 0x243   : > { %v8457_v26 = vpop.eup %8456  ;;  %v2780_v55 = vrot.slane %v2778_v21, 1  ;;  %v2673_v15 = vpack.c.bf16 %v2625_v31, %v2625_v31  ;;  %8470 = vrcp.f32 %v2114_v5  ;;  %v7483_v17 = vpop.f32.mrf.mxu1 }
 0x244   : > { %v8459_v42 = vpop.eup %8458  ;;  %v2115_v1 = vadd.f32 1.0, %v8457_v26  ;;  %v6532_v3 = vmul.f32 -1.442695, %v9832_v52  ;;  %7646 = vmatpush3.bf16.msra.mxu0 %v8121_v60  ;;  %v8123_v26 = vld [vmem:[%s11510_s7 + $0x80] sm:$0xff]  }
 0x245   : > { %v2783_v11 = vshll.u32 %v2673_v15, 16  ;;  %v3407_v63 = vrot.slane %v2673_v15, 1  ;;  %v1823_v2 = vpop.f32.mrf.mxu1  ;;  %v2273_v35 = vmul.f32 %v8459_v42, %v9702_v48  ;;  %v2781_v31 = vor.u32 %v2780_v55, %v2776_v20  ;;  %7647 = vmatprep.subr.bf16.mxu0 %v8123_v26 }
 0x246   : > { %8472 = vrcp.f32 %v2115_v1  ;;  %v9837_v29 = vadd.f32 %v9586_v9, %v1823_v2 }
 0x247   : > { %v8461_v21 = vpop.eup %8460  ;;  %v2785_v5 = vrot.slane %v2783_v11, 1  ;;  %8474 = vpow2.f32 %v6532_v3  ;;  %v7484_v47 = vpop.f32.mrf.mxu1  ;;  %v9843_v15 = vsel %vm3390_vm1, %v3406_v12, %v3407_v63  ;;  %v2626_v11 = vsel %vm2386_vm2, %v2273_v35, 0.0 }
 0x248   : > { %v8463_v54 = vpop.eup %8462  ;;  %v2116_v17 = vadd.f32 1.0, %v8461_v21  ;;  %v6533_v48 = vmul.f32 -1.442695, %v9837_v29  ;;  %7648 = vmatpush3.bf16.msra.mxu0 %v8123_v26 }
 0x249   : > { %v2274_v2 = vmul.f32 %v8463_v54, %v9715_v50  ;;  %v1828_v42 = vpop.f32.mrf.mxu1  ;;  %v9848_v60 = vsel %vm2714_vm6, %v2781_v31, %v2785_v5  ;;  %v9863_v5 = vld [vmem:[%s11510_s7 + $0x138] sm:$0xff]  }
 0x24a   : > { %11581 = vst [vmem:[#allocation37_spill] sm:$0xff] %v9848_v60  ;;  %8476 = vrcp.f32 %v2116_v17  ;;  %v9853_v55 = vadd.f32 %v9586_v9, %v1828_v42  ;;  %7562 = vmatmul.mubr.bf16.gmra.mxu0 %v9848_v60  ;;  %7729 = vmatprep.subr.bf16.mxu0 %v9863_v5 }
 0x24b   : > { %v8465_v63 = vpop.eup %8464  ;;  %v2674_v1 = vpack.c.bf16 %v2274_v2, %v2626_v11  ;;  %v9856_v3 = vpack.c.bf16 %v2274_v2, %v2273_v35  ;;  %8478 = vpow2.f32 %v6533_v48  ;;  %v7487_v50 = vpop.f32.mrf.mxu1 }
 0x24c   : > { %v8467_v20 = vpop.eup %8466  ;;  %v2275_v12 = vmul.f32 %v8465_v63, %v9732_v25  ;;  %v6534_v21 = vmul.f32 -1.442695, %v9853_v55 }
 0x24d   : > { %v2117_v47 = vadd.f32 1.0, %v8467_v20  ;;  %7613 = vmatprep.mubr.msk.bf16.mxu1 %vm9645_vm4, %v9856_v3  ;;  %v1831_v35 = vpop.f32.mrf.mxu1  ;;  %v2790_v31 = vshll.u32 %v2674_v1, 16  ;;  %v2788_v50 = vshrl.u32 %v2674_v1, 16 }
 0x24e   : > { %v2628_v26 = vsel %vm2445_vm5, %v2275_v12, 0.0  ;;  %8480 = vpow2.f32 %v6534_v21  ;;  %v9871_v25 = vadd.f32 %v9586_v9, %v1831_v35  ;;  %v3409_v21 = vrot.slane %v2674_v1, 1 }
 0x24f   : > { %v8469_v54 = vpop.eup %8468  ;;  %v2675_v17 = vpack.c.bf16 %v2628_v26, %v2628_v26  ;;  %8482 = vrcp.f32 %v2117_v47  ;;  %v7488_v48 = vpop.f32.mrf.mxu1  ;;  %v2792_v2 = vrot.slane %v2790_v31, 1 }
 0x250   : > { %v8471_v42 = vpop.eup %8470  ;;  %v2118_v11 = vadd.f32 1.0, %v8469_v54  ;;  %v6535_v63 = vmul.f32 -1.442695, %v9871_v25 }
 0x251   : > { %v2276_v20 = vmul.f32 %v8471_v42, %v9745_v41  ;;  %v1836_v27 = vpop.f32.mrf.mxu1  ;;  %v2795_v12 = vshll.u32 %v2675_v17, 16  ;;  %v3410_v18 = vrot.slane %v2675_v17, 1  ;;  %v2793_v26 = vor.u32 %v2792_v2, %v2788_v50 }
 0x252   : > { %8484 = vrcp.f32 %v2118_v11  ;;  %v9877_v35 = vadd.f32 %v9586_v9, %v1836_v27 }
 0x253   : > { %v8473_v24 = vpop.eup %8472  ;;  %8486 = vpow2.f32 %v6535_v63  ;;  %v7491_v47 = vpop.f32.mrf.mxu1  ;;  %v2797_v31 = vrot.slane %v2795_v12, 1  ;;  %v9880_v54 = vsel %vm3390_vm1, %v3409_v21, %v3410_v18  ;;  %v2629_v1 = vsel %vm2386_vm2, %v2276_v20, 0.0 }
 0x254   : > { %v8475_v48 = vpop.eup %8474  ;;  %v2277_v39 = vmul.f32 %v8473_v24, %v9759_v61  ;;  %v6536_v41 = vmul.f32 -1.442695, %v9877_v35 }
 0x255   : > { %v2119_v17 = vadd.f32 1.0, %v8475_v48  ;;  %v1839_v42 = vpop.f32.mrf.mxu1  ;;  %v9887_v27 = vsel %vm2714_vm6, %v2793_v26, %v2797_v31 }
 0x256   : > { %11582 = vst [vmem:[#allocation38_spill] sm:$0xff] %v9887_v27  ;;  %v2676_v11 = vpack.c.bf16 %v2277_v39, %v2629_v1  ;;  %v9889_v63 = vpack.c.bf16 %v2277_v39, %v2276_v20  ;;  %8488 = vpow2.f32 %v6536_v41  ;;  %v9892_v18 = vadd.f32 %v9586_v9, %v1839_v42  ;;  %7565 = vmatprep.mubr.bf16.mxu0 %v9887_v27 }
 0x257   : > { %v8477_v24 = vpop.eup %8476  ;;  %8490 = vrcp.f32 %v2119_v17  ;;  %v7492_v61 = vpop.f32.mrf.mxu1 }
 0x258   : > { %v8479_v2 = vpop.eup %8478  ;;  %v2802_v50 = vshll.u32 %v2676_v11, 16  ;;  %v2278_v12 = vmul.f32 %v8477_v24, %v9783_v28  ;;  %v6537_v21 = vmul.f32 -1.442695, %v9892_v18  ;;  %7614 = vmatmul.mubr.msk.bf16.gmra.mxu1 %vm9645_vm4, %v9889_v63  ;;  %v2800_v17 = vshrl.u32 %v2676_v11, 16 }
 0x259   : > { %v2120_v39 = vadd.f32 1.0, %v8479_v2  ;;  %v1844_v20 = vpop.f32.mrf.mxu1 }
 0x25a   : > { %v2631_v47 = vsel %vm2445_vm5, %v2278_v12, 0.0  ;;  %8492 = vpow2.f32 %v6537_v21  ;;  %v9903_v26 = vadd.f32 %v9586_v9, %v1844_v20  ;;  %v2804_v48 = vrot.slane %v2802_v50, 1 }
 0x25b   : > { %v8481_v31 = vpop.eup %8480  ;;  %v2677_v41 = vpack.c.bf16 %v2631_v47, %v2631_v47  ;;  %8494 = vrcp.f32 %v2120_v39  ;;  %v7495_v28 = vpop.f32.mrf.mxu1  ;;  %v3412_v12 = vrot.slane %v2676_v11, 1 }
 0x25c   : > { %v8483_v1 = vpop.eup %8482  ;;  %v2121_v42 = vadd.f32 1.0, %v8481_v31  ;;  %v6538_v24 = vmul.f32 -1.442695, %v9903_v26  ;;  %v2805_v47 = vor.u32 %v2804_v48, %v2800_v17  ;;  %v9923_v48 = vld [vmem:[%s11510_s7 + $0x178] sm:$0xff]  }
 0x25d   : > { %v2807_v61 = vshll.u32 %v2677_v41, 16  ;;  %v3413_v2 = vrot.slane %v2677_v41, 1  ;;  %v2279_v10 = vmul.f32 %v8483_v1, %v9794_v53  ;;  %v1847_v62 = vpop.f32.mrf.mxu1  ;;  %7777 = vmatprep.subr.bf16.mxu1 %v9923_v48 }
 0x25e   : > { %8496 = vrcp.f32 %v2121_v42  ;;  %v9908_v21 = vadd.f32 %v9586_v9, %v1847_v62 }
 0x25f   : > { %v8485_v20 = vpop.eup %8484  ;;  %v2809_v50 = vrot.slane %v2807_v61, 1  ;;  %8498 = vpow2.f32 %v6538_v24  ;;  %v7496_v39 = vpop.f32.mrf.mxu1  ;;  %v9911_v28 = vsel %vm3390_vm1, %v3412_v12, %v3413_v2  ;;  %v2632_v53 = vsel %vm2386_vm2, %v2279_v10, 0.0 }
 0x260   : > { %v8487_v31 = vpop.eup %8486  ;;  %v2280_v13 = vmul.f32 %v8485_v20, %v9813_v37  ;;  %v6539_v41 = vmul.f32 -1.442695, %v9908_v21 }
 0x261   : > { %v2122_v11 = vadd.f32 1.0, %v8487_v31  ;;  %v1852_v1 = vpop.f32.mrf.mxu1  ;;  %v9918_v62 = vsel %vm2714_vm6, %v2805_v47, %v2809_v50 }
 0x262   : > { %11583 = vst [vmem:[#allocation39_spill] sm:$0xff] %v9918_v62  ;;  %v2678_v17 = vpack.c.bf16 %v2280_v13, %v2632_v53  ;;  %v9925_v42 = vpack.c.bf16 %v2280_v13, %v2279_v10  ;;  %8500 = vpow2.f32 %v6539_v41  ;;  %v9928_v37 = vadd.f32 %v9586_v9, %v1852_v1  ;;  %7566 = vmatmul.mubr.bf16.gmra.mxu0 %v9918_v62 }
 0x263   : > { %v8489_v24 = vpop.eup %8488  ;;  %8502 = vrcp.f32 %v2122_v11  ;;  %v7499_v61 = vpop.f32.mrf.mxu1 }
 0x264   : > { %v8491_v2 = vpop.eup %8490  ;;  %v2123_v12 = vadd.f32 1.0, %v8489_v24  ;;  %v6540_v20 = vmul.f32 -1.442695, %v9928_v37  ;;  %7617 = vmatprep.mubr.msk.bf16.mxu1 %vm9645_vm4, %v9925_v42  ;;  %v2814_v50 = vshll.u32 %v2678_v17, 16  ;;  %v3415_v49 = vrot.slane %v2678_v17, 1 }
 0x265   : > { %v2281_v13 = vmul.f32 %v8491_v2, %v9832_v52  ;;  %v1855_v10 = vpop.f32.mrf.mxu1 }
 0x266   : > { %8504 = vrcp.f32 %v2123_v12  ;;  %v9938_v39 = vadd.f32 %v9586_v9, %v1855_v10  ;;  %v2816_v2 = vrot.slane %v2814_v50, 1 }
 0x267   : > { %v8493_v47 = vpop.eup %8492  ;;  %v2634_v31 = vsel %vm2445_vm5, %v2281_v13, 0.0  ;;  %8506 = vpow2.f32 %v6540_v20  ;;  %v7500_v41 = vpop.f32.mrf.mxu1  ;;  %v2812_v13 = vshrl.u32 %v2678_v17, 16 }
 0x268   : > { %v8495_v53 = vpop.eup %8494  ;;  %v2679_v11 = vpack.c.bf16 %v2634_v31, %v2634_v31  ;;  %v2124_v1 = vadd.f32 1.0, %v8493_v47  ;;  %v6541_v24 = vmul.f32 -1.442695, %v9938_v39 }
 0x269   : > { %v2282_v61 = vmul.f32 %v8495_v53, %v9837_v29  ;;  %v1860_v52 = vpop.f32.mrf.mxu1 }
 0x26a   : > { %8508 = vrcp.f32 %v2124_v1  ;;  %v9945_v12 = vadd.f32 %v9586_v9, %v1860_v52  ;;  %v2819_v10 = vshll.u32 %v2679_v11, 16  ;;  %v3416_v38 = vrot.slane %v2679_v11, 1 }
 0x26b   : > { %v8497_v59 = vpop.eup %8496  ;;  %8510 = vpow2.f32 %v6541_v24  ;;  %v7503_v20 = vpop.f32.mrf.mxu1  ;;  %v2635_v50 = vsel %vm2386_vm2, %v2282_v61, 0.0  ;;  %v2817_v1 = vor.u32 %v2816_v2, %v2812_v13 }
 0x26c   : > { %v8499_v41 = vpop.eup %8498  ;;  %v2283_v47 = vmul.f32 %v8497_v59, %v9853_v55  ;;  %v6542_v31 = vmul.f32 -1.442695, %v9945_v12  ;;  %v2821_v46 = vrot.slane %v2819_v10, 1  ;;  %v9950_v29 = vsel %vm3390_vm1, %v3415_v49, %v3416_v38  ;;  %v9959_v59 = vld [vmem:[%s11509_s6] ss:$0 sm:$0xff] }
 0x26d   : > { %v2125_v9 = vadd.f32 1.0, %v8499_v41  ;;  %v1863_v53 = vpop.f32.mrf.mxu1 }
 0x26e   : > { %v2680_v11 = vpack.c.bf16 %v2283_v47, %v2635_v50  ;;  %v9954_v52 = vpack.c.bf16 %v2283_v47, %v2282_v61  ;;  %8512 = vpow2.f32 %v6542_v31  ;;  %v9962_v55 = vadd.f32 %v9959_v59, %v1863_v53 }
 0x26f   : > { %v8501_v38 = vpop.eup %8500  ;;  %8514 = vrcp.f32 %v2125_v9  ;;  %v9965_v49 = vsel %vm2714_vm6, %v2817_v1, %v2821_v46  ;;  %v7504_v17 = vpop.f32.mrf.mxu1 }
 0x270   : > { %11584 = vst [vmem:[#allocation40_spill] sm:$0xff] %v9965_v49  ;;  %v8503_v24 = vpop.eup %8502  ;;  %v2826_v2 = vshll.u32 %v2680_v11, 16  ;;  %v2126_v10 = vadd.f32 1.0, %v8501_v38  ;;  %v6543_v61 = vmul.f32 -1.442695, %v9962_v55  ;;  %7569 = vmatprep.mubr.bf16.mxu0 %v9965_v49  ;;  %7618 = vmatmul.mubr.msk.bf16.gmra.mxu1 %vm9645_vm4, %v9954_v52  ;;  %v2824_v38 = vshrl.u32 %v2680_v11, 16 }
 0x271   : > { %v2284_v20 = vmul.f32 %v8503_v24, %v9871_v25  ;;  %v1868_v13 = vpop.f32.mrf.mxu1 }
 0x272   : > { %8516 = vrcp.f32 %v2126_v10  ;;  %v9974_v41 = vadd.f32 %v9959_v59, %v1868_v13  ;;  %v2828_v9 = vrot.slane %v2826_v2, 1  ;;  %v3418_v13 = vrot.slane %v2680_v11, 1 }
 0x273   : > { %v8505_v46 = vpop.eup %8504  ;;  %v2637_v47 = vsel %vm2445_vm5, %v2284_v20, 0.0  ;;  %8518 = vpow2.f32 %v6543_v61  ;;  %v7507_v31 = vpop.f32.mrf.mxu1 }
 0x274   : > { %v8507_v50 = vpop.eup %8506  ;;  %v2681_v53 = vpack.c.bf16 %v2637_v47, %v2637_v47  ;;  %v6544_v1 = vmul.f32 -1.442695, %v9974_v41  ;;  %v2285_v17 = vmul.f32 %v8505_v46, %v9877_v35  ;;  %v2829_v32 = vor.u32 %v2828_v9, %v2824_v38 }
 0x275   : > { %v2127_v25 = vadd.f32 1.0, %v8507_v50  ;;  %v1871_v24 = vpop.f32.mrf.mxu1 }
 0x276   : > { %v2831_v10 = vshll.u32 %v2681_v53, 16  ;;  %v3419_v58 = vrot.slane %v2681_v53, 1  ;;  %8520 = vpow2.f32 %v6544_v1  ;;  %v9981_v20 = vadd.f32 %v9959_v59, %v1871_v24 }
 0x277   : > { %v8509_v33 = vpop.eup %8508  ;;  %8522 = vrcp.f32 %v2127_v25  ;;  %v7508_v61 = vpop.f32.mrf.mxu1  ;;  %v2638_v35 = vsel %vm2386_vm2, %v2285_v17, 0.0 }
 0x278   : > { %v8511_v31 = vpop.eup %8510  ;;  %v2833_v2 = vrot.slane %v2831_v10, 1  ;;  %v2286_v47 = vmul.f32 %v8509_v33, %v9892_v18  ;;  %v9985_v22 = vsel %vm3390_vm1, %v3418_v13, %v3419_v58  ;;  %v6545_v11 = vmul.f32 -1.442695, %v9981_v20 }
 0x279   : > { %11585 = vst [vmem:[#allocation41_spill] sm:$0xff] %v9985_v22  ;;  %v2128_v46 = vadd.f32 1.0, %v8511_v31  ;;  %v1876_v50 = vpop.f32.mrf.mxu1 }
 0x27a   : > { %v2682_v53 = vpack.c.bf16 %v2286_v47, %v2638_v35  ;;  %v9990_v1 = vpack.c.bf16 %v2286_v47, %v2285_v17  ;;  %v9993_v25 = vadd.f32 %v9959_v59, %v1876_v50  ;;  %v9996_v24 = vsel %vm2714_vm6, %v2829_v32, %v2833_v2 }
 0x27b   : > { %11586 = vst [vmem:[#allocation42_spill] sm:$0xff] %v9996_v24  ;;  %v8513_v33 = vpop.eup %8512  ;;  %8524 = vrcp.f32 %v2128_v46  ;;  %7570 = vmatmul.mubr.bf16.gmra.mxu0 %v9996_v24  ;;  %v7511_v58 = vpop.f32.mrf.mxu1 }
 0x27c   : > { %v8515_v18 = vpop.eup %8514  ;;  %v2129_v9 = vadd.f32 1.0, %v8513_v33  ;;  %8526 = vpow2.f32 %v6545_v11  ;;  %v6546_v38 = vmul.f32 -1.442695, %v9993_v25  ;;  %7621 = vmatprep.mubr.msk.bf16.mxu1 %vm9645_vm4, %v9990_v1  ;;  %v2838_v13 = vshll.u32 %v2682_v53, 16 }
 0x27d   : > { %v2287_v17 = vmul.f32 %v8515_v18, %v9903_v26  ;;  %v1879_v10 = vpop.f32.mrf.mxu1  ;;  %v2836_v26 = vshrl.u32 %v2682_v53, 16 }
 0x27e   : > { %8528 = vrcp.f32 %v2129_v9  ;;  %v10005_v32 = vadd.f32 %v9959_v59, %v1879_v10  ;;  %v2840_v11 = vrot.slane %v2838_v13, 1 }
 0x27f   : > { %v8517_v61 = vpop.eup %8516  ;;  %v2640_v31 = vsel %vm2445_vm5, %v2287_v17, 0.0  ;;  %8530 = vpow2.f32 %v6546_v38  ;;  %v7512_v2 = vpop.f32.mrf.mxu1  ;;  %v3421_v38 = vrot.slane %v2682_v53, 1 }
 0x280   : > { %v8519_v47 = vpop.eup %8518  ;;  %v2683_v35 = vpack.c.bf16 %v2640_v31, %v2640_v31  ;;  %v6547_v46 = vmul.f32 -1.442695, %v10005_v32  ;;  %v2288_v58 = vmul.f32 %v8517_v61, %v9908_v21  ;;  %v2841_v13 = vor.u32 %v2840_v11, %v2836_v26 }
 0x281   : > { %v2130_v50 = vadd.f32 1.0, %v8519_v47  ;;  %v1884_v33 = vpop.f32.mrf.mxu1 }
 0x282   : > { %8532 = vpow2.f32 %v6547_v46  ;;  %v10012_v18 = vadd.f32 %v9959_v59, %v1884_v33  ;;  %v2843_v9 = vshll.u32 %v2683_v35, 16  ;;  %v3422_v2 = vrot.slane %v2683_v35, 1 }
 0x283   : > { %v8521_v10 = vpop.eup %8520  ;;  %8534 = vrcp.f32 %v2130_v50  ;;  %v7515_v17 = vpop.f32.mrf.mxu1  ;;  %v2641_v61 = vsel %vm2386_vm2, %v2288_v58, 0.0 }
 0x284   : > { %v8523_v43 = vpop.eup %8522  ;;  %v2131_v31 = vadd.f32 1.0, %v8521_v10  ;;  %v6548_v45 = vmul.f32 -1.442695, %v10012_v18  ;;  %v2845_v47 = vrot.slane %v2843_v9, 1  ;;  %v10017_v21 = vsel %vm3390_vm1, %v3421_v38, %v3422_v2 }
 0x285   : > { %v2289_v14 = vmul.f32 %v8523_v43, %v9928_v37  ;;  %v1887_v24 = vpop.f32.mrf.mxu1  ;;  %11587 = vst [vmem:[#allocation43_spill] sm:$0xff] %v10017_v21 }
 0x286   : > { %8536 = vrcp.f32 %v2131_v31  ;;  %v10022_v46 = vadd.f32 %v9959_v59, %v1887_v24  ;;  %v10025_v53 = vsel %vm2714_vm6, %v2841_v13, %v2845_v47 }
 0x287   : > { %11588 = vst [vmem:[#allocation44_spill] sm:$0xff] %v10025_v53  ;;  %v2684_v35 = vpack.c.bf16 %v2289_v14, %v2641_v61  ;;  %v10027_v50 = vpack.c.bf16 %v2289_v14, %v2288_v58  ;;  %8538 = vpow2.f32 %v6548_v45  ;;  %7573 = vmatprep.mubr.bf16.mxu0 %v10025_v53  ;;  %v7516_v43 = vpop.f32.mrf.mxu1 }
 0x288   : > { %v8525_v37 = vpop.eup %8524  ;;  %v6549_v11 = vmul.f32 -1.442695, %v10022_v46 }
 0x289   : > { %v8527_v33 = vpop.eup %8526  ;;  %v2850_v26 = vshll.u32 %v2684_v35, 16  ;;  %v2290_v9 = vmul.f32 %v8525_v37, %v9938_v39  ;;  %7622 = vmatmul.mubr.msk.bf16.gmra.mxu1 %vm9645_vm4, %v10027_v50  ;;  %v1892_v24 = vpop.f32.mrf.mxu1  ;;  %v2848_v13 = vshrl.u32 %v2684_v35, 16  ;;  %v3424_v43 = vrot.slane %v2684_v35, 1 }
 0x28a   : > { %v2132_v10 = vadd.f32 1.0, %v8527_v33  ;;  %8540 = vpow2.f32 %v6549_v11  ;;  %v10036_v14 = vadd.f32 %v9959_v59, %v1892_v24 }
 0x28b   : > { %v8529_v45 = vpop.eup %8528  ;;  %v2643_v58 = vsel %vm2445_vm5, %v2290_v9, 0.0  ;;  %v7519_v17 = vpop.f32.mrf.mxu1  ;;  %v2852_v2 = vrot.slane %v2850_v26, 1 }
 0x28c   : > { %v8531_v38 = vpop.eup %8530  ;;  %v2685_v31 = vpack.c.bf16 %v2643_v58, %v2643_v58  ;;  %8542 = vrcp.f32 %v2132_v10  ;;  %v6550_v39 = vmul.f32 -1.442695, %v10036_v14  ;;  %v2291_v33 = vmul.f32 %v8529_v45, %v9945_v12 }
 0x28d   : > { %v2133_v47 = vadd.f32 1.0, %v8531_v38  ;;  %v1895_v61 = vpop.f32.mrf.mxu1  ;;  %v2853_v53 = vor.u32 %v2852_v2, %v2848_v13 }
 0x28e   : > { %v2855_v37 = vshll.u32 %v2685_v31, 16  ;;  %v3425_v11 = vrot.slane %v2685_v31, 1  ;;  %8544 = vpow2.f32 %v6550_v39  ;;  %v10043_v9 = vadd.f32 %v9959_v59, %v1895_v61 }
 0x28f   : > { %v8533_v24 = vpop.eup %8532  ;;  %8546 = vrcp.f32 %v2133_v47  ;;  %v7520_v17 = vpop.f32.mrf.mxu1  ;;  %v2644_v12 = vsel %vm2386_vm2, %v2291_v33, 0.0 }
 0x290   : > { %v8535_v26 = vpop.eup %8534  ;;  %v2857_v58 = vrot.slane %v2855_v37, 1  ;;  %v2134_v10 = vadd.f32 1.0, %v8533_v24  ;;  %v10046_v49 = vsel %vm3390_vm1, %v3424_v43, %v3425_v11  ;;  %v6551_v38 = vmul.f32 -1.442695, %v10043_v9 }
 0x291   : > { %11589 = vst [vmem:[#allocation45_spill] sm:$0xff] %v10046_v49  ;;  %v2292_v35 = vmul.f32 %v8535_v26, %v9962_v55  ;;  %v1900_v31 = vpop.f32.mrf.mxu1 }
 0x292   : > { %8548 = vrcp.f32 %v2134_v10  ;;  %v10053_v45 = vadd.f32 %v9959_v59, %v1900_v31  ;;  %v10056_v39 = vsel %vm2714_vm6, %v2853_v53, %v2857_v58 }
 0x293   : > { %11590 = vst [vmem:[#allocation46_spill] sm:$0xff] %v10056_v39  ;;  %v8537_v47 = vpop.eup %8536  ;;  %v2686_v2 = vpack.c.bf16 %v2292_v35, %v2644_v12  ;;  %v10058_v13 = vpack.c.bf16 %v2292_v35, %v2291_v33  ;;  %8550 = vpow2.f32 %v6551_v38  ;;  %7574 = vmatmul.mubr.bf16.gmra.mxu0 %v10056_v39  ;;  %v7523_v55 = vpop.f32.mrf.mxu1 }
 0x294   : > { %v8539_v61 = vpop.eup %8538  ;;  %v2293_v43 = vmul.f32 %v8537_v47, %v9974_v41  ;;  %v6552_v37 = vmul.f32 -1.442695, %v10053_v45 }
 0x295   : > { %v2135_v11 = vadd.f32 1.0, %v8539_v61  ;;  %7625 = vmatprep.mubr.msk.bf16.mxu1 %vm9645_vm4, %v10058_v13  ;;  %v1903_v53 = vpop.f32.mrf.mxu1  ;;  %v2862_v24 = vshll.u32 %v2686_v2, 16  ;;  %v2860_v12 = vshrl.u32 %v2686_v2, 16  ;;  %v3427_v61 = vrot.slane %v2686_v2, 1 }
 0x296   : > { %v2646_v33 = vsel %vm2445_vm5, %v2293_v43, 0.0  ;;  %8552 = vpow2.f32 %v6552_v37  ;;  %v10069_v17 = vadd.f32 %v9959_v59, %v1903_v53 }
 0x297   : > { %v8541_v26 = vpop.eup %8540  ;;  %v2687_v58 = vpack.c.bf16 %v2646_v33, %v2646_v33  ;;  %8554 = vrcp.f32 %v2135_v11  ;;  %v7524_v41 = vpop.f32.mrf.mxu1  ;;  %v2864_v10 = vrot.slane %v2862_v24, 1 }
 0x298   : > { %v2136_v35 = vadd.f32 1.0, %v8541_v26  ;;  %v6553_v38 = vmul.f32 -1.442695, %v10069_v17 }
 0x299   : > { %v8543_v31 = vpop.eup %8542  ;;  %v2867_v47 = vshll.u32 %v2687_v58, 16  ;;  %v10072_v55 = vpop.f32.mrf.mxu1  ;;  %v3428_v39 = vrot.slane %v2687_v58, 1  ;;  %v2865_v53 = vor.u32 %v2864_v10, %v2860_v12 }
 0x29a   : > { %v2294_v43 = vmul.f32 %v8543_v31, %v9981_v20  ;;  %8556 = vrcp.f32 %v2136_v35 }
 0x29b   : > { %v8545_v37 = vpop.eup %8544  ;;  %8558 = vpow2.f32 %v6553_v38  ;;  %v2869_v33 = vrot.slane %v2867_v47, 1  ;;  %v7527_v11 = vpop.f32.mrf.mxu1  ;;  %v10076_v24 = vsel %vm3390_vm1, %v3427_v61, %v3428_v39 }
 0x29c   : > { %11591 = vst [vmem:[#allocation47_spill] sm:$0xff] %v10076_v24  ;;  %v8547_v26 = vpop.eup %8546  ;;  %v2137_v41 = vadd.f32 1.0, %v8545_v37  ;;  %v2647_v20 = vsel %vm2386_vm2, %v2294_v43, 0.0 }
 0x29d   : > { %v2295_v62 = vmul.f32 %v8547_v26, %v9993_v25  ;;  %v10080_v27 = vsel %vm2714_vm6, %v2865_v53, %v2869_v33  ;;  %v10082_v2 = vpop.f32.mrf.mxu1 }
 0x29e   : > { %11592 = vst [vmem:[#allocation48_spill] sm:$0xff] %v10080_v27  ;;  %8560 = vrcp.f32 %v2137_v41  ;;  %7577 = vmatprep.mubr.bf16.mxu0 %v10080_v27 }
 0x29f   : > { %v8549_v58 = vpop.eup %8548  ;;  %v2688_v10 = vpack.c.bf16 %v2295_v62, %v2647_v20  ;;  %v10087_v35 = vpack.c.bf16 %v2295_v62, %v2294_v43  ;;  %v7528_v39 = vpop.f32.mrf.mxu1 }
 0x2a0   : > { %v8551_v38 = vpop.eup %8550  ;;  %v2296_v31 = vmul.f32 %v8549_v58, %v10005_v32 }
 0x2a1   : > { %v2874_v25 = vshll.u32 %v2688_v10, 16  ;;  %v2138_v12 = vadd.f32 1.0, %v8551_v38  ;;  %7626 = vmatmul.mubr.msk.bf16.gmra.mxu1 %vm9645_vm4, %v10087_v35  ;;  %v10093_v47 = vpop.f32.mrf.mxu1  ;;  %v2872_v11 = vshrl.u32 %v2688_v10, 16  ;;  %v3430_v39 = vrot.slane %v2688_v10, 1 }
 0x2a2   : > { %v2649_v61 = vsel %vm2445_vm5, %v2296_v31, 0.0 }
 0x2a3   : > { %v8553_v37 = vpop.eup %8552  ;;  %v2876_v53 = vrot.slane %v2874_v25, 1  ;;  %v2689_v33 = vpack.c.bf16 %v2649_v61, %v2649_v61  ;;  %8562 = vrcp.f32 %v2138_v12  ;;  %v7531_v62 = vpop.f32.mrf.mxu1 }
 0x2a4   : > { %v8555_v43 = vpop.eup %8554  ;;  %v2139_v26 = vadd.f32 1.0, %v8553_v37 }
 0x2a5   : > { %v2879_v32 = vshll.u32 %v2689_v33, 16  ;;  %v3431_v41 = vrot.slane %v2689_v33, 1  ;;  %v2297_v20 = vmul.f32 %v8555_v43, %v10012_v18  ;;  %v1919_v58 = vpop.f32.mrf.mxu1  ;;  %v2877_v60 = vor.u32 %v2876_v53, %v2872_v11 }
 0x2a6   : > { %8564 = vrcp.f32 %v2139_v26 }
 0x2a7   : > { %v8557_v38 = vpop.eup %8556  ;;  %v2881_v27 = vrot.slane %v2879_v32, 1  ;;  %v7532_v56 = vpop.f32.mrf.mxu1  ;;  %v10099_v31 = vsel %vm3390_vm1, %v3430_v39, %v3431_v41  ;;  %v2650_v61 = vsel %vm2386_vm2, %v2297_v20, 0.0 }
 0x2a8   : > { %11593 = vst [vmem:[#allocation49_spill] sm:$0xff] %v10099_v31  ;;  %v8559_v25 = vpop.eup %8558  ;;  %v2298_v12 = vmul.f32 %v8557_v38, %v10022_v46 }
 0x2a9   : > { %v2140_v37 = vadd.f32 1.0, %v8559_v25  ;;  %v10105_v33 = vsel %vm2714_vm6, %v2877_v60, %v2881_v27  ;;  %v1924_v18 = vpop.f32.mrf.mxu1 }
 0x2aa   : > { %v2690_v10 = vpack.c.bf16 %v2298_v12, %v2650_v61  ;;  %v10107_v62 = vpack.c.bf16 %v2298_v12, %v2297_v20  ;;  %7578 = vmatmul.mubr.bf16.gmra.mxu0 %v10105_v33 }
 0x2ab   : > { %v8561_v56 = vpop.eup %8560  ;;  %8566 = vrcp.f32 %v2140_v37  ;;  %v7535_v53 = vpop.f32.mrf.mxu1 }
 0x2ac   : > { %v2299_v43 = vmul.f32 %v8561_v56, %v10036_v14  ;;  %7629 = vmatprep.mubr.msk.bf16.mxu1 %vm9645_vm4, %v10107_v62  ;;  %v2886_v46 = vshll.u32 %v2690_v10, 16  ;;  %v2884_v20 = vshrl.u32 %v2690_v10, 16  ;;  %v3433_v38 = vrot.slane %v2690_v10, 1 }
 0x2ad   : > { %v1927_v11 = vpop.f32.mrf.mxu1 }
 0x2ae   : > { %v2652_v60 = vsel %vm2445_vm5, %v2299_v43, 0.0  ;;  %v2888_v26 = vrot.slane %v2886_v46, 1 }
 0x2af   : > { %v2691_v27 = vpack.c.bf16 %v2652_v60, %v2652_v60  ;;  %v7536_v32 = vpop.f32.mrf.mxu1 }
 0x2b0   : > { %v8563_v41 = vpop.eup %8562  ;;  %v2889_v12 = vor.u32 %v2888_v26, %v2884_v20  ;;  %v8129_v20 = vld [vmem:[%s11510_s7 + $0x170] sm:$0xff]  }
 0x2b1   : > { %v2300_v58 = vmul.f32 %v8563_v41, %v10043_v9  ;;  %v2891_v39 = vshll.u32 %v2691_v27, 16  ;;  %v3434_v25 = vrot.slane %v2691_v27, 1 }
 0x2b3   : > { %v8565_v14 = vpop.eup %8564  ;;  %v2893_v61 = vrot.slane %v2891_v39, 1  ;;  %v10118_v37 = vsel %vm3390_vm1, %v3433_v38, %v3434_v25  ;;  %v2653_v56 = vsel %vm2386_vm2, %v2300_v58, 0.0 }
 0x2b4   : > { %11594 = vst [vmem:[#allocation50_spill] sm:$0xff] %v10118_v37  ;;  %v2301_v18 = vmul.f32 %v8565_v14, %v10053_v45 }
 0x2b5   : > { %v10124_v53 = vsel %vm2714_vm6, %v2889_v12, %v2893_v61  ;;  %v8130_v12 = vld [vmem:[%s11510_s7 + $0x168] sm:$0xff]   ;;  %v8132_v61 = vld [vmem:[%s11510_s7 + $0x160] sm:$0xff]  }
 0x2b6   : > { %v2692_v43 = vpack.c.bf16 %v2301_v18, %v2653_v56  ;;  %v10126_v46 = vpack.c.bf16 %v2301_v18, %v2300_v58  ;;  %7581 = vmatprep.mubr.bf16.mxu0 %v10124_v53  ;;  %v10171_v18 = vadd.f32 %v9959_v59, %v10082_v2  ;;  %v8125_v56 = vld [vmem:[%s11510_s7 + $0x130] sm:$0xff]  }
 0x2b8   : > { %v8567_v9 = vpop.eup %8566  ;;  %v2898_v10 = vshll.u32 %v2692_v43, 16  ;;  %7630 = vmatmul.mubr.msk.bf16.gmra.mxu1 %vm9645_vm4, %v10126_v46  ;;  %v2896_v26 = vshrl.u32 %v2692_v43, 16  ;;  %v3436_v58 = vrot.slane %v2692_v43, 1  ;;  %v6555_v43 = vmul.f32 -1.442695, %v10171_v18 }
 0x2b9   : > { %v2302_v11 = vmul.f32 %v8567_v9, %v10069_v17  ;;  %7697 = vmatprep.mubr.msk.bf16.mxu1 %vm9645_vm4, %v9649_v8  ;;  %v11595_v8 = vmov 0.0|0.0   ;;  %v8126_v9 = vld [vmem:[%s11510_s7 + $0x128] sm:$0xff]  }
 0x2ba   : > { %v2900_v60 = vrot.slane %v2898_v10, 1  ;;  %v10145_v38 = vrot.slane %v11595_v8, 1  ;;  %v8135_v10 = vld [vmem:[%s11510_s7 + $0x150] sm:$0xff]  }
 0x2bb   : > { %v2655_v45 = vsel %vm2445_vm5, %v2302_v11, 0.0  ;;  %v8136_v11 = vld [vmem:[%s11510_s7 + $0x148] sm:$0xff]  }
 0x2bc   : > { %v2693_v27 = vpack.c.bf16 %v2655_v45, %v2655_v45  ;;  %v2901_v17 = vor.u32 %v2900_v60, %v2896_v26  ;;  %11596 = vst [vmem:[#allocation51_spill] sm:$0xff] %v10145_v38  ;;  %v8131_v45 = vld [vmem:[%s11510_s7 + $0x118] sm:$0xff]   ;;  %v8134_v26 = vld [vmem:[%s11510_s7 + $0x110] sm:$0xff]  }
 0x2be   : > { %v2903_v32 = vshll.u32 %v2693_v27, 16  ;;  %v3437_v41 = vrot.slane %v2693_v27, 1  ;;  %v8138_v27 = vld [vmem:[%s11510_s7 + $0x140] sm:$0xff]  }
 0x2c0   : > { %v2905_v39 = vrot.slane %v2903_v32, 1  ;;  %7698 = vmatmul.mubr.msk.bf16.vlgmr.msra.gmra.mxu1 %vm9645_vm4, %v9680_v16  ;;  %v10148_v25 = vsel %vm3390_vm1, %v3436_v58, %v3437_v41  ;;  %v8143_v58 = vld [vmem:[%s11510_s7 + $0x1f8] sm:$0xff]  }
 0x2c1   : > { %11597 = vst [vmem:[#allocation52_spill] sm:$0xff] %v10148_v25  ;;  %7701 = vmatprep.mubr.msk.bf16.mxu1 %vm9645_vm4, %v9720_v4  ;;  %7778 = vmatpush3.bf16.msra.mxu1 %v9923_v48  ;;  %v10167_v48 = vadd.f32 %v9959_v59, %v10072_v55  ;;  %v8133_v55 = vld [vmem:[%s11510_s7 + $0x158] sm:$0xff]  }
 0x2c2   : > { %v10155_v14 = vsel %vm2714_vm6, %v2901_v17, %v2905_v39  ;;  %7779 = vmatprep.subr.bf16.mxu1 %v8129_v20 }
 0x2c3   : > { %7582 = vmatmul.mubr.bf16.gmra.mxu0 %v10155_v14  ;;  %v6554_v2 = vmul.f32 -1.442695, %v10167_v48 }
 0x2c4   : > { %7649 = vmatprep.mubr.bf16.mxu0 %v10145_v38  ;;  %v11610_v38 = vld [vmem:[#allocation40_spill] sm:$0xff] }
 0x2c5   : > { %7780 = vmatpush3.bf16.msra.mxu1 %v8129_v20  ;;  %8568 = vpow2.f32 %v6554_v2 }
 0x2c6   : > { %7781 = vmatprep.subr.bf16.mxu1 %v8130_v12  ;;  %8570 = vpow2.f32 %v6555_v43 }
 0x2c8   : > { %7702 = vmatmul.mubr.msk.bf16.gmra.mxu1 %vm9645_vm4, %v9770_v19 }
 0x2c9   : > { %7705 = vmatprep.mubr.msk.bf16.mxu1 %vm9645_vm4, %v9816_v30  ;;  %7782 = vmatpush3.bf16.msra.mxu1 %v8130_v12 }
 0x2ca   : > { %7783 = vmatprep.subr.bf16.mxu1 %v8132_v61 }
 0x2cb   : > { %7650 = vmatmul.mubr.bf16.vlgmr.msra.gmra.mxu0 %v9671_v6 }
 0x2cc   : > { %7730 = vmatpush3.bf16.msra.mxu0 %v9863_v5  ;;  %7653 = vmatprep.mubr.bf16.mxu0 %v9710_v34  ;;  %v8128_v5 = vld [vmem:[%s11510_s7 + $0x120] sm:$0xff]  }
 0x2cd   : > { %7731 = vmatprep.subr.bf16.mxu0 %v8125_v56  ;;  %7784 = vmatpush3.bf16.msra.mxu1 %v8132_v61 }
 0x2ce   : > { %7785 = vmatprep.subr.bf16.mxu1 %v8133_v55 }
 0x2d0   : > { %7706 = vmatmul.mubr.msk.bf16.gmra.mxu1 %vm9645_vm4, %v9856_v3  ;;  %7732 = vmatpush3.bf16.msra.mxu0 %v8125_v56  ;;  %v7603_v60 = vpop.f32.mrf.mxu1  ;;  %v8137_v56 = vld [vmem:[%s11510_s7 + $0x108] sm:$0xff]  }
 0x2d1   : > { %7709 = vmatprep.mubr.msk.bf16.mxu1 %vm9645_vm4, %v9889_v63  ;;  %7733 = vmatprep.subr.bf16.mxu0 %v8126_v9 }
 0x2d2   : > { %7786 = vmatpush3.bf16.msra.mxu1 %v8133_v55  ;;  %v3231_v32 = vpop.f32.mrf.mxu1  ;;  %v8569_v39 = vpop.eup %8568 }
 0x2d3   : > { %7654 = vmatmul.mubr.bf16.gmra.mxu0 %v9751_v23  ;;  %7787 = vmatprep.subr.bf16.mxu1 %v8135_v10  ;;  %v8571_v12 = vpop.eup %8570  ;;  %v2141_v43 = vadd.f32 1.0, %v8569_v39 }
 0x2d4   : > { %7657 = vmatprep.mubr.bf16.mxu0 %v9800_v36  ;;  %7734 = vmatpush3.bf16.msra.mxu0 %v8126_v9  ;;  %v7604_v55 = vpop.f32.mrf.mxu1 }
 0x2d5   : > { %7735 = vmatprep.subr.bf16.mxu0 %v8128_v5  ;;  %8572 = vrcp.f32 %v2141_v43 }
 0x2d6   : > { %7788 = vmatpush3.bf16.msra.mxu1 %v8135_v10  ;;  %v2142_v10 = vadd.f32 1.0, %v8571_v12 }
 0x2d7   : > { %7789 = vmatprep.subr.bf16.mxu1 %v8136_v11 }
 0x2d8   : > { %7710 = vmatmul.mubr.msk.bf16.gmra.mxu1 %vm9645_vm4, %v9925_v42  ;;  %7736 = vmatpush3.bf16.msra.mxu0 %v8128_v5  ;;  %v8139_v5 = vld [vmem:[%s11510_s7 + $0x100] sm:$0xff]   ;;  %8574 = vrcp.f32 %v2142_v10 }
 0x2d9   : > { %7713 = vmatprep.mubr.msk.bf16.mxu1 %vm9645_vm4, %v9954_v52  ;;  %7737 = vmatprep.subr.bf16.mxu0 %v8131_v45 }
 0x2da   : > { %v7555_v41 = vpop.f32.mrf.mxu0  ;;  %7790 = vmatpush3.bf16.msra.mxu1 %v8136_v11  ;;  %v8140_v11 = vld [vmem:[%s11510_s7 + $0x1b8] sm:$0xff]  }
 0x2db   : > { %v10225_v20 = vadd.f32 %v7603_v60, %v7555_v41  ;;  %7658 = vmatmul.mubr.bf16.gmra.mxu0 %v9843_v15  ;;  %7791 = vmatprep.subr.bf16.mxu1 %v8138_v27 }
 0x2dc   : > { %7661 = vmatprep.mubr.bf16.mxu0 %v9880_v54  ;;  %v3022_v17 = vpop.f32.mrf.mxu0  ;;  %7738 = vmatpush3.bf16.msra.mxu0 %v8131_v45  ;;  %v10261_v45 = vpop.f32.mrf.mxu1 }
 0x2dd   : > { %v10232_v61 = vadd.f32 %v3231_v32, %v3022_v17  ;;  %7739 = vmatprep.subr.bf16.mxu0 %v8134_v26  ;;  %11598 = vst [vmem:[#allocation53_spill] sm:$0xff] %v10261_v45 }
 0x2de   : > { %v7556_v2 = vpop.f32.mrf.mxu0  ;;  %7792 = vmatpush3.bf16.msra.mxu1 %v8138_v27 }
 0x2df   : > { %v10237_v9 = vadd.f32 %v7604_v55, %v7556_v2  ;;  %7873 = vmatprep.subr.bf16.mxu1 %v8143_v58 }
 0x2e0   : > { %7714 = vmatmul.mubr.msk.bf16.gmra.mxu1 %vm9645_vm4, %v9990_v1  ;;  %7740 = vmatpush3.bf16.msra.mxu0 %v8134_v26  ;;  %v10266_v32 = vpop.f32.mrf.mxu0 }
 0x2e1   : > { %7717 = vmatprep.mubr.msk.bf16.mxu1 %vm9645_vm4, %v10027_v50  ;;  %7741 = vmatprep.subr.bf16.mxu0 %v8137_v56  ;;  %11599 = vst [vmem:[#allocation54_spill] sm:$0xff] %v10266_v32 }
 0x2e2   : > { %v8573_v27 = vpop.eup %8572 }
 0x2e3   : > { %7662 = vmatmul.mubr.bf16.gmra.mxu0 %v9911_v28  ;;  %v10273_v17 = vmul.f32 %v8573_v27, %v10167_v48  ;;  %v10296_v48 = vadd.f32 %v9959_v59, %v10093_v47  ;;  %v8148_v27 = vld [vmem:[%s11510_s7 + $0x1e0] sm:$0xff]  }
 0x2e4   : > { %7665 = vmatprep.mubr.bf16.mxu0 %v9950_v29  ;;  %7742 = vmatpush3.bf16.msra.mxu0 %v8137_v56 }
 0x2e5   : > { %7743 = vmatprep.subr.bf16.mxu0 %v8139_v5  ;;  %v8575_v26 = vpop.eup %8574 }
 0x2e6   : > { %v10276_v12 = vmul.f32 %v8575_v26, %v10171_v18  ;;  %v8145_v18 = vld [vmem:[%s11510_s7 + $0x1f0] sm:$0xff]  }
 0x2e7   : > { %v8141_v26 = vld [vmem:[%s11510_s7 + $0x1b0] sm:$0xff]  }
 0x2e8   : > { %7718 = vmatmul.mubr.msk.bf16.gmra.mxu1 %vm9645_vm4, %v10058_v13  ;;  %7744 = vmatpush3.bf16.msra.mxu0 %v8139_v5  ;;  %v10283_v2 = vpack.c.bf16 %v10276_v12, %v10273_v17 }
 0x2e9   : > { %7721 = vmatprep.mubr.msk.bf16.mxu1 %vm9645_vm4, %v10087_v35  ;;  %7825 = vmatprep.subr.bf16.mxu0 %v8140_v11  ;;  %v7607_v60 = vpop.f32.mrf.mxu1 }
 0x2eb   : > { %7666 = vmatmul.mubr.bf16.gmra.mxu0 %v9985_v22  ;;  %v3247_v41 = vpop.f32.mrf.mxu1 }
 0x2ec   : > { %7669 = vmatprep.mubr.bf16.mxu0 %v10017_v21 }
 0x2ed   : > { %v7608_v10 = vpop.f32.mrf.mxu1 }
 0x2ef   : > { %v10309_v59 = vpop.f32.mrf.mxu1 }
 0x2f0   : > { %7722 = vmatmul.mubr.msk.bf16.gmra.mxu1 %vm9645_vm4, %v10107_v62  ;;  %11600 = vst [vmem:[#allocation55_spill] sm:$0xff] %v10309_v59 }
 0x2f1   : > { %7725 = vmatprep.mubr.msk.bf16.mxu1 %vm9645_vm4, %v10126_v46 }
 0x2f3   : > { %v7559_v39 = vpop.f32.mrf.mxu0  ;;  %7670 = vmatmul.mubr.bf16.gmra.mxu0 %v10046_v49 }
 0x2f4   : > { %v10278_v56 = vadd.f32 %v7607_v60, %v7559_v39  ;;  %7673 = vmatprep.mubr.bf16.mxu0 %v10076_v24  ;;  %v6556_v60 = vmul.f32 -1.442695, %v10296_v48  ;;  %v8149_v39 = vld [vmem:[%s11510_s7 + $0x1d8] sm:$0xff]  }
 0x2f5   : > { %v3038_v55 = vpop.f32.mrf.mxu0 }
 0x2f6   : > { %v10285_v43 = vadd.f32 %v3247_v41, %v3038_v55  ;;  %8576 = vpow2.f32 %v6556_v60 }
 0x2f7   : > { %v7560_v5 = vpop.f32.mrf.mxu0 }
 0x2f8   : > { %v10287_v45 = vadd.f32 %v7608_v10, %v7560_v5  ;;  %7726 = vmatmul.mubr.msk.bf16.gmra.mxu1 %vm9645_vm4, %v10283_v2 }
 0x2f9   : > { %7793 = vmatprep.mubr.bf16.mxu1 %v9671_v6  ;;  %v8146_v6 = vld [vmem:[%s11510_s7 + $0x1e8] sm:$0xff]  }
 0x2fb   : > { %7674 = vmatmul.mubr.bf16.gmra.mxu0 %v10099_v31 }
 0x2fc   : > { %7677 = vmatprep.mubr.bf16.mxu0 %v10118_v37 }
 0x300   : > { %7794 = vmatmul.mubr.bf16.vlgmr.msra.gmra.mxu1 %v9710_v34 }
 0x301   : > { %7797 = vmatprep.mubr.bf16.mxu1 %v9751_v23  ;;  %7874 = vmatpush3.bf16.msra.mxu1 %v8143_v58  ;;  %v7611_v47 = vpop.f32.mrf.mxu1  ;;  %v10315_v58 = vpop.f32.mrf.mxu0 }
 0x302   : > { %7875 = vmatprep.subr.bf16.mxu1 %v8145_v18  ;;  %11601 = vst [vmem:[#allocation56_spill] sm:$0xff] %v10315_v58 }
 0x303   : > { %7678 = vmatmul.mubr.bf16.gmra.mxu0 %v10148_v25  ;;  %v3263_v41 = vpop.f32.mrf.mxu1 }
 0x304   : > { %7745 = vmatprep.mubr.bf16.mxu0 %v9678_v57 }
 0x305   : > { %7876 = vmatpush3.bf16.msra.mxu1 %v8145_v18  ;;  %v8142_v18 = vld [vmem:[%s11510_s7 + $0x1a8] sm:$0xff]   ;;  %v7612_v60 = vpop.f32.mrf.mxu1 }
 0x306   : > { %7877 = vmatprep.subr.bf16.mxu1 %v8146_v6 }
 0x308   : > { %7798 = vmatmul.mubr.bf16.gmra.mxu1 %v9800_v36 }
 0x309   : > { %7801 = vmatprep.mubr.bf16.mxu1 %v9843_v15  ;;  %7878 = vmatpush3.bf16.msra.mxu1 %v8146_v6 }
 0x30a   : > { %v7563_v57 = vpop.f32.mrf.mxu0  ;;  %7879 = vmatprep.subr.bf16.mxu1 %v8148_v27 }
 0x30b   : > { %v10325_v55 = vadd.f32 %v7611_v47, %v7563_v57  ;;  %7746 = vmatmul.mubr.bf16.vlgmr.msra.gmra.mxu0 %v9718_v7  ;;  %v8577_v47 = vpop.eup %8576  ;;  %v8152_v57 = vld [vmem:[%s11510_s7 + $0x1c8] sm:$0xff]  }
 0x30c   : > { %7826 = vmatpush3.bf16.msra.mxu0 %v8140_v11  ;;  %7749 = vmatprep.mubr.bf16.mxu0 %v9762_v51  ;;  %v3054_v10 = vpop.f32.mrf.mxu0  ;;  %v8151_v11 = vld [vmem:[%s11510_s7 + $0x1d0] sm:$0xff]  }
 0x30d   : > { %v10329_v5 = vadd.f32 %v3263_v41, %v3054_v10  ;;  %7827 = vmatprep.subr.bf16.mxu0 %v8141_v26  ;;  %7880 = vmatpush3.bf16.msra.mxu1 %v8148_v27  ;;  %v8144_v27 = vld [vmem:[%s11510_s7 + $0x1a0] sm:$0xff]   ;;  %v2143_v10 = vadd.f32 1.0, %v8577_v47  ;;  %v11608_v47 = vld [vmem:[#allocation39_spill] sm:$0xff] }
 0x30e   : > { %v7564_v6 = vpop.f32.mrf.mxu0  ;;  %7881 = vmatprep.subr.bf16.mxu1 %v8149_v39  ;;  %v11604_v41 = vld [vmem:[#allocation36_spill] sm:$0xff] }
 0x30f   : > { %11602 = vst [vmem:[#allocation57_spill] sm:$0xff] %v10329_v5  ;;  %v10334_v59 = vadd.f32 %v7612_v60, %v7564_v6  ;;  %v11605_v60 = vld [vmem:[#allocation37_spill] sm:$0xff]  ;;  %8578 = vrcp.f32 %v2143_v10  ;;  %v11606_v6 = vld [vmem:[#allocation38_spill] sm:$0xff] }
 0x310   : > { %7802 = vmatmul.mubr.bf16.gmra.mxu1 %v9880_v54  ;;  %7828 = vmatpush3.bf16.msra.mxu0 %v8141_v26  ;;  %v8147_v26 = vld [vmem:[%s11510_s7 + $0x198] sm:$0xff]   ;;  %v10367_v58 = vpop.f32.mrf.mxu0 }
 0x311   : > { %11603 = vst [vmem:[#allocation58_spill] sm:$0xff] %v10334_v59  ;;  %7805 = vmatprep.mubr.bf16.mxu1 %v9911_v28  ;;  %7829 = vmatprep.subr.bf16.mxu0 %v8142_v18  ;;  %11609 = vst [vmem:[#allocation37_spill] sm:$0xff] %v10367_v58 }
 0x312   : > { %7882 = vmatpush3.bf16.msra.mxu1 %v8149_v39  ;;  %v8154_v39 = vld [vmem:[%s11510_s7 + $0x1c0] sm:$0xff]  }
 0x313   : > { %7750 = vmatmul.mubr.bf16.gmra.mxu0 %v11604_v41  ;;  %7883 = vmatprep.subr.bf16.mxu1 %v8151_v11 }
 0x314   : > { %7753 = vmatprep.mubr.bf16.mxu0 %v11605_v60  ;;  %7830 = vmatpush3.bf16.msra.mxu0 %v8142_v18  ;;  %v8150_v18 = vld [vmem:[%s11510_s7 + $0x190] sm:$0xff]  }
 0x315   : > { %7831 = vmatprep.subr.bf16.mxu0 %v8144_v27 }
 0x316   : > { %7884 = vmatpush3.bf16.msra.mxu1 %v8151_v11  ;;  %v10361_v11 = vpop.f32.mrf.mxu1 }
 0x317   : > { %7885 = vmatprep.subr.bf16.mxu1 %v8152_v57  ;;  %11607 = vst [vmem:[#allocation36_spill] sm:$0xff] %v10361_v11 }
 0x318   : > { %7806 = vmatmul.mubr.bf16.gmra.mxu1 %v9950_v29  ;;  %7832 = vmatpush3.bf16.msra.mxu0 %v8144_v27  ;;  %v8153_v27 = vld [vmem:[%s11510_s7 + $0x188] sm:$0xff]   ;;  %v7615_v10 = vpop.f32.mrf.mxu1 }
 0x319   : > { %7809 = vmatprep.mubr.bf16.mxu1 %v9985_v22  ;;  %7833 = vmatprep.subr.bf16.mxu0 %v8147_v26  ;;  %v11611_v22 = vld [vmem:[#allocation42_spill] sm:$0xff] }
 0x31a   : > { %7886 = vmatpush3.bf16.msra.mxu1 %v8152_v57  ;;  %v8155_v57 = vld [vmem:[%s11510_s7 + $0x180] sm:$0xff]  }
 0x31b   : > { %7754 = vmatmul.mubr.bf16.gmra.mxu0 %v11606_v6  ;;  %7887 = vmatprep.subr.bf16.mxu1 %v8154_v39 }
 0x31c   : > { %7757 = vmatprep.mubr.bf16.mxu0 %v11608_v47  ;;  %7834 = vmatpush3.bf16.msra.mxu0 %v8147_v26  ;;  %v3279_v26 = vpop.f32.mrf.mxu1  ;;  %v8579_v58 = vpop.eup %8578 }
 0x31d   : > { %7835 = vmatprep.subr.bf16.mxu0 %v8150_v18 }
 0x31e   : > { %7888 = vmatpush3.bf16.msra.mxu1 %v8154_v39 }
 0x320   : > { %7810 = vmatmul.mubr.bf16.gmra.mxu1 %v10017_v21  ;;  %7836 = vmatpush3.bf16.msra.mxu0 %v8150_v18  ;;  %v8156_v18 = vld [vmem:[%s11510_s7 + $0x238] sm:$0xff]  }
 0x321   : > { %7813 = vmatprep.mubr.bf16.mxu1 %v10046_v49  ;;  %7837 = vmatprep.subr.bf16.mxu0 %v8153_v27  ;;  %v7616_v49 = vpop.f32.mrf.mxu1 }
 0x322   : > { %v7567_v11 = vpop.f32.mrf.mxu0 }
 0x323   : > { %v10374_v32 = vadd.f32 %v7615_v10, %v7567_v11  ;;  %7758 = vmatmul.mubr.bf16.gmra.mxu0 %v11610_v38  ;;  %v2305_v11 = vmul.f32 %v8579_v58, %v10296_v48  ;;  %v10400_v44 = vpop.f32.mrf.mxu1 }
 0x324   : > { %7761 = vmatprep.mubr.bf16.mxu0 %v11611_v22  ;;  %v3070_v39 = vpop.f32.mrf.mxu0  ;;  %7838 = vmatpush3.bf16.msra.mxu0 %v8153_v27  ;;  %v11614_v27 = vld [vmem:[#allocation44_spill] sm:$0xff]  ;;  %11617 = vst [vmem:[#allocation40_spill] sm:$0xff] %v10400_v44 }
 0x325   : > { %v10378_v21 = vadd.f32 %v3279_v26, %v3070_v39  ;;  %7839 = vmatprep.subr.bf16.mxu0 %v8155_v57  ;;  %v2658_v10 = vsel %vm2445_vm5, %v2305_v11, 0.0  ;;  %v11615_v26 = vld [vmem:[#allocation46_spill] sm:$0xff] }
 0x326   : > { %v7568_v59 = vpop.f32.mrf.mxu0 }
 0x327   : > { %11612 = vst [vmem:[#allocation38_spill] sm:$0xff] %v10378_v21  ;;  %v10383_v5 = vadd.f32 %v7616_v49, %v7568_v59  ;;  %v2656_v49 = vsel %vm2386_vm2, %v10273_v17, 0.0  ;;  %v2695_v59 = vpack.c.bf16 %v2658_v10, %v2658_v10 }
 0x328   : > { %7814 = vmatmul.mubr.bf16.gmra.mxu1 %v10076_v24  ;;  %7840 = vmatpush3.bf16.msra.mxu0 %v8155_v57  ;;  %v2694_v48 = vpack.c.bf16 %v10276_v12, %v2656_v49  ;;  %v11616_v57 = vld [vmem:[#allocation48_spill] sm:$0xff]  ;;  %v10406_v17 = vpop.f32.mrf.mxu0 }
 0x329   : > { %11613 = vst [vmem:[#allocation39_spill] sm:$0xff] %v10383_v5  ;;  %7817 = vmatprep.mubr.bf16.mxu1 %v10099_v31  ;;  %7921 = vmatprep.subr.bf16.mxu0 %v8156_v18  ;;  %v4245_v58 = vrot.slane %v2695_v59, 1  ;;  %11619 = vst [vmem:[#allocation44_spill] sm:$0xff] %v10406_v17  ;;  %v3979_v49 = vshll.u32 %v2695_v59, 16 }
 0x32a   : > { %v4244_v39 = vrot.slane %v2694_v48, 1  ;;  %v3974_v11 = vshll.u32 %v2694_v48, 16  ;;  %v3972_v12 = vshrl.u32 %v2694_v48, 16 }
 0x32b   : > { %7762 = vmatmul.mubr.bf16.gmra.mxu0 %v11614_v27 }
 0x32c   : > { %7765 = vmatprep.mubr.bf16.mxu0 %v11615_v26  ;;  %v10403_v0 = vsel %vm3390_vm1, %v4244_v39, %v4245_v58  ;;  %v3976_v10 = vrot.slane %v3974_v11, 1  ;;  %v3981_v58 = vrot.slane %v3979_v49, 1 }
 0x32d   : > { %11618 = vst [vmem:[#allocation42_spill] sm:$0xff] %v10403_v0 }
 0x330   : > { %7818 = vmatmul.mubr.bf16.gmra.mxu1 %v10118_v37  ;;  %v7619_v31 = vpop.f32.mrf.mxu1 }
 0x331   : > { %7821 = vmatprep.mubr.bf16.mxu1 %v10148_v25 }
 0x332   : > { %v3295_v25 = vpop.f32.mrf.mxu1 }
 0x333   : > { %7766 = vmatmul.mubr.bf16.gmra.mxu0 %v11616_v57 }
 0x334   : > { %7769 = vmatprep.mubr.bf16.mxu0 %v10105_v33  ;;  %v7620_v5 = vpop.f32.mrf.mxu1 }
 0x338   : > { %7822 = vmatmul.mubr.bf16.gmra.mxu1 %v10403_v0  ;;  %v3977_v0 = vor.u32 %v3976_v10, %v3972_v12 }
 0x339   : > { %7889 = vmatprep.mubr.bf16.mxu1 %v9718_v7 }
 0x33a   : > { %v10420_v7 = vsel %vm2714_vm6, %v3977_v0, %v3981_v58 }
 0x33b   : > { %v7571_v37 = vpop.f32.mrf.mxu0  ;;  %7770 = vmatmul.mubr.bf16.gmra.mxu0 %v10124_v53 }
 0x33c   : > { %v10410_v24 = vadd.f32 %v7619_v31, %v7571_v37  ;;  %7773 = vmatprep.mubr.bf16.mxu0 %v10155_v14  ;;  %v8157_v31 = vld [vmem:[%s11510_s7 + $0x230] sm:$0xff]  }
 0x33d   : > { %v3086_v44 = vpop.f32.mrf.mxu0 }
 0x33e   : > { %v10413_v39 = vadd.f32 %v3295_v25, %v3086_v44 }
 0x33f   : > { %v7572_v17 = vpop.f32.mrf.mxu0 }
 0x340   : > { %v10415_v21 = vadd.f32 %v7620_v5, %v7572_v17  ;;  %7890 = vmatmul.mubr.bf16.vlgmr.msra.gmra.mxu1 %v9762_v51  ;;  %v10437_v51 = vpop.f32.mrf.mxu1 }
 0x341   : > { %7893 = vmatprep.mubr.bf16.mxu1 %v11604_v41  ;;  %v10443_v25 = vpop.f32.mrf.mxu0 }
 0x343   : > { %7774 = vmatmul.mubr.bf16.gmra.mxu0 %v10420_v7 }
 0x344   : > { %7841 = vmatprep.mubr.msk.bf16.mxu0 %vm9645_vm4, %v9680_v16  ;;  %v8158_v16 = vld [vmem:[%s11510_s7 + $0x228] sm:$0xff]  }
 0x348   : > { %7894 = vmatmul.mubr.bf16.gmra.mxu1 %v11605_v60 }
 0x349   : > { %7897 = vmatprep.mubr.bf16.mxu1 %v11606_v6  ;;  %v7623_v37 = vpop.f32.mrf.mxu1 }
 0x34b   : > { %7842 = vmatmul.mubr.msk.bf16.vlgmr.msra.gmra.mxu0 %vm9645_vm4, %v9720_v4  ;;  %v8159_v4 = vld [vmem:[%s11510_s7 + $0x220] sm:$0xff]  }
 0x34c   : > { %7922 = vmatpush3.bf16.msra.mxu0 %v8156_v18  ;;  %7845 = vmatprep.mubr.msk.bf16.mxu0 %vm9645_vm4, %v9770_v19  ;;  %v3311_v19 = vpop.f32.mrf.mxu1 }
 0x34d   : > { %7923 = vmatprep.subr.bf16.mxu0 %v8157_v31 }
 0x350   : > { %7898 = vmatmul.mubr.bf16.gmra.mxu1 %v11608_v47  ;;  %7924 = vmatpush3.bf16.msra.mxu0 %v8157_v31  ;;  %v7624_v47 = vpop.f32.mrf.mxu1 }
 0x351   : > { %7901 = vmatprep.mubr.bf16.mxu1 %v11610_v38  ;;  %7925 = vmatprep.subr.bf16.mxu0 %v8158_v16  ;;  %v8160_v38 = vld [vmem:[%s11510_s7 + $0x218] sm:$0xff]  }
 0x353   : > { %v7575_v5 = vpop.f32.mrf.mxu0  ;;  %7846 = vmatmul.mubr.msk.bf16.gmra.mxu0 %vm9645_vm4, %v9816_v30  ;;  %v8161_v30 = vld [vmem:[%s11510_s7 + $0x210] sm:$0xff]  }
 0x354   : > { %v10452_v41 = vadd.f32 %v7623_v37, %v7575_v5  ;;  %7849 = vmatprep.mubr.msk.bf16.mxu0 %vm9645_vm4, %v9856_v3  ;;  %7926 = vmatpush3.bf16.msra.mxu0 %v8158_v16  ;;  %v8163_v3 = vld [vmem:[%s11510_s7 + $0x200] sm:$0xff]  }
 0x355   : > { %v3102_v60 = vpop.f32.mrf.mxu0  ;;  %7927 = vmatprep.subr.bf16.mxu0 %v8159_v4 }
 0x356   : > { %v10460_v6 = vadd.f32 %v3311_v19, %v3102_v60 }
 0x357   : > { %v7576_v18 = vpop.f32.mrf.mxu0 }
 0x358   : > { %v10462_v59 = vadd.f32 %v7624_v47, %v7576_v18  ;;  %7902 = vmatmul.mubr.bf16.gmra.mxu1 %v11611_v22  ;;  %7928 = vmatpush3.bf16.msra.mxu0 %v8159_v4  ;;  %v8162_v22 = vld [vmem:[%s11510_s7 + $0x208] sm:$0xff]  }
 0x359   : > { %7905 = vmatprep.mubr.bf16.mxu1 %v11614_v27  ;;  %7929 = vmatprep.subr.bf16.mxu0 %v8160_v38  ;;  %v10491_v27 = vpop.f32.mrf.mxu0 }
 0x35b   : > { %7850 = vmatmul.mubr.msk.bf16.gmra.mxu0 %vm9645_vm4, %v9889_v63  ;;  %v10486_v63 = vpop.f32.mrf.mxu1 }
 0x35c   : > { %7853 = vmatprep.mubr.msk.bf16.mxu0 %vm9645_vm4, %v9925_v42  ;;  %7930 = vmatpush3.bf16.msra.mxu0 %v8160_v38 }
 0x35d   : > { %7931 = vmatprep.subr.bf16.mxu0 %v8161_v30 }
 0x360   : > { %7906 = vmatmul.mubr.bf16.gmra.mxu1 %v11615_v26  ;;  %7932 = vmatpush3.bf16.msra.mxu0 %v8161_v30 }
 0x361   : > { %7909 = vmatprep.mubr.bf16.mxu1 %v11616_v57  ;;  %7933 = vmatprep.subr.bf16.mxu0 %v8162_v22  ;;  %v7627_v42 = vpop.f32.mrf.mxu1 }
 0x363   : > { %7854 = vmatmul.mubr.msk.bf16.gmra.mxu0 %vm9645_vm4, %v9954_v52  ;;  %v3327_v26 = vpop.f32.mrf.mxu1 }
 0x364   : > { %7857 = vmatprep.mubr.msk.bf16.mxu0 %vm9645_vm4, %v9990_v1  ;;  %7934 = vmatpush3.bf16.msra.mxu0 %v8162_v22 }
 0x365   : > { %7935 = vmatprep.subr.bf16.mxu0 %v8163_v3  ;;  %v7628_v44 = vpop.f32.mrf.mxu1 }
 0x368   : > { %7910 = vmatmul.mubr.bf16.gmra.mxu1 %v10105_v33  ;;  %7936 = vmatpush3.bf16.msra.mxu0 %v8163_v3 }
 0x369   : > { %7913 = vmatprep.mubr.bf16.mxu1 %v10124_v53  ;;  %v11620_v53 = vld [vmem:[#allocation23_spill] sm:$0xff] }
 0x36a   : > { %v7579_v48 = vpop.f32.mrf.mxu0 }
 0x36b   : > { %v10495_v57 = vadd.f32 %v7627_v42, %v7579_v48  ;;  %7858 = vmatmul.mubr.msk.bf16.gmra.mxu0 %vm9645_vm4, %v10027_v50  ;;  %v10515_v50 = vpop.f32.mrf.mxu1 }
 0x36c   : > { %7861 = vmatprep.mubr.msk.bf16.mxu0 %vm9645_vm4, %v10058_v13  ;;  %v3118_v52 = vpop.f32.mrf.mxu0 }
 0x36d   : > { %v10503_v1 = vadd.f32 %v3327_v26, %v3118_v52 }
 0x36e   : > { %v7580_v33 = vpop.f32.mrf.mxu0 }
 0x36f   : > { %v10505_v11 = vadd.f32 %v7628_v44, %v7580_v33 }
 0x370   : > { %7914 = vmatmul.mubr.bf16.gmra.mxu1 %v10155_v14  ;;  %v10526_v12 = vpop.f32.mrf.mxu0 }
 0x371   : > { %7917 = vmatprep.mubr.bf16.mxu1 %v10420_v7 }
 0x373   : > { %7862 = vmatmul.mubr.msk.bf16.gmra.mxu0 %vm9645_vm4, %v10087_v35 }
 0x374   : > { %7865 = vmatprep.mubr.msk.bf16.mxu0 %vm9645_vm4, %v10107_v62 }
 0x378   : > { %v7631_v13 = vpop.f32.mrf.mxu1  ;;  %7918 = vmatmul.mubr.bf16.gmra.mxu1 %v11620_v53 }
 0x37a   : > { %v3343_v0 = vpop.f32.mrf.mxu1 }
 0x37b   : > { %7866 = vmatmul.mubr.msk.bf16.gmra.mxu0 %vm9645_vm4, %v10126_v46 }
 0x37c   : > { %7869 = vmatprep.mubr.msk.bf16.mxu0 %vm9645_vm4, %v10283_v2  ;;  %v7632_v14 = vpop.f32.mrf.mxu1 }
 0x37e   : > { %v10524_v35 = vpop.f32.mrf.mxu1 }
 0x380   : > { %v7699_v17 = vpop.f32.mrf.mxu1 }
 0x382   : > { %v3812_v62 = vpop.f32.mrf.mxu1 }
 0x383   : > { %v7583_v10 = vpop.f32.mrf.mxu0  ;;  %7870 = vmatmul.mubr.bf16.gmra.mxu0 %v11595_v8 }
 0x384   : > { %v10529_v49 = vadd.f32 %v7631_v13, %v7583_v10  ;;  %7937 = vmatprep.mubr.bf16.mxu0 %v9710_v34  ;;  %v7700_v58 = vpop.f32.mrf.mxu1  ;;  %v11621_v10 = vld [vmem:[#allocation57_spill] sm:$0xff] }
 0x385   : > { %v3134_v46 = vpop.f32.mrf.mxu0 }
 0x386   : > { %v10532_v7 = vadd.f32 %v3343_v0, %v3134_v46  ;;  %v10534_v40 = vpop.f32.mrf.mxu1 }
 0x387   : > { %v7584_v2 = vpop.f32.mrf.mxu0 }
 0x388   : > { %v10536_v31 = vadd.f32 %v7632_v14, %v7584_v2  ;;  %v7703_v16 = vpop.f32.mrf.mxu1 }
 0x389   : > { %v10538_v37 = vpop.f32.mrf.mxu0 }
 0x38a   : > { %v3828_v4 = vpop.f32.mrf.mxu1 }
 0x38b   : > { %v7651_v19 = vpop.f32.mrf.mxu0  ;;  %7938 = vmatmul.mubr.bf16.vlgmr.msra.gmra.mxu0 %v9751_v23 }
 0x38c   : > { %v3683_v8 = vadd.f32 %v7651_v19, %v10225_v20  ;;  %7941 = vmatprep.mubr.bf16.mxu0 %v9800_v36  ;;  %v7704_v34 = vpop.f32.mrf.mxu1 }
 0x38d   : > { %v3554_v5 = vpop.f32.mrf.mxu0 }
 0x38e   : > { %v3681_v60 = vadd.f32 %v3554_v5, %v10232_v61  ;;  %v10544_v38 = vpop.f32.mrf.mxu1  ;;  %v10546_v47 = vadd.f32 %v7699_v17, %v3683_v8  ;;  %v11623_v5 = vld [vmem:[#allocation41_spill] sm:$0xff] }
 0x38f   : > { %v7652_v18 = vpop.f32.mrf.mxu0 }
 0x390   : > { %v3684_v30 = vadd.f32 %v7652_v18, %v10237_v9  ;;  %v7707_v22 = vpop.f32.mrf.mxu1  ;;  %v10549_v3 = vadd.f32 %v3812_v62, %v3681_v60  ;;  %v11624_v18 = vld [vmem:[#allocation43_spill] sm:$0xff] }
 0x391   : > { %v10551_v42 = vpop.f32.mrf.mxu0 }
 0x392   : > { %v3844_v23 = vpop.f32.mrf.mxu1  ;;  %v10553_v20 = vadd.f32 %v7700_v58, %v3684_v30 }
 0x393   : > { %v7655_v36 = vpop.f32.mrf.mxu0  ;;  %7942 = vmatmul.mubr.bf16.gmra.mxu0 %v9843_v15 }
 0x394   : > { %v3687_v61 = vadd.f32 %v7655_v36, %v10278_v56  ;;  %7945 = vmatprep.mubr.bf16.mxu0 %v9880_v54  ;;  %v7708_v26 = vpop.f32.mrf.mxu1  ;;  %v11625_v36 = vld [vmem:[#allocation38_spill] sm:$0xff] }
 0x395   : > { %v3570_v48 = vpop.f32.mrf.mxu0 }
 0x396   : > { %v3685_v52 = vadd.f32 %v3570_v48, %v10285_v43  ;;  %v10559_v9 = vpop.f32.mrf.mxu1  ;;  %v10561_v44 = vadd.f32 %v7703_v16, %v3687_v61  ;;  %v11622_v16 = vld [vmem:[#allocation58_spill] sm:$0xff] }
 0x397   : > { %v7656_v33 = vpop.f32.mrf.mxu0 }
 0x398   : > { %v3688_v13 = vadd.f32 %v7656_v33, %v10287_v45  ;;  %v7711_v53 = vpop.f32.mrf.mxu1  ;;  %v10564_v0 = vadd.f32 %v3828_v4, %v3685_v52  ;;  %v11626_v33 = vld [vmem:[#allocation39_spill] sm:$0xff] }
 0x399   : > { %v10566_v14 = vpop.f32.mrf.mxu0 }
 0x39a   : > { %v3860_v15 = vpop.f32.mrf.mxu1  ;;  %v10568_v56 = vadd.f32 %v7704_v34, %v3688_v13 }
 0x39b   : > { %v7659_v54 = vpop.f32.mrf.mxu0  ;;  %7946 = vmatmul.mubr.bf16.gmra.mxu0 %v9911_v28 }
 0x39c   : > { %v3691_v43 = vadd.f32 %v7659_v54, %v10325_v55  ;;  %7949 = vmatprep.mubr.bf16.mxu0 %v9950_v29  ;;  %v7712_v17 = vpop.f32.mrf.mxu1 }
 0x39d   : > { %v3586_v62 = vpop.f32.mrf.mxu0 }
 0x39e   : > { %v3689_v58 = vadd.f32 %v3586_v62, %v11621_v10  ;;  %v10574_v45 = vpop.f32.mrf.mxu1  ;;  %v10576_v46 = vadd.f32 %v7707_v22, %v3691_v43 }
 0x39f   : > { %v7660_v2 = vpop.f32.mrf.mxu0 }
 0x3a0   : > { %v3692_v4 = vadd.f32 %v7660_v2, %v11622_v16  ;;  %v7715_v19 = vpop.f32.mrf.mxu1  ;;  %v10579_v8 = vadd.f32 %v3844_v23, %v3689_v58  ;;  %v11627_v58 = vld [vmem:[#allocation45_spill] sm:$0xff]  ;;  %v11628_v16 = vld [vmem:[#allocation47_spill] sm:$0xff] }
 0x3a1   : > { %v10581_v34 = vpop.f32.mrf.mxu0 }
 0x3a2   : > { %v3876_v28 = vpop.f32.mrf.mxu1  ;;  %v10583_v55 = vadd.f32 %v7708_v26, %v3692_v4 }
 0x3a3   : > { %v7663_v29 = vpop.f32.mrf.mxu0  ;;  %7950 = vmatmul.mubr.bf16.gmra.mxu0 %v11623_v5 }
 0x3a4   : > { %v3695_v60 = vadd.f32 %v7663_v29, %v10374_v32  ;;  %7953 = vmatprep.mubr.bf16.mxu0 %v11624_v18  ;;  %v7716_v30 = vpop.f32.mrf.mxu1  ;;  %v3299_v18 = vadd.f32 %v10437_v51, %v10443_v25 }
 0x3a5   : > { %v3602_v22 = vpop.f32.mrf.mxu0 }
 0x3a6   : > { %v3693_v61 = vadd.f32 %v3602_v22, %v11625_v36  ;;  %v3879_v48 = vpop.f32.mrf.mxu1  ;;  %v10589_v52 = vadd.f32 %v7711_v53, %v3695_v60 }
 0x3a7   : > { %v7664_v23 = vpop.f32.mrf.mxu0 }
 0x3a8   : > { %v3696_v13 = vadd.f32 %v7664_v23, %v11626_v33  ;;  %v7719_v54 = vpop.f32.mrf.mxu1  ;;  %v10592_v26 = vadd.f32 %v3860_v15, %v3693_v61 }
 0x3a9   : > { %v10594_v43 = vpop.f32.mrf.mxu0 }
 0x3aa   : > { %v3892_v62 = vpop.f32.mrf.mxu1  ;;  %v10596_v10 = vadd.f32 %v7712_v17, %v3696_v13 }
 0x3ab   : > { %v7667_v32 = vpop.f32.mrf.mxu0  ;;  %7954 = vmatmul.mubr.bf16.gmra.mxu0 %v11627_v58 }
 0x3ac   : > { %v3699_v2 = vadd.f32 %v7667_v32, %v10410_v24  ;;  %7957 = vmatprep.mubr.bf16.mxu0 %v11628_v16  ;;  %v7720_v53 = vpop.f32.mrf.mxu1  ;;  %v11629_v32 = vld [vmem:[#allocation49_spill] sm:$0xff] }
 0x3ad   : > { %v3618_v4 = vpop.f32.mrf.mxu0 }
 0x3ae   : > { %v3697_v29 = vadd.f32 %v3618_v4, %v10413_v39  ;;  %v3895_v5 = vpop.f32.mrf.mxu1  ;;  %v10602_v60 = vadd.f32 %v7715_v19, %v3699_v2  ;;  %v11630_v19 = vld [vmem:[#allocation50_spill] sm:$0xff] }
 0x3af   : > { %v7668_v15 = vpop.f32.mrf.mxu0 }
 0x3b0   : > { %v3700_v17 = vadd.f32 %v7668_v15, %v10415_v21  ;;  %v7723_v22 = vpop.f32.mrf.mxu1  ;;  %v10607_v36 = vadd.f32 %v3876_v28, %v3697_v29 }
 0x3b1   : > { %v3621_v61 = vpop.f32.mrf.mxu0 }
 0x3b2   : > { %v3698_v24 = vadd.f32 %v3621_v61, %v3299_v18  ;;  %v3908_v23 = vpop.f32.mrf.mxu1  ;;  %v10609_v33 = vadd.f32 %v7716_v30, %v3700_v17  ;;  %v3315_v30 = vadd.f32 %v10486_v63, %v10491_v27 }
 0x3b3   : > { %v7671_v13 = vpop.f32.mrf.mxu0  ;;  %7958 = vmatmul.mubr.bf16.gmra.mxu0 %v11629_v32 }
 0x3b4   : > { %v3703_v39 = vadd.f32 %v7671_v13, %v10452_v41  ;;  %7961 = vmatprep.mubr.bf16.mxu0 %v11630_v19  ;;  %v7724_v58 = vpop.f32.mrf.mxu1  ;;  %v10614_v2 = vadd.f32 %v3879_v48, %v3698_v24  ;;  %v11631_v24 = vld [vmem:[#allocation52_spill] sm:$0xff] }
 0x3b5   : > { %v3634_v51 = vpop.f32.mrf.mxu0 }
 0x3b6   : > { %v3701_v21 = vadd.f32 %v3634_v51, %v10460_v6  ;;  %v3911_v25 = vpop.f32.mrf.mxu1  ;;  %v10617_v28 = vadd.f32 %v7719_v54, %v3703_v39  ;;  %v11632_v54 = vld [vmem:[#allocation42_spill] sm:$0xff] }
 0x3b7   : > { %v7672_v16 = vpop.f32.mrf.mxu0 }
 0x3b8   : > { %v3704_v4 = vadd.f32 %v7672_v16, %v10462_v59  ;;  %v7727_v29 = vpop.f32.mrf.mxu1  ;;  %v10622_v15 = vadd.f32 %v3892_v62, %v3701_v21  ;;  %v8164_v59 = vld [vmem:[%s11512_s9 + $0x38] sm:$0xff]  }
 0x3b9   : > { %v3637_v41 = vpop.f32.mrf.mxu0  ;;  %7969 = vmatprep.subr.bf16.mxu1 %v8164_v59 }
 0x3ba   : > { %v3702_v18 = vadd.f32 %v3637_v41, %v3315_v30  ;;  %v3924_v17 = vpop.f32.mrf.mxu1  ;;  %v10624_v48 = vadd.f32 %v7720_v53, %v3704_v4  ;;  %7970 = vmatpush3.bf16.msra.mxu1 %v8164_v59  ;;  %v11633_v41 = vld [vmem:[#allocation51_spill] sm:$0xff] }
 0x3bb   : > { %v7675_v61 = vpop.f32.mrf.mxu0  ;;  %7962 = vmatmul.mubr.bf16.gmra.mxu0 %v11631_v24 }
 0x3bc   : > { %v3707_v6 = vadd.f32 %v7675_v61, %v10495_v57  ;;  %7965 = vmatprep.mubr.bf16.mxu0 %v11632_v54  ;;  %v7728_v13 = vpop.f32.mrf.mxu1  ;;  %v10629_v32 = vadd.f32 %v3895_v5, %v3702_v18  ;;  %v3331_v57 = vadd.f32 %v10515_v50, %v10526_v12 }
 0x3bd   : > { %v3650_v63 = vpop.f32.mrf.mxu0 }
 0x3be   : > { %v3705_v27 = vadd.f32 %v3650_v63, %v10503_v1  ;;  %v3927_v62 = vpop.f32.mrf.mxu1  ;;  %v10635_v53 = vadd.f32 %v7723_v22, %v3707_v6  ;;  %v3347_v6 = vadd.f32 %v10524_v35, %v10538_v37  ;;  %v11634_v63 = vld [vmem:[#allocation54_spill] sm:$0xff] }
 0x3bf   : > { %v7676_v39 = vpop.f32.mrf.mxu0 }
 0x3c0   : > { %v3708_v19 = vadd.f32 %v7676_v39, %v10505_v11  ;;  %v7795_v5 = vpop.f32.mrf.mxu1  ;;  %v10640_v51 = vadd.f32 %v3908_v23, %v3705_v27  ;;  %v8165_v11 = vld [vmem:[%s11512_s9 + $0x30] sm:$0xff]   ;;  %v11635_v27 = vld [vmem:[#allocation53_spill] sm:$0xff] }
 0x3c1   : > { %v3653_v21 = vpop.f32.mrf.mxu0  ;;  %7971 = vmatprep.subr.bf16.mxu1 %v8165_v11  ;;  %v3235_v39 = vadd.f32 %v11635_v27, %v11634_v63 }
 0x3c2   : > { %v3706_v16 = vadd.f32 %v3653_v21, %v3331_v57  ;;  %v4347_v30 = vpop.f32.mrf.mxu1  ;;  %v10642_v4 = vadd.f32 %v7724_v58, %v3708_v19  ;;  %7972 = vmatpush3.bf16.msra.mxu1 %v8165_v11 }
 0x3c3   : > { %v7679_v1 = vpop.f32.mrf.mxu0  ;;  %7966 = vmatmul.mubr.bf16.gmra.mxu0 %v11633_v41  ;;  %v3682_v21 = vadd.f32 %v10551_v42, %v3235_v39 }
 0x3c4   : > { %v3711_v22 = vadd.f32 %v7679_v1, %v10529_v49  ;;  %v7796_v18 = vpop.f32.mrf.mxu1  ;;  %v10646_v61 = vadd.f32 %v3911_v25, %v3706_v16 }
 0x3c5   : > { %v3666_v50 = vpop.f32.mrf.mxu0 }
 0x3c6   : > { %v3709_v12 = vadd.f32 %v3666_v50, %v10532_v7  ;;  %v4350_v23 = vpop.f32.mrf.mxu1  ;;  %v10652_v24 = vadd.f32 %v7727_v29, %v3711_v22 }
 0x3c7   : > { %v7680_v58 = vpop.f32.mrf.mxu0 }
 0x3c8   : > { %v3712_v49 = vadd.f32 %v7680_v58, %v10536_v31  ;;  %v7799_v25 = vpop.f32.mrf.mxu1  ;;  %v10657_v54 = vadd.f32 %v3924_v17, %v3709_v12  ;;  %v11637_v58 = vld [vmem:[#allocation55_spill] sm:$0xff] }
 0x3c9   : > { %v3669_v59 = vpop.f32.mrf.mxu0 }
 0x3ca   : > { %v3710_v57 = vadd.f32 %v3669_v59, %v3347_v6  ;;  %v4363_v7 = vpop.f32.mrf.mxu1  ;;  %v10661_v19 = vadd.f32 %v7728_v13, %v3712_v49  ;;  %v3940_v13 = vadd.f32 %v10534_v40, %v3682_v21 }
 0x3cb   : > { %v7747_v29 = vpop.f32.mrf.mxu0 }
 0x3cc   : > { %v4212_v16 = vadd.f32 %v7747_v29, %v10546_v47  ;;  %v7800_v1 = vpop.f32.mrf.mxu1  ;;  %v10665_v35 = vadd.f32 %v3927_v62, %v3710_v57  ;;  %v11636_v47 = vld [vmem:[#allocation56_spill] sm:$0xff] }
 0x3cd   : > { %v4083_v31 = vpop.f32.mrf.mxu0  ;;  %v3251_v62 = vadd.f32 %v11637_v58, %v11636_v47 }
 0x3ce   : > { %v4210_v37 = vadd.f32 %v4083_v31, %v10549_v3  ;;  %v10668_v17 = vpop.f32.mrf.mxu1  ;;  %v10670_v41 = vadd.f32 %v7795_v5, %v4212_v16 }
 0x3cf   : > { %v7748_v22 = vpop.f32.mrf.mxu0  ;;  %v3686_v5 = vadd.f32 %v10566_v14, %v3251_v62 }
 0x3d0   : > { %v4213_v11 = vadd.f32 %v7748_v22, %v10553_v20  ;;  %v7803_v50 = vpop.f32.mrf.mxu1  ;;  %v10674_v12 = vadd.f32 %v4347_v30, %v4210_v37  ;;  %v11639_v37 = vld [vmem:[#allocation36_spill] sm:$0xff] }
 0x3d1   : > { %v4086_v42 = vpop.f32.mrf.mxu0 }
 0x3d2   : > { %v4211_v6 = vadd.f32 %v4086_v42, %v3940_v13  ;;  %v4379_v49 = vpop.f32.mrf.mxu1  ;;  %v10678_v59 = vadd.f32 %v7796_v18, %v4213_v11  ;;  %v3944_v18 = vadd.f32 %v10544_v38, %v3686_v5 }
 0x3d3   : > { %v7751_v3 = vpop.f32.mrf.mxu0 }
 0x3d4   : > { %v4216_v63 = vadd.f32 %v7751_v3, %v10561_v44  ;;  %v7804_v27 = vpop.f32.mrf.mxu1  ;;  %v10682_v20 = vadd.f32 %v4350_v23, %v4211_v6  ;;  %v11638_v44 = vld [vmem:[#allocation37_spill] sm:$0xff] }
 0x3d5   : > { %v4099_v40 = vpop.f32.mrf.mxu0  ;;  %v3267_v23 = vadd.f32 %v11639_v37, %v11638_v44 }
 0x3d6   : > { %v4214_v30 = vadd.f32 %v4099_v40, %v10564_v0  ;;  %v10685_v39 = vpop.f32.mrf.mxu1  ;;  %v10687_v57 = vadd.f32 %v7799_v25, %v4216_v63  ;;  %v11641_v40 = vld [vmem:[#allocation40_spill] sm:$0xff] }
 0x3d7   : > { %v7752_v29 = vpop.f32.mrf.mxu0  ;;  %v3690_v25 = vadd.f32 %v10581_v34, %v3267_v23  ;;  %v11640_v34 = vld [vmem:[#allocation44_spill] sm:$0xff] }
 0x3d8   : > { %v4217_v21 = vadd.f32 %v7752_v29, %v10568_v56  ;;  %v7807_v16 = vpop.f32.mrf.mxu1  ;;  %v10691_v31 = vadd.f32 %v4363_v7, %v4214_v30 }
 0x3d9   : > { %v4102_v14 = vpop.f32.mrf.mxu0  ;;  %v3948_v3 = vadd.f32 %v10559_v9, %v3690_v25  ;;  %v8166_v9 = vld [vmem:[%s11512_s9 + $0x28] sm:$0xff]  }
 0x3da   : > { %v10695_v22 = vadd.f32 %v4102_v14, %v3944_v18  ;;  %v4395_v11 = vpop.f32.mrf.mxu1  ;;  %v10697_v0 = vadd.f32 %v7800_v1, %v4217_v21  ;;  %7973 = vmatprep.subr.bf16.mxu1 %v8166_v9 }
 0x3db   : > { %v7755_v13 = vpop.f32.mrf.mxu0  ;;  %7974 = vmatpush3.bf16.msra.mxu1 %v8166_v9  ;;  %v8170_v9 = vld [vmem:[%s11512_s9 + $0x8] sm:$0xff]  }
 0x3dc   : > { %v4220_v42 = vadd.f32 %v7755_v13, %v10576_v46  ;;  %v7808_v56 = vpop.f32.mrf.mxu1  ;;  %v3283_v46 = vadd.f32 %v11641_v40, %v11640_v34 }
 0x3dd   : > { %v4115_v47 = vpop.f32.mrf.mxu0 }
 0x3de   : > { %v4218_v38 = vadd.f32 %v4115_v47, %v10579_v8  ;;  %v10702_v7 = vpop.f32.mrf.mxu1  ;;  %v10704_v58 = vadd.f32 %v7803_v50, %v4220_v42  ;;  %v3694_v50 = vadd.f32 %v10594_v43, %v3283_v46  ;;  %v8167_v42 = vld [vmem:[%s11512_s9 + $0x20] sm:$0xff]  }
 0x3df   : > { %v7756_v62 = vpop.f32.mrf.mxu0  ;;  %7975 = vmatprep.subr.bf16.mxu1 %v8167_v42 }
 0x3e0   : > { %v4221_v6 = vadd.f32 %v7756_v62, %v10583_v55  ;;  %v7811_v1 = vpop.f32.mrf.mxu1  ;;  %v10708_v5 = vadd.f32 %v4379_v49, %v4218_v38  ;;  %v3952_v43 = vadd.f32 %v10574_v45, %v3694_v50  ;;  %7976 = vmatpush3.bf16.msra.mxu1 %v8167_v42  ;;  %v8171_v42 = vld [vmem:[%s11512_s9] sm:$0xff]  }
 0x3e1   : > { %v4118_v63 = vpop.f32.mrf.mxu0 }
 0x3e2   : > { %v10712_v30 = vadd.f32 %v4118_v63, %v3948_v3  ;;  %v4411_v29 = vpop.f32.mrf.mxu1  ;;  %v10714_v8 = vadd.f32 %v7804_v27, %v4221_v6 }
 0x3e3   : > { %v7759_v21 = vpop.f32.mrf.mxu0 }
 0x3e4   : > { %v4224_v18 = vadd.f32 %v7759_v21, %v10589_v52  ;;  %v7812_v55 = vpop.f32.mrf.mxu1  ;;  %v8169_v21 = vld [vmem:[%s11512_s9 + $0x10] sm:$0xff]  }
 0x3e5   : > { %v4131_v14 = vpop.f32.mrf.mxu0 }
 0x3e6   : > { %v4222_v49 = vadd.f32 %v4131_v14, %v10592_v26  ;;  %v10722_v44 = vpop.f32.mrf.mxu1  ;;  %v10724_v37 = vadd.f32 %v7807_v16, %v4224_v18 }
 0x3e7   : > { %v7760_v23 = vpop.f32.mrf.mxu0 }
 0x3e8   : > { %v4225_v27 = vadd.f32 %v7760_v23, %v10596_v10  ;;  %v7815_v13 = vpop.f32.mrf.mxu1  ;;  %v10728_v52 = vadd.f32 %v4395_v11, %v4222_v49  ;;  %v8168_v11 = vld [vmem:[%s11512_s9 + $0x18] sm:$0xff]  }
 0x3e9   : > { %v4134_v25 = vpop.f32.mrf.mxu0  ;;  %7977 = vmatprep.subr.bf16.mxu1 %v8168_v11 }
 0x3ea   : > { %v10733_v26 = vadd.f32 %v4134_v25, %v3952_v43  ;;  %v4427_v47 = vpop.f32.mrf.mxu1  ;;  %v10735_v16 = vadd.f32 %v7808_v56, %v4225_v27  ;;  %7978 = vmatpush3.bf16.msra.mxu1 %v8168_v11 }
 0x3eb   : > { %v7763_v38 = vpop.f32.mrf.mxu0  ;;  %7979 = vmatprep.subr.bf16.mxu1 %v8169_v21 }
 0x3ec   : > { %v4228_v10 = vadd.f32 %v7763_v38, %v10602_v60  ;;  %v7816_v62 = vpop.f32.mrf.mxu1 }
 0x3ed   : > { %v4147_v45 = vpop.f32.mrf.mxu0 }
 0x3ee   : > { %v4226_v6 = vadd.f32 %v4147_v45, %v10607_v36  ;;  %v10742_v3 = vpop.f32.mrf.mxu1  ;;  %v10744_v63 = vadd.f32 %v7811_v1, %v4228_v10  ;;  %7980 = vmatpush3.bf16.msra.mxu1 %v8169_v21 }
 0x3ef   : > { %v7764_v34 = vpop.f32.mrf.mxu0  ;;  %7981 = vmatprep.subr.bf16.mxu1 %v8170_v9 }
 0x3f0   : > { %v4229_v56 = vadd.f32 %v7764_v34, %v10609_v33  ;;  %v7819_v40 = vpop.f32.mrf.mxu1  ;;  %v10747_v46 = vadd.f32 %v4411_v29, %v4226_v6 }
 0x3f1   : > { %v4150_v60 = vpop.f32.mrf.mxu0 }
 0x3f2   : > { %v10753_v50 = vadd.f32 %v4150_v60, %v10614_v2  ;;  %v4443_v36 = vpop.f32.mrf.mxu1  ;;  %v10755_v18 = vadd.f32 %v7812_v55, %v4229_v56  ;;  %7982 = vmatpush3.bf16.msra.mxu1 %v8170_v9 }
 0x3f3   : > { %v7767_v1 = vpop.f32.mrf.mxu0  ;;  %7983 = vmatprep.subr.bf16.mxu1 %v8171_v42 }
 0x3f4   : > { %v4232_v14 = vadd.f32 %v7767_v1, %v10617_v28  ;;  %v7820_v33 = vpop.f32.mrf.mxu1 }
 0x3f5   : > { %v4163_v29 = vpop.f32.mrf.mxu0 }
 0x3f6   : > { %v4230_v49 = vadd.f32 %v4163_v29, %v10622_v15  ;;  %v10762_v23 = vpop.f32.mrf.mxu1  ;;  %v10764_v2 = vadd.f32 %v7815_v13, %v4232_v14  ;;  %7984 = vmatpush3.bf16.msra.mxu1 %v8171_v42 }
 0x3f7   : > { %v7768_v27 = vpop.f32.mrf.mxu0 }
 0x3f8   : > { %v4233_v55 = vadd.f32 %v7768_v27, %v10624_v48  ;;  %v7823_v43 = vpop.f32.mrf.mxu1  ;;  %v10767_v25 = vadd.f32 %v4427_v47, %v4230_v49 }
 0x3f9   : > { %v4166_v28 = vpop.f32.mrf.mxu0 }
 0x3fa   : > { %v10773_v38 = vadd.f32 %v4166_v28, %v10629_v32  ;;  %v4459_v15 = vpop.f32.mrf.mxu1  ;;  %v10775_v10 = vadd.f32 %v7816_v62, %v4233_v55 }
 0x3fb   : > { %v7771_v13 = vpop.f32.mrf.mxu0 }
 0x3fc   : > { %v4236_v45 = vadd.f32 %v7771_v13, %v10635_v53  ;;  %v7824_v48 = vpop.f32.mrf.mxu1 }
 0x3fd   : > { %v4179_v47 = vpop.f32.mrf.mxu0 }
 0x3fe   : > { %v4234_v11 = vadd.f32 %v4179_v47, %v10640_v51  ;;  %v10779_v6 = vpop.f32.mrf.mxu1  ;;  %v10781_v34 = vadd.f32 %v7819_v40, %v4236_v45 }
 0x3ff   : > { %v7772_v56 = vpop.f32.mrf.mxu0 }
 0x400   : > { %v4237_v32 = vadd.f32 %v7772_v56, %v10642_v4  ;;  %v10784_v60 = vpop.f32.mrf.mxu1  ;;  %v10786_v62 = vadd.f32 %v4443_v36, %v4234_v11 }
 0x401   : > { %v4182_v21 = vpop.f32.mrf.mxu0 }
 0x402   : > { %v10789_v1 = vadd.f32 %v4182_v21, %v10646_v61  ;;  %v10791_v53 = vpop.f32.mrf.mxu1  ;;  %v10793_v14 = vadd.f32 %v7820_v33, %v4237_v32 }
 0x403   : > { %v7775_v51 = vpop.f32.mrf.mxu0 }
 0x404   : > { %v4240_v29 = vadd.f32 %v7775_v51, %v10652_v24  ;;  %v10796_v40 = vpop.f32.mrf.mxu1 }
 0x405   : > { %v4195_v9 = vpop.f32.mrf.mxu0 }
 0x406   : > { %v4238_v4 = vadd.f32 %v4195_v9, %v10657_v54  ;;  %v10799_v49 = vpop.f32.mrf.mxu1  ;;  %v10801_v36 = vadd.f32 %v7823_v43, %v4240_v29 }
 0x407   : > { %v7776_v27 = vpop.f32.mrf.mxu0 }
 0x408   : > { %v4241_v61 = vadd.f32 %v7776_v27, %v10661_v19  ;;  %v10804_v55 = vpop.f32.mrf.mxu1  ;;  %v10806_v28 = vadd.f32 %v4459_v15, %v4238_v4 }
 0x409   : > { %v4198_v33 = vpop.f32.mrf.mxu0 }
 0x40a   : > { %v10809_v42 = vadd.f32 %v4198_v33, %v10665_v35  ;;  %v10811_v24 = vpop.f32.mrf.mxu1  ;;  %v10813_v13 = vadd.f32 %v7824_v48, %v4241_v61 }
 0x40b   : > { %v7843_v54 = vpop.f32.mrf.mxu0 }
 0x40c   : > { %v10816_v45 = vadd.f32 %v7843_v54, %v10670_v41  ;;  %v10821_v19 = vpop.f32.mrf.mxu1 }
 0x40d   : > { %v4605_v43 = vpop.f32.mrf.mxu0 }
 0x40e   : > { %v10819_v47 = vadd.f32 %v4605_v43, %v10674_v12  ;;  %v10826_v56 = vpop.f32.mrf.mxu1 }
 0x40f   : > { %v7844_v15 = vpop.f32.mrf.mxu0 }
 0x410   : > { %v10824_v11 = vadd.f32 %v7844_v15, %v10678_v59  ;;  %v10834_v51 = vpop.f32.mrf.mxu1 }
 0x411   : > { %v4608_v35 = vpop.f32.mrf.mxu0 }
 0x412   : > { %v10829_v48 = vadd.f32 %v4608_v35, %v10682_v20  ;;  %v10844_v4 = vpop.f32.mrf.mxu1 }
 0x413   : > { %v7847_v32 = vpop.f32.mrf.mxu0 }
 0x414   : > { %v10832_v41 = vadd.f32 %v7847_v32, %v10687_v57  ;;  %v10849_v61 = vpop.f32.mrf.mxu1 }
 0x415   : > { %v4621_v21 = vpop.f32.mrf.mxu0 }
 0x416   : > { %v10837_v12 = vadd.f32 %v4621_v21, %v10691_v31  ;;  %v10859_v43 = vpop.f32.mrf.mxu1 }
 0x417   : > { %v7848_v29 = vpop.f32.mrf.mxu0 }
 0x418   : > { %v10840_v59 = vadd.f32 %v7848_v29, %v10697_v0  ;;  %v10864_v32 = vpop.f32.mrf.mxu1 }
 0x419   : > { %v10842_v9 = vpop.f32.mrf.mxu0  ;;  %11642 = vst [vmem:[#allocation46_spill] sm:$0xff] %v10864_v32 }
 0x41b   : > { %v7851_v20 = vpop.f32.mrf.mxu0 }
 0x41c   : > { %v10847_v27 = vadd.f32 %v7851_v20, %v10704_v58  ;;  %v10874_v20 = vpop.f32.mrf.mxu1 }
 0x41d   : > { %v4637_v57 = vpop.f32.mrf.mxu0  ;;  %11644 = vst [vmem:[#allocation23_spill] sm:$0xff] %v10874_v20 }
 0x41e   : > { %v10852_v33 = vadd.f32 %v4637_v57, %v10708_v5 }
 0x41f   : > { %v7852_v31 = vpop.f32.mrf.mxu0 }
 0x420   : > { %v10855_v54 = vadd.f32 %v7852_v31, %v10714_v8 }
 0x421   : > { %v10857_v0 = vpop.f32.mrf.mxu0 }
 0x423   : > { %v7855_v15 = vpop.f32.mrf.mxu0 }
 0x424   : > { %v10862_v35 = vadd.f32 %v7855_v15, %v10724_v37  ;;  %v10879_v15 = vpop.f32.mrf.mxu1 }
 0x425   : > { %v4653_v58 = vpop.f32.mrf.mxu0 }
 0x426   : > { %v10867_v21 = vadd.f32 %v4653_v58, %v10728_v52 }
 0x427   : > { %v7856_v5 = vpop.f32.mrf.mxu0 }
 0x428   : > { %v10870_v29 = vadd.f32 %v7856_v5, %v10735_v16  ;;  %v10889_v5 = vpop.f32.mrf.mxu1 }
 0x429   : > { %v10872_v8 = vpop.f32.mrf.mxu0 }
 0x42a   : > { %11643 = vst [vmem:[#allocation48_spill] sm:$0xff] %v10870_v29 }
 0x42b   : > { %v7859_v57 = vpop.f32.mrf.mxu0 }
 0x42c   : > { %v10877_v31 = vadd.f32 %v7859_v57, %v10744_v63  ;;  %v10894_v57 = vpop.f32.mrf.mxu1 }
 0x42d   : > { %v4669_v37 = vpop.f32.mrf.mxu0 }
 0x42e   : > { %11645 = vst [vmem:[#allocation57_spill] sm:$0xff] %v10877_v31  ;;  %v10882_v32 = vadd.f32 %v4669_v37, %v10747_v46 }
 0x42f   : > { %v7860_v52 = vpop.f32.mrf.mxu0 }
 0x430   : > { %11646 = vst [vmem:[#allocation58_spill] sm:$0xff] %v10882_v32  ;;  %v10885_v58 = vadd.f32 %v7860_v52, %v10755_v18  ;;  %v10904_v52 = vpop.f32.mrf.mxu1 }
 0x431   : > { %v10887_v16 = vpop.f32.mrf.mxu0 }
 0x432   : > { %11647 = vst [vmem:[#allocation41_spill] sm:$0xff] %v10885_v58 }
 0x433   : > { %v7863_v29 = vpop.f32.mrf.mxu0 }
 0x434   : > { %v10892_v20 = vadd.f32 %v7863_v29, %v10764_v2  ;;  %v10909_v29 = vpop.f32.mrf.mxu1 }
 0x435   : > { %v4685_v63 = vpop.f32.mrf.mxu0 }
 0x436   : > { %11648 = vst [vmem:[#allocation43_spill] sm:$0xff] %v10892_v20  ;;  %v10897_v31 = vadd.f32 %v4685_v63, %v10767_v25 }
 0x437   : > { %v7864_v46 = vpop.f32.mrf.mxu0 }
 0x438   : > { %11649 = vst [vmem:[#allocation38_spill] sm:$0xff] %v10897_v31  ;;  %v10900_v37 = vadd.f32 %v7864_v46, %v10775_v10  ;;  %v10919_v46 = vpop.f32.mrf.mxu1 }
 0x439   : > { %v10902_v18 = vpop.f32.mrf.mxu0 }
 0x43a   : > { %11650 = vst [vmem:[#allocation39_spill] sm:$0xff] %v10900_v37 }
 0x43b   : > { %v7867_v58 = vpop.f32.mrf.mxu0 }
 0x43c   : > { %v10907_v32 = vadd.f32 %v7867_v58, %v10781_v34  ;;  %v10924_v58 = vpop.f32.mrf.mxu1 }
 0x43d   : > { %v4701_v2 = vpop.f32.mrf.mxu0 }
 0x43e   : > { %11651 = vst [vmem:[#allocation45_spill] sm:$0xff] %v10907_v32  ;;  %v10912_v20 = vadd.f32 %v4701_v2, %v10786_v62 }
 0x43f   : > { %v7868_v25 = vpop.f32.mrf.mxu0 }
 0x440   : > { %11652 = vst [vmem:[#allocation47_spill] sm:$0xff] %v10912_v20  ;;  %v10915_v63 = vadd.f32 %v7868_v25, %v10793_v14  ;;  %v10934_v25 = vpop.f32.mrf.mxu1 }
 0x441   : > { %v10917_v10 = vpop.f32.mrf.mxu0 }
 0x442   : > { %11653 = vst [vmem:[#allocation49_spill] sm:$0xff] %v10915_v63  ;;  %v5005_v63 = vadd.f32 %v10784_v60, %v10816_v45  ;;  %v5006_v60 = vadd.f32 %v10796_v40, %v10824_v11 }
 0x443   : > { %v7871_v37 = vpop.f32.mrf.mxu0 }
 0x444   : > { %v10922_v31 = vadd.f32 %v7871_v37, %v10801_v36  ;;  %v10941_v36 = vld [vmem:[%s11511_s8] ss:$0 sm:$0xff] }
 0x445   : > { %v4717_v34 = vpop.f32.mrf.mxu0 }
 0x446   : > { %v10927_v32 = vadd.f32 %v4717_v34, %v10806_v28  ;;  %v5003_v28 = vadd.f32 %v10791_v53, %v10819_v47  ;;  %v5004_v53 = vadd.f32 %v10799_v49, %v10829_v48  ;;  %v4479_v47 = vadd.f32 %v10668_v17, %v10695_v22 }
 0x447   : > { %v7872_v62 = vpop.f32.mrf.mxu0  ;;  %v5007_v49 = vadd.f32 %v10811_v24, %v10837_v12  ;;  %v4483_v12 = vadd.f32 %v10685_v39, %v10712_v30  ;;  %v5013_v39 = vadd.f32 %v10834_v51, %v10847_v27 }
 0x448   : > { %11654 = vst [vmem:[#allocation50_spill] sm:$0xff] %v10927_v32  ;;  %v10930_v2 = vadd.f32 %v7872_v62, %v10813_v13  ;;  %v10945_v13 = vpop.f32.mrf.mxu1 }
 0x449   : > { %v10932_v14 = vpop.f32.mrf.mxu0 }
 0x44a   : > { %11655 = vst [vmem:[#allocation52_spill] sm:$0xff] %v10930_v2  ;;  %11656 = vst [vmem:[#allocation42_spill] sm:$0xff] %v10932_v14 }
 0x44b   : > { %v7939_v20 = vpop.f32.mrf.mxu0 }
 0x44c   : > { %v5269_v37 = vadd.f32 %v7939_v20, %v5005_v63 }
 0x44d   : > { %v5140_v34 = vpop.f32.mrf.mxu0 }
 0x44e   : > { %v10948_v62 = vadd.f32 %v10941_v36, %v5269_v37  ;;  %v5267_v2 = vadd.f32 %v5140_v34, %v5003_v28  ;;  %v5009_v37 = vadd.f32 %v10804_v55, %v10832_v41  ;;  %v10962_v28 = vpop.f32.mrf.mxu1  ;;  %v4737_v34 = vadd.f32 %v10842_v9, %v4479_v47 }
 0x44f   : > { %v7940_v45 = vpop.f32.mrf.mxu0  ;;  %v5010_v41 = vadd.f32 %v10821_v19, %v10840_v59 }
 0x450   : > { %v6901_v14 = vmul.f32 -1.442695, %v10948_v62  ;;  %v10954_v32 = vadd.f32 %v10941_v36, %v5267_v2  ;;  %v5270_v20 = vadd.f32 %v7940_v45, %v5006_v60 }
 0x451   : > { %v5143_v63 = vpop.f32.mrf.mxu0 }
 0x452   : > { %8580 = vpow2.f32 %v6901_v14  ;;  %v6899_v40 = vmul.f32 -1.442695, %v10954_v32  ;;  %v10966_v11 = vadd.f32 %v10941_v36, %v5270_v20  ;;  %v5268_v2 = vadd.f32 %v5143_v63, %v5004_v53  ;;  %v10977_v14 = vpop.f32.mrf.mxu1 }
 0x453   : > { %v7943_v60 = vpop.f32.mrf.mxu0  ;;  %v5008_v53 = vadd.f32 %v10826_v56, %v4737_v34  ;;  %v4741_v63 = vadd.f32 %v10857_v0, %v4483_v12 }
 0x454   : > { %8582 = vpow2.f32 %v6899_v40  ;;  %v6902_v17 = vmul.f32 -1.442695, %v10966_v11  ;;  %v10973_v22 = vadd.f32 %v10941_v36, %v5268_v2  ;;  %v5273_v55 = vadd.f32 %v7943_v60, %v5009_v37  ;;  %v10997_v30 = vpop.f32.mrf.mxu1 }
 0x455   : > { %v5156_v48 = vpop.f32.mrf.mxu0  ;;  %v4487_v37 = vadd.f32 %v10702_v7, %v10733_v26  ;;  %v4491_v40 = vadd.f32 %v10722_v44, %v10753_v50  ;;  %v4495_v7 = vadd.f32 %v10742_v3, %v10773_v38  ;;  %v11008_v44 = vadd.f32 %v10762_v23, %v10789_v1  ;;  %v11657_v1 = vld [vmem:[#allocation46_spill] sm:$0xff] }
 0x456   : > { %8584 = vpow2.f32 %v6902_v17  ;;  %v6900_v9 = vmul.f32 -1.442695, %v10973_v22  ;;  %v10981_v45 = vadd.f32 %v10941_v36, %v5273_v55  ;;  %v5271_v24 = vadd.f32 %v5156_v48, %v5007_v49 }
 0x457   : > { %v7944_v20 = vpop.f32.mrf.mxu0  ;;  %v4745_v0 = vadd.f32 %v10872_v8, %v4487_v37  ;;  %v5011_v50 = vadd.f32 %v10844_v4, %v10852_v33  ;;  %v11018_v8 = vadd.f32 %v10779_v6, %v10809_v42  ;;  %v5014_v23 = vadd.f32 %v10849_v61, %v10855_v54  ;;  %v11025_v33 = vpop.f32.mrf.mxu1  ;;  %v11658_v61 = vld [vmem:[#allocation23_spill] sm:$0xff] }
 0x458   : > { %8586 = vpow2.f32 %v6900_v9  ;;  %v6905_v47 = vmul.f32 -1.442695, %v10981_v45  ;;  %v10988_v19 = vadd.f32 %v10941_v36, %v5271_v24  ;;  %v5274_v59 = vadd.f32 %v7944_v20, %v5010_v41 }
 0x459   : > { %v5159_v2 = vpop.f32.mrf.mxu0  ;;  %v5012_v38 = vadd.f32 %v10859_v43, %v4741_v63  ;;  %v5017_v4 = vadd.f32 %v11657_v1, %v10862_v35  ;;  %v4749_v42 = vadd.f32 %v10887_v16, %v4491_v40  ;;  %v5015_v54 = vadd.f32 %v11658_v61, %v10867_v21  ;;  %v11659_v43 = vld [vmem:[#allocation48_spill] sm:$0xff]  ;;  %v11660_v16 = vld [vmem:[#allocation57_spill] sm:$0xff]  ;;  %v11661_v21 = vld [vmem:[#allocation58_spill] sm:$0xff]  ;;  %v11053_v40 = vpop.f32.mrf.mxu1 }
 0x45a   : > { %8588 = vpow2.f32 %v6905_v47  ;;  %v6903_v56 = vmul.f32 -1.442695, %v10988_v19  ;;  %v11001_v34 = vadd.f32 %v10941_v36, %v5274_v59  ;;  %v5272_v60 = vadd.f32 %v5159_v2, %v5008_v53  ;;  %v11664_v1 = vld [vmem:[#allocation38_spill] sm:$0xff]  ;;  %v11665_v61 = vld [vmem:[#allocation39_spill] sm:$0xff] }
 0x45b   : > { %v7947_v26 = vpop.f32.mrf.mxu0  ;;  %v5018_v9 = vadd.f32 %v10879_v15, %v11659_v43  ;;  %v5016_v35 = vadd.f32 %v10889_v5, %v4745_v0  ;;  %v11043_v63 = vadd.f32 %v10894_v57, %v11660_v16  ;;  %v11047_v37 = vadd.f32 %v10904_v52, %v11661_v21  ;;  %v11662_v15 = vld [vmem:[#allocation41_spill] sm:$0xff] }
 0x45c   : > { %8590 = vpow2.f32 %v6903_v56  ;;  %v6906_v51 = vmul.f32 -1.442695, %v11001_v34  ;;  %v11014_v27 = vadd.f32 %v10941_v36, %v5272_v60  ;;  %v5277_v49 = vadd.f32 %v7947_v26, %v5013_v39 }
 0x45d   : > { %v5172_v3 = vpop.f32.mrf.mxu0  ;;  %v11051_v5 = vadd.f32 %v10909_v29, %v11662_v15  ;;  %v4753_v0 = vadd.f32 %v10902_v18, %v4495_v7  ;;  %v11061_v26 = vadd.f32 %v10919_v46, %v4749_v42  ;;  %v7919_v29 = vpop.f32.mrf.mxu1  ;;  %v11663_v7 = vld [vmem:[#allocation43_spill] sm:$0xff]  ;;  %v11073_v46 = vadd.f32 %v10934_v25, %v11664_v1 }
 0x45e   : > { %8592 = vpow2.f32 %v6906_v51  ;;  %v6904_v17 = vmul.f32 -1.442695, %v11014_v27  ;;  %v11029_v55 = vadd.f32 %v10941_v36, %v5277_v49  ;;  %v5275_v48 = vadd.f32 %v5172_v3, %v5011_v50 }
 0x45f   : > { %v8581_v6 = vpop.eup %8580  ;;  %v7948_v41 = vpop.f32.mrf.mxu0  ;;  %v11081_v43 = vadd.f32 %v10945_v13, %v11665_v61  ;;  %v11666_v13 = vld [vmem:[#allocation45_spill] sm:$0xff] }
 0x460   : > { %v5436_v24 = vadd.f32 1.0, %v8581_v6  ;;  %8594 = vpow2.f32 %v6904_v17  ;;  %v6909_v12 = vmul.f32 -1.442695, %v11029_v55  ;;  %v11039_v20 = vadd.f32 %v10941_v36, %v5275_v48  ;;  %v4988_v25 = vpop.f32.mrf.mxu1 }
 0x461   : > { %v8583_v53 = vpop.eup %8582  ;;  %v5278_v47 = vadd.f32 %v7948_v41, %v5014_v23  ;;  %v5175_v59 = vpop.f32.mrf.mxu0  ;;  %v11094_v21 = vadd.f32 %v10977_v14, %v11666_v13  ;;  %v11672_v13 = vld [vmem:[#allocation5_spill] sm:$0xff] }
 0x462   : > { %8596 = vrcp.f32 %v5436_v24  ;;  %v5434_v2 = vadd.f32 1.0, %v8583_v53  ;;  %v6907_v39 = vmul.f32 -1.442695, %v11039_v20  ;;  %v5276_v56 = vadd.f32 %v5175_v59, %v5012_v38  ;;  %v7920_v14 = vpop.f32.mrf.mxu1 }
 0x463   : > { %v8585_v60 = vpop.eup %8584  ;;  %8598 = vpow2.f32 %v6909_v12  ;;  %v11058_v57 = vadd.f32 %v10941_v36, %v5278_v47  ;;  %v7951_v52 = vpop.f32.mrf.mxu0  ;;  %v11069_v38 = vadd.f32 %v10924_v58, %v11663_v7  ;;  %v11084_v58 = vadd.f32 %v10962_v28, %v4753_v0 }
 0x464   : > { %8600 = vrcp.f32 %v5434_v2  ;;  %v5437_v50 = vadd.f32 1.0, %v8585_v60  ;;  %v11064_v51 = vadd.f32 %v10941_v36, %v5276_v56  ;;  %v5281_v49 = vadd.f32 %v7951_v52, %v5017_v4  ;;  %v11668_v60 = vld [vmem:[#allocation49_spill] sm:$0xff] }
 0x465   : > { %v8587_v3 = vpop.eup %8586  ;;  %8602 = vpow2.f32 %v6907_v39  ;;  %v6910_v23 = vmul.f32 -1.442695, %v11058_v57  ;;  %v5188_v18 = vpop.f32.mrf.mxu0  ;;  %v4757_v59 = vadd.f32 %v10917_v10, %v11008_v44  ;;  %v11667_v44 = vld [vmem:[#allocation47_spill] sm:$0xff]  ;;  %v11106_v0 = vadd.f32 %v11025_v33, %v11668_v60 }
 0x466   : > { %8604 = vrcp.f32 %v5437_v50  ;;  %v5435_v17 = vadd.f32 1.0, %v8587_v3  ;;  %v6908_v48 = vmul.f32 -1.442695, %v11064_v51  ;;  %v11077_v6 = vadd.f32 %v10941_v36, %v5281_v49 }
 0x467   : > { %v8589_v4 = vpop.eup %8588  ;;  %8606 = vpow2.f32 %v6910_v23  ;;  %v5279_v42 = vadd.f32 %v5188_v18, %v5015_v54  ;;  %v7952_v41 = vpop.f32.mrf.mxu0  ;;  %v11102_v56 = vadd.f32 %v10997_v30, %v11667_v44  ;;  %v11113_v3 = vadd.f32 %v7919_v29, %v10922_v31  ;;  %v11670_v31 = vld [vmem:[#allocation42_spill] sm:$0xff] }
 0x468   : > { %8608 = vrcp.f32 %v5435_v17  ;;  %v5440_v24 = vadd.f32 1.0, %v8589_v4  ;;  %v6913_v12 = vmul.f32 -1.442695, %v11077_v6  ;;  %v5282_v53 = vadd.f32 %v7952_v41, %v5018_v9  ;;  %v4991_v41 = vpop.f32.mrf.mxu1 }
 0x469   : > { %v8591_v47 = vpop.eup %8590  ;;  %8610 = vpow2.f32 %v6908_v48  ;;  %v11090_v54 = vadd.f32 %v10941_v36, %v5279_v42  ;;  %v5191_v16 = vpop.f32.mrf.mxu0  ;;  %v11117_v18 = vadd.f32 %v11053_v40, %v4757_v59  ;;  %v11669_v48 = vld [vmem:[#allocation50_spill] sm:$0xff]  ;;  %v4761_v29 = vadd.f32 %v11670_v31, %v11018_v8 }
 0x46a   : > { %8612 = vrcp.f32 %v5440_v24  ;;  %v5438_v28 = vadd.f32 1.0, %v8591_v47  ;;  %v11097_v15 = vadd.f32 %v10941_v36, %v5282_v53  ;;  %v5280_v2 = vadd.f32 %v5191_v16, %v5016_v35 }
 0x46b   : > { %v8593_v9 = vpop.eup %8592  ;;  %8614 = vpow2.f32 %v6913_v12  ;;  %v6911_v39 = vmul.f32 -1.442695, %v11090_v54  ;;  %v7955_v10 = vpop.f32.mrf.mxu0  ;;  %v11122_v4 = vadd.f32 %v4988_v25, %v11669_v48  ;;  %v11671_v12 = vld [vmem:[#allocation52_spill] sm:$0xff] }
 0x46c   : > { %8616 = vrcp.f32 %v5438_v28  ;;  %v5441_v52 = vadd.f32 1.0, %v8593_v9  ;;  %v6914_v50 = vmul.f32 -1.442695, %v11097_v15  ;;  %v11110_v35 = vadd.f32 %v10941_v36, %v5280_v2 }
 0x46d   : > { %v8595_v49 = vpop.eup %8594  ;;  %8618 = vpow2.f32 %v6911_v39  ;;  %v5285_v30 = vadd.f32 %v7955_v10, %v11043_v63  ;;  %v5204_v23 = vpop.f32.mrf.mxu0  ;;  %v11135_v53 = vadd.f32 %v7920_v14, %v11671_v12  ;;  %v11146_v39 = vadd.f32 %v4991_v41, %v4761_v29 }
 0x46e   : > { %8620 = vrcp.f32 %v5441_v52  ;;  %v5439_v33 = vadd.f32 1.0, %v8595_v49  ;;  %v6912_v7 = vmul.f32 -1.442695, %v11110_v35  ;;  %v5283_v1 = vadd.f32 %v5204_v23, %v11047_v37 }
 0x46f   : > { %v8597_v17 = vpop.eup %8596  ;;  %8622 = vpow2.f32 %v6914_v50  ;;  %v11127_v63 = vadd.f32 %v10941_v36, %v5285_v30  ;;  %v7956_v42 = vpop.f32.mrf.mxu0 }
 0x470   : > { %v8599_v40 = vpop.eup %8598  ;;  %v5532_v61 = vmul.f32 %v8597_v17, %v10948_v62  ;;  %8624 = vrcp.f32 %v5439_v33  ;;  %v11131_v24 = vadd.f32 %v10941_v36, %v5283_v1  ;;  %v5286_v37 = vadd.f32 %v7956_v42, %v11051_v5  ;;  %v11674_v17 = vld [vmem:[#allocation6_spill] sm:$0xff] }
 0x471   : > { %v8601_v25 = vpop.eup %8600  ;;  %v5444_v8 = vadd.f32 1.0, %v8599_v40  ;;  %8626 = vpow2.f32 %v6912_v7  ;;  %v6917_v47 = vmul.f32 -1.442695, %v11127_v63  ;;  %v5207_v59 = vpop.f32.mrf.mxu0  ;;  %v11673_v7 = vld [vmem:[#allocation3_spill] sm:$0xff] }
 0x472   : > { %v8603_v16 = vpop.eup %8602  ;;  %v11139_v28 = vadd.f32 %v11672_v13, %v5532_v61  ;;  %v5530_v62 = vmul.f32 %v8601_v25, %v10954_v32  ;;  %v6915_v2 = vmul.f32 -1.442695, %v11131_v24  ;;  %v11144_v9 = vadd.f32 %v10941_v36, %v5286_v37  ;;  %v11675_v13 = vld [vmem:[#allocation9_spill] sm:$0xff] }
 0x473   : > { %v8605_v5 = vpop.eup %8604  ;;  %8628 = vrcp.f32 %v5444_v8  ;;  %v5442_v10 = vadd.f32 1.0, %v8603_v16  ;;  %v5284_v44 = vadd.f32 %v5207_v59, %v11061_v26  ;;  %v7959_v60 = vpop.f32.mrf.mxu0 }
 0x474   : > { %v8607_v14 = vpop.eup %8606  ;;  %v5533_v52 = vmul.f32 %v8605_v5, %v10966_v11  ;;  %8630 = vpow2.f32 %v6917_v47  ;;  %v6918_v50 = vmul.f32 -1.442695, %v11144_v9  ;;  %v5289_v32 = vadd.f32 %v7959_v60, %v11069_v38 }
 0x475   : > { %v8609_v49 = vpop.eup %8608  ;;  %8632 = vrcp.f32 %v5442_v10  ;;  %v5445_v30 = vadd.f32 1.0, %v8607_v14  ;;  %v11153_v23 = vadd.f32 %v10941_v36, %v5284_v44  ;;  %v5220_v33 = vpop.f32.mrf.mxu0  ;;  %v11156_v1 = vadd.f32 %v11673_v7, %v5530_v62 }
 0x476   : > { %v8611_v26 = vpop.eup %8610  ;;  %v11159_v48 = vadd.f32 %v11674_v17, %v5533_v52  ;;  %v5531_v11 = vmul.f32 %v8609_v49, %v10973_v22  ;;  %8634 = vpow2.f32 %v6915_v2  ;;  %v11163_v31 = vadd.f32 %v10941_v36, %v5289_v32  ;;  %v11676_v49 = vld [vmem:[#allocation4_spill] sm:$0xff] }
 0x477   : > { %v8613_v38 = vpop.eup %8612  ;;  %8636 = vrcp.f32 %v5445_v30  ;;  %v5443_v29 = vadd.f32 1.0, %v8611_v26  ;;  %v6916_v42 = vmul.f32 -1.442695, %v11153_v23  ;;  %v5287_v40 = vadd.f32 %v5220_v33, %v11073_v46  ;;  %v7960_v41 = vpop.f32.mrf.mxu0  ;;  %v11677_v26 = vld [vmem:[#allocation10_spill] sm:$0xff] }
 0x478   : > { %v8615_v61 = vpop.eup %8614  ;;  %v5756_v37 = vpack.c.bf16 %v11159_v48, %v11139_v28  ;;  %v5536_v25 = vmul.f32 %v8613_v38, %v10981_v45  ;;  %8638 = vpow2.f32 %v6918_v50  ;;  %v6921_v22 = vmul.f32 -1.442695, %v11163_v31 }
 0x479   : > { %v8617_v12 = vpop.eup %8616  ;;  %8640 = vrcp.f32 %v5443_v29  ;;  %v5448_v8 = vadd.f32 1.0, %v8615_v61  ;;  %v11172_v47 = vadd.f32 %v10941_v36, %v5287_v40  ;;  %v5290_v59 = vadd.f32 %v7960_v41, %v11081_v43  ;;  %v5223_v16 = vpop.f32.mrf.mxu0  ;;  %v11678_v61 = vld [vmem:[#allocation7_spill] sm:$0xff] }
 0x47a   : > { %v8619_v46 = vpop.eup %8618  ;;  %v11176_v62 = vadd.f32 %v11675_v13, %v5536_v25  ;;  %v5534_v28 = vmul.f32 %v8617_v12, %v10988_v19  ;;  %8642 = vpow2.f32 %v6916_v42  ;;  %v5288_v45 = vadd.f32 %v5223_v16, %v11084_v58 }
 0x47b   : > { %v8621_v2 = vpop.eup %8620  ;;  %8644 = vrcp.f32 %v5448_v8  ;;  %v5446_v5 = vadd.f32 1.0, %v8619_v46  ;;  %v6919_v10 = vmul.f32 -1.442695, %v11172_v47  ;;  %v11182_v44 = vadd.f32 %v10941_v36, %v5290_v59  ;;  %v7963_v60 = vpop.f32.mrf.mxu0  ;;  %v11679_v59 = vld [vmem:[#allocation8_spill] sm:$0xff] }
 0x47c   : > { %v8623_v43 = vpop.eup %8622  ;;  %v5537_v14 = vmul.f32 %v8621_v2, %v11001_v34  ;;  %8646 = vpow2.f32 %v6921_v22  ;;  %v11186_v52 = vadd.f32 %v10941_v36, %v5288_v45  ;;  %v5293_v19 = vadd.f32 %v7963_v60, %v11094_v21 }
 0x47d   : > { %v8625_v50 = vpop.eup %8624  ;;  %8648 = vrcp.f32 %v5446_v5  ;;  %v5449_v58 = vadd.f32 1.0, %v8623_v43  ;;  %v6922_v32 = vmul.f32 -1.442695, %v11182_v44  ;;  %v5724_v30 = vadd.f32 %v11676_v49, %v5531_v11  ;;  %v5236_v33 = vpop.f32.mrf.mxu0 }
 0x47e   : > { %v8627_v7 = vpop.eup %8626  ;;  %v11192_v17 = vadd.f32 %v11677_v26, %v5537_v14  ;;  %v5535_v34 = vmul.f32 %v8625_v50, %v11014_v27  ;;  %8650 = vpow2.f32 %v6919_v10  ;;  %v6920_v48 = vmul.f32 -1.442695, %v11186_v52  ;;  %v11681_v26 = vld [vmem:[#allocation14_spill] sm:$0xff] }
 0x47f   : > { %8652 = vrcp.f32 %v5449_v58  ;;  %v5447_v38 = vadd.f32 1.0, %v8627_v7  ;;  %v11197_v21 = vadd.f32 %v10941_v36, %v5293_v19  ;;  %v5755_v29 = vpack.c.bf16 %v5724_v30, %v11156_v1  ;;  %v7964_v42 = vpop.f32.mrf.mxu0 }
 0x480   : > { %v8629_v40 = vpop.eup %8628  ;;  %8654 = vpow2.f32 %v6922_v32  ;;  %v5291_v11 = vadd.f32 %v5236_v33, %v11102_v56  ;;  %v5294_v41 = vadd.f32 %v7964_v42, %v11106_v0  ;;  %v5727_v25 = vadd.f32 %v11678_v61, %v5534_v28  ;;  %v11680_v28 = vld [vmem:[#allocation13_spill] sm:$0xff] }
 0x481   : > { %v8631_v27 = vpop.eup %8630  ;;  %v5540_v22 = vmul.f32 %v8629_v40, %v11029_v55  ;;  %8656 = vrcp.f32 %v5447_v38  ;;  %v6925_v12 = vmul.f32 -1.442695, %v11197_v21  ;;  %7985 = vmatprep.mubr.bf16.mxu1 %v5755_v29  ;;  %v5239_v8 = vpop.f32.mrf.mxu0  ;;  %v5728_v16 = vadd.f32 %v11679_v59, %v5535_v34 }
 0x482   : > { %v8633_v1 = vpop.eup %8632  ;;  %v5452_v46 = vadd.f32 1.0, %v8631_v27  ;;  %8658 = vpow2.f32 %v6920_v48  ;;  %v11207_v13 = vadd.f32 %v10941_v36, %v5291_v11  ;;  %7986 = vmatmul.mubr.bf16.vlgmr.msra.gmra.mxu1 %v5756_v37  ;;  %v11210_v56 = vadd.f32 %v10941_v36, %v5294_v41  ;;  %v11682_v11 = vld [vmem:[#allocation11_spill] sm:$0xff] }
 0x483   : > { %v8635_v0 = vpop.eup %8634  ;;  %v11213_v55 = vadd.f32 %v11680_v28, %v5540_v22  ;;  %v5538_v45 = vmul.f32 %v8633_v1, %v11039_v20  ;;  %8660 = vpow2.f32 %v6925_v12  ;;  %v5292_v2 = vadd.f32 %v5239_v8, %v11117_v18  ;;  %v7967_v5 = vpop.f32.mrf.mxu0  ;;  %v11683_v8 = vld [vmem:[#allocation17_spill] sm:$0xff] }
 0x484   : > { %v8637_v10 = vpop.eup %8636  ;;  %8662 = vrcp.f32 %v5452_v46  ;;  %v5450_v60 = vadd.f32 1.0, %v8635_v0  ;;  %v6923_v43 = vmul.f32 -1.442695, %v11207_v13  ;;  %v6926_v37 = vmul.f32 -1.442695, %v11210_v56  ;;  %v11684_v0 = vld [vmem:[#allocation12_spill] sm:$0xff] }
 0x485   : > { %v8639_v14 = vpop.eup %8638  ;;  %v5541_v19 = vmul.f32 %v8637_v10, %v11058_v57  ;;  %v11221_v50 = vadd.f32 %v10941_v36, %v5292_v2  ;;  %v5297_v58 = vadd.f32 %v7967_v5, %v11113_v3  ;;  %v5757_v20 = vpack.c.bf16 %v5728_v16, %v5727_v25  ;;  %v5252_v32 = vpop.f32.mrf.mxu0 }
 0x486   : > { %v8641_v49 = vpop.eup %8640  ;;  %8664 = vrcp.f32 %v5450_v60  ;;  %v5453_v18 = vadd.f32 1.0, %v8639_v14  ;;  %v5295_v30 = vadd.f32 %v5252_v32, %v11122_v4  ;;  %v5758_v33 = vpack.c.bf16 %v11192_v17, %v11176_v62 }
 0x487   : > { %v8643_v7 = vpop.eup %8642  ;;  %v5734_v34 = vadd.f32 %v11681_v26, %v5541_v19  ;;  %v5539_v57 = vmul.f32 %v8641_v49, %v11064_v51  ;;  %8666 = vpow2.f32 %v6923_v43  ;;  %v6924_v48 = vmul.f32 -1.442695, %v11221_v50  ;;  %7989 = vmatprep.mubr.bf16.mxu1 %v5757_v20  ;;  %v7968_v3 = vpop.f32.mrf.mxu0  ;;  %v11685_v19 = vld [vmem:[#allocation18_spill] sm:$0xff]  ;;  %v11686_v20 = vld [vmem:[#allocation15_spill] sm:$0xff] }
 0x488   : > { %v8645_v38 = vpop.eup %8644  ;;  %8668 = vrcp.f32 %v5453_v18  ;;  %v5451_v29 = vadd.f32 1.0, %v8643_v7  ;;  %v11231_v42 = vadd.f32 %v10941_v36, %v5297_v58  ;;  %v11234_v4 = vadd.f32 %v10941_v36, %v5295_v30 }
 0x489   : > { %v8647_v62 = vpop.eup %8646  ;;  %v5544_v17 = vmul.f32 %v8645_v38, %v11077_v6  ;;  %8670 = vpow2.f32 %v6926_v37  ;;  %v5298_v51 = vadd.f32 %v7968_v3, %v11135_v53  ;;  %v5255_v40 = vpop.f32.mrf.mxu0  ;;  %v5731_v41 = vadd.f32 %v11682_v11, %v5538_v45 }
 0x48a   : > { %v8649_v61 = vpop.eup %8648  ;;  %8672 = vrcp.f32 %v5451_v29  ;;  %v5456_v25 = vadd.f32 1.0, %v8647_v62  ;;  %v6929_v27 = vmul.f32 -1.442695, %v11231_v42  ;;  %v6927_v22 = vmul.f32 -1.442695, %v11234_v4  ;;  %7990 = vmatmul.mubr.bf16.gmra.mxu1 %v5758_v33 }
 0x48b   : > { %v8651_v12 = vpop.eup %8650  ;;  %v5737_v59 = vadd.f32 %v11683_v8, %v5544_v17  ;;  %v5542_v16 = vmul.f32 %v8649_v61, %v11090_v54  ;;  %8674 = vpow2.f32 %v6924_v48  ;;  %v11244_v6 = vadd.f32 %v10941_v36, %v5298_v51  ;;  %v11688_v48 = vld [vmem:[#allocation21_spill] sm:$0xff] }
 0x48c   : > { %v8653_v53 = vpop.eup %8652  ;;  %8676 = vrcp.f32 %v5456_v25  ;;  %v5454_v1 = vadd.f32 1.0, %v8651_v12  ;;  %v5296_v46 = vadd.f32 %v5255_v40, %v11146_v39  ;;  %v5732_v28 = vadd.f32 %v11684_v0, %v5539_v57  ;;  %v11689_v40 = vld [vmem:[#allocation19_spill] sm:$0xff]  ;;  %v11690_v25 = vld [vmem:[#allocation22_spill] sm:$0xff] }
 0x48d   : > { %v8655_v45 = vpop.eup %8654  ;;  %v5545_v2 = vmul.f32 %v8653_v53, %v11097_v15  ;;  %8678 = vpow2.f32 %v6929_v27  ;;  %v6930_v5 = vmul.f32 -1.442695, %v11244_v6  ;;  %v5760_v10 = vpack.c.bf16 %v5734_v34, %v11213_v55 }
 0x48e   : > { %v8657_v54 = vpop.eup %8656  ;;  %8680 = vrcp.f32 %v5454_v1  ;;  %v5457_v60 = vadd.f32 1.0, %v8655_v45  ;;  %v11252_v43 = vadd.f32 %v10941_v36, %v5296_v46  ;;  %v5759_v37 = vpack.c.bf16 %v5732_v28, %v5731_v41  ;;  %v11687_v36 = vld [vmem:[#allocation16_spill] sm:$0xff]  ;;  %v11692_v28 = vld [vmem:[#allocation26_spill] sm:$0xff] }
 0x48f   : > { %v8659_v14 = vpop.eup %8658  ;;  %v5738_v39 = vadd.f32 %v11685_v19, %v5545_v2  ;;  %v5543_v58 = vmul.f32 %v8657_v54, %v11110_v35  ;;  %8682 = vpow2.f32 %v6927_v22  ;;  %v5735_v15 = vadd.f32 %v11686_v20, %v5542_v16  ;;  %v11691_v16 = vld [vmem:[#allocation20_spill] sm:$0xff] }
 0x490   : > { %v8661_v32 = vpop.eup %8660  ;;  %8684 = vrcp.f32 %v5457_v60  ;;  %v5455_v49 = vadd.f32 1.0, %v8659_v14  ;;  %v6928_v55 = vmul.f32 -1.442695, %v11252_v43  ;;  %7993 = vmatprep.mubr.bf16.mxu1 %v5759_v37 }
 0x491   : > { %v8663_v18 = vpop.eup %8662  ;;  %v5460_v30 = vadd.f32 1.0, %v8661_v32  ;;  %8686 = vpow2.f32 %v6930_v5  ;;  %v5736_v33 = vadd.f32 %v11687_v36, %v5543_v58  ;;  %v5762_v7 = vpack.c.bf16 %v5738_v39, %v5737_v59  ;;  %v11694_v58 = vld [vmem:[#allocation27_spill] sm:$0xff] }
 0x492   : > { %v5548_v26 = vmul.f32 %v8663_v18, %v11127_v63  ;;  %8688 = vrcp.f32 %v5455_v49  ;;  %7994 = vmatmul.mubr.bf16.gmra.mxu1 %v5760_v10 }
 0x493   : > { %v8665_v35 = vpop.eup %8664  ;;  %8690 = vrcp.f32 %v5460_v30  ;;  %v5761_v34 = vpack.c.bf16 %v5736_v33, %v5735_v15  ;;  %v11696_v30 = vld [vmem:[#allocation30_spill] sm:$0xff] }
 0x494   : > { %v8667_v57 = vpop.eup %8666  ;;  %v5741_v3 = vadd.f32 %v11688_v48, %v5548_v26  ;;  %v5546_v38 = vmul.f32 %v8665_v35, %v11131_v24  ;;  %8692 = vpow2.f32 %v6928_v55  ;;  %v11695_v55 = vld [vmem:[#allocation25_spill] sm:$0xff]  ;;  %v11698_v48 = vld [vmem:[#allocation31_spill] sm:$0xff] }
 0x495   : > { %v8669_v29 = vpop.eup %8668  ;;  %v5458_v62 = vadd.f32 1.0, %v8667_v57  ;;  %7997 = vmatprep.mubr.bf16.mxu1 %v5761_v34  ;;  %v11697_v34 = vld [vmem:[#allocation28_spill] sm:$0xff] }
 0x496   : > { %v8671_v17 = vpop.eup %8670  ;;  %v5549_v51 = vmul.f32 %v8669_v29, %v11144_v9  ;;  %v5739_v11 = vadd.f32 %v11689_v40, %v5546_v38 }
 0x497   : > { %v8673_v63 = vpop.eup %8672  ;;  %8694 = vrcp.f32 %v5458_v62  ;;  %v5461_v41 = vadd.f32 1.0, %v8671_v17  ;;  %v11699_v17 = vld [vmem:[#allocation29_spill] sm:$0xff] }
 0x498   : > { %v8675_v61 = vpop.eup %8674  ;;  %v5742_v27 = vadd.f32 %v11690_v25, %v5549_v51  ;;  %v5547_v22 = vmul.f32 %v8673_v63, %v11153_v23 }
 0x499   : > { %v8677_v12 = vpop.eup %8676  ;;  %8696 = vrcp.f32 %v5461_v41  ;;  %v5459_v24 = vadd.f32 1.0, %v8675_v61 }
 0x49a   : > { %v8679_v8 = vpop.eup %8678  ;;  %v5552_v59 = vmul.f32 %v8677_v12, %v11163_v31  ;;  %7998 = vmatmul.mubr.bf16.gmra.mxu1 %v5762_v7  ;;  %v5740_v53 = vadd.f32 %v11691_v16, %v5547_v22  ;;  %v5764_v9 = vpack.c.bf16 %v5742_v27, %v5741_v3  ;;  %v11693_v31 = vld [vmem:[#allocation24_spill] sm:$0xff]  ;;  %v11702_v12 = vld [vmem:[#allocation35_spill] sm:$0xff] }
 0x49b   : > { %v8681_v1 = vpop.eup %8680  ;;  %8698 = vrcp.f32 %v5459_v24  ;;  %v5464_v46 = vadd.f32 1.0, %v8679_v8  ;;  %v11701_v27 = vld [vmem:[#allocation32_spill] sm:$0xff] }
 0x49c   : > { %v8683_v0 = vpop.eup %8682  ;;  %v5745_v45 = vadd.f32 %v11692_v28, %v5552_v59  ;;  %v5550_v2 = vmul.f32 %v8681_v1, %v11172_v47  ;;  %v5763_v5 = vpack.c.bf16 %v5740_v53, %v5739_v11  ;;  %v11703_v59 = vld [vmem:[#allocation33_spill] sm:$0xff] }
 0x49d   : > { %v8685_v23 = vpop.eup %8684  ;;  %8700 = vrcp.f32 %v5464_v46  ;;  %v5462_v10 = vadd.f32 1.0, %v8683_v0 }
 0x49e   : > { %v8687_v54 = vpop.eup %8686  ;;  %v5553_v60 = vmul.f32 %v8685_v23, %v11182_v44  ;;  %8001 = vmatprep.mubr.bf16.mxu1 %v5763_v5  ;;  %v5743_v37 = vadd.f32 %v11693_v31, %v5550_v2 }
 0x49f   : > { %v8689_v14 = vpop.eup %8688  ;;  %8702 = vrcp.f32 %v5462_v10  ;;  %v5465_v19 = vadd.f32 1.0, %v8687_v54 }
 0x4a0   : > { %v8691_v39 = vpop.eup %8690  ;;  %v5746_v20 = vadd.f32 %v11694_v58, %v5553_v60  ;;  %v5551_v15 = vmul.f32 %v8689_v14, %v11186_v52 }
 0x4a1   : > { %v8693_v32 = vpop.eup %8692  ;;  %v5556_v47 = vmul.f32 %v8691_v39, %v11197_v21  ;;  %8704 = vrcp.f32 %v5465_v19 }
 0x4a2   : > { %v5463_v49 = vadd.f32 1.0, %v8693_v32  ;;  %8002 = vmatmul.mubr.bf16.gmra.mxu1 %v5764_v9  ;;  %v5744_v18 = vadd.f32 %v11695_v55, %v5551_v15  ;;  %v5766_v44 = vpack.c.bf16 %v5746_v20, %v5745_v45 }
 0x4a3   : > { %v5749_v36 = vadd.f32 %v11696_v30, %v5556_v47 }
 0x4a4   : > { %v8695_v33 = vpop.eup %8694  ;;  %8706 = vrcp.f32 %v5463_v49  ;;  %v5765_v7 = vpack.c.bf16 %v5744_v18, %v5743_v37 }
 0x4a5   : > { %v5554_v26 = vmul.f32 %v8695_v33, %v11207_v13  ;;  %v11700_v13 = vld [vmem:[#allocation34_spill] sm:$0xff] }
 0x4a6   : > { %v8697_v35 = vpop.eup %8696  ;;  %8005 = vmatprep.mubr.bf16.mxu1 %v5765_v7 }
 0x4a7   : > { %v5557_v52 = vmul.f32 %v8697_v35, %v11210_v56  ;;  %v5747_v57 = vadd.f32 %v11697_v34, %v5554_v26 }
 0x4a8   : > { %v8699_v21 = vpop.eup %8698 }
 0x4a9   : > { %v5750_v3 = vadd.f32 %v11698_v48, %v5557_v52  ;;  %v5555_v38 = vmul.f32 %v8699_v21, %v11221_v50 }
 0x4aa   : > { %v8701_v29 = vpop.eup %8700  ;;  %8006 = vmatmul.mubr.bf16.gmra.mxu1 %v5766_v44 }
 0x4ab   : > { %v5560_v62 = vmul.f32 %v8701_v29, %v11231_v42  ;;  %v5748_v51 = vadd.f32 %v11699_v17, %v5555_v38  ;;  %v5768_v40 = vpack.c.bf16 %v5750_v3, %v5749_v36 }
 0x4ac   : > { %v8703_v11 = vpop.eup %8702 }
 0x4ad   : > { %v5753_v63 = vadd.f32 %v11700_v13, %v5560_v62  ;;  %v5558_v41 = vmul.f32 %v8703_v11, %v11234_v4  ;;  %v5767_v56 = vpack.c.bf16 %v5748_v51, %v5747_v57  ;;  %v11294_v4 = vld [vmem:[%s11513_s10] ss:$0 sm:$0xff] }
 0x4ae   : > { %v8705_v61 = vpop.eup %8704 }
 0x4af   : > { %v5561_v25 = vmul.f32 %v8705_v61, %v11244_v6  ;;  %8009 = vmatprep.mubr.bf16.mxu1 %v5767_v56  ;;  %v5751_v22 = vadd.f32 %v11701_v27, %v5558_v41 }
 0x4b1   : > { %v8707_v50 = vpop.eup %8706  ;;  %v5754_v24 = vadd.f32 %v11702_v12, %v5561_v25 }
 0x4b2   : > { %v5559_v42 = vmul.f32 %v8707_v50, %v11252_v43  ;;  %8010 = vmatmul.mubr.bf16.gmra.mxu1 %v5768_v40 }
 0x4b3   : > { %v5770_v8 = vpack.c.bf16 %v5754_v24, %v5753_v63 }
 0x4b4   : > { %v5752_v16 = vadd.f32 %v11703_v59, %v5559_v42 }
 0x4b6   : > { %v5769_v53 = vpack.c.bf16 %v5752_v16, %v5751_v22 }
 0x4b8   : > { %8013 = vmatprep.mubr.bf16.mxu1 %v5769_v53 }
 0x4ba   : > { %8014 = vmatmul.mubr.bf16.gmra.mxu1 %v5770_v8 }
 0x542   : > { %v7987_v6 = vpop.f32.mrf.mxu1 }
 0x543   : > { %v11297_v9 = vadd.f32 %v7987_v6, %v11294_v4 }
 0x544   : > { %v5876_v1 = vpop.f32.mrf.mxu1 }
 0x545   : > { %v6942_v46 = vmul.f32 -1.442695, %v11297_v9  ;;  %v11301_v43 = vadd.f32 %v11294_v4, %v5876_v1 }
 0x546   : > { %v7988_v0 = vpop.f32.mrf.mxu1 }
 0x547   : > { %8708 = vpow2.f32 %v6942_v46  ;;  %v6940_v28 = vmul.f32 -1.442695, %v11301_v43  ;;  %v11305_v45 = vadd.f32 %v7988_v0, %v11294_v4 }
 0x548   : > { %v5879_v2 = vpop.f32.mrf.mxu1 }
 0x549   : > { %8710 = vpow2.f32 %v6940_v28  ;;  %v6943_v5 = vmul.f32 -1.442695, %v11305_v45  ;;  %v11309_v23 = vadd.f32 %v11294_v4, %v5879_v2 }
 0x54a   : > { %v7991_v10 = vpop.f32.mrf.mxu1 }
 0x54b   : > { %8712 = vpow2.f32 %v6943_v5  ;;  %v6941_v54 = vmul.f32 -1.442695, %v11309_v23  ;;  %v11313_v60 = vadd.f32 %v7991_v10, %v11294_v4 }
 0x54c   : > { %v5892_v31 = vpop.f32.mrf.mxu1 }
 0x54d   : > { %8714 = vpow2.f32 %v6941_v54  ;;  %v6946_v37 = vmul.f32 -1.442695, %v11313_v60  ;;  %v11317_v14 = vadd.f32 %v11294_v4, %v5892_v31 }
 0x54e   : > { %v7992_v19 = vpop.f32.mrf.mxu1 }
 0x54f   : > { %8716 = vpow2.f32 %v6946_v37  ;;  %v6944_v39 = vmul.f32 -1.442695, %v11317_v14  ;;  %v11321_v58 = vadd.f32 %v7992_v19, %v11294_v4 }
 0x550   : > { %v5895_v20 = vpop.f32.mrf.mxu1 }
 0x551   : > { %8718 = vpow2.f32 %v6944_v39  ;;  %v6947_v15 = vmul.f32 -1.442695, %v11321_v58  ;;  %v11325_v32 = vadd.f32 %v11294_v4, %v5895_v20 }
 0x552   : > { %v7995_v47 = vpop.f32.mrf.mxu1 }
 0x553   : > { %8720 = vpow2.f32 %v6947_v15  ;;  %v6945_v49 = vmul.f32 -1.442695, %v11325_v32  ;;  %v11329_v55 = vadd.f32 %v7995_v47, %v11294_v4 }
 0x554   : > { %v8709_v18 = vpop.eup %8708  ;;  %v5908_v44 = vpop.f32.mrf.mxu1 }
 0x555   : > { %v6101_v30 = vadd.f32 1.0, %v8709_v18  ;;  %8722 = vpow2.f32 %v6945_v49  ;;  %v6950_v36 = vmul.f32 -1.442695, %v11329_v55  ;;  %v11333_v33 = vadd.f32 %v11294_v4, %v5908_v44 }
 0x556   : > { %v8711_v7 = vpop.eup %8710  ;;  %v7996_v26 = vpop.f32.mrf.mxu1 }
 0x557   : > { %8724 = vrcp.f32 %v6101_v30  ;;  %v6099_v35 = vadd.f32 1.0, %v8711_v7  ;;  %v6948_v52 = vmul.f32 -1.442695, %v11333_v33  ;;  %v11337_v34 = vadd.f32 %v7996_v26, %v11294_v4 }
 0x558   : > { %v8713_v57 = vpop.eup %8712  ;;  %8726 = vpow2.f32 %v6950_v36  ;;  %v5911_v21 = vpop.f32.mrf.mxu1 }
 0x559   : > { %8728 = vrcp.f32 %v6099_v35  ;;  %v6102_v48 = vadd.f32 1.0, %v8713_v57  ;;  %v6951_v3 = vmul.f32 -1.442695, %v11337_v34  ;;  %v11341_v38 = vadd.f32 %v11294_v4, %v5911_v21 }
 0x55a   : > { %v8715_v29 = vpop.eup %8714  ;;  %8730 = vpow2.f32 %v6948_v52  ;;  %v7999_v62 = vpop.f32.mrf.mxu1 }
 0x55b   : > { %8732 = vrcp.f32 %v6102_v48  ;;  %v6100_v17 = vadd.f32 1.0, %v8715_v29  ;;  %v6949_v51 = vmul.f32 -1.442695, %v11341_v38  ;;  %v11345_v40 = vadd.f32 %v7999_v62, %v11294_v4 }
 0x55c   : > { %v8717_v11 = vpop.eup %8716  ;;  %8734 = vpow2.f32 %v6951_v3  ;;  %v5924_v13 = vpop.f32.mrf.mxu1 }
 0x55d   : > { %8736 = vrcp.f32 %v6100_v17  ;;  %v6105_v63 = vadd.f32 1.0, %v8717_v11  ;;  %v6954_v41 = vmul.f32 -1.442695, %v11345_v40  ;;  %v11349_v56 = vadd.f32 %v11294_v4, %v5924_v13 }
 0x55e   : > { %v8719_v61 = vpop.eup %8718  ;;  %8738 = vpow2.f32 %v6949_v51  ;;  %v8000_v25 = vpop.f32.mrf.mxu1 }
 0x55f   : > { %8740 = vrcp.f32 %v6105_v63  ;;  %v6103_v27 = vadd.f32 1.0, %v8719_v61  ;;  %v6952_v22 = vmul.f32 -1.442695, %v11349_v56  ;;  %v11353_v50 = vadd.f32 %v8000_v25, %v11294_v4 }
 0x560   : > { %v8721_v12 = vpop.eup %8720  ;;  %8742 = vpow2.f32 %v6954_v41  ;;  %v5927_v24 = vpop.f32.mrf.mxu1 }
 0x561   : > { %8744 = vrcp.f32 %v6103_v27  ;;  %v6106_v42 = vadd.f32 1.0, %v8721_v12  ;;  %v6955_v8 = vmul.f32 -1.442695, %v11353_v50  ;;  %v11358_v59 = vadd.f32 %v11294_v4, %v5927_v24 }
 0x562   : > { %v8723_v16 = vpop.eup %8722  ;;  %8746 = vpow2.f32 %v6952_v22  ;;  %v8003_v53 = vpop.f32.mrf.mxu1 }
 0x563   : > { %8748 = vrcp.f32 %v6106_v42  ;;  %v6104_v6 = vadd.f32 1.0, %v8723_v16  ;;  %v6953_v1 = vmul.f32 -1.442695, %v11358_v59  ;;  %v11362_v46 = vadd.f32 %v8003_v53, %v11294_v4 }
 0x564   : > { %v8725_v0 = vpop.eup %8724  ;;  %8750 = vpow2.f32 %v6955_v8  ;;  %v5940_v28 = vpop.f32.mrf.mxu1 }
 0x565   : > { %v8727_v2 = vpop.eup %8726  ;;  %v6197_v5 = vmul.f32 %v8725_v0, %v11297_v9  ;;  %8752 = vrcp.f32 %v6104_v6  ;;  %v6958_v10 = vmul.f32 -1.442695, %v11362_v46  ;;  %v11372_v54 = vadd.f32 %v11294_v4, %v5940_v28 }
 0x566   : > { %v8729_v31 = vpop.eup %8728  ;;  %v6109_v37 = vadd.f32 1.0, %v8727_v2  ;;  %8754 = vpow2.f32 %v6953_v1  ;;  %v8004_v19 = vpop.f32.mrf.mxu1 }
 0x567   : > { %v8731_v39 = vpop.eup %8730  ;;  %6229 = vst [vmem:[%s11367_s12 + $0x10] sm:$0xff] %v6197_v5  ;;  %v6195_v20 = vmul.f32 %v8729_v31, %v11301_v43  ;;  %8756 = vpow2.f32 %v6958_v10  ;;  %v6956_v15 = vmul.f32 -1.442695, %v11372_v54  ;;  %v11378_v9 = vadd.f32 %v8004_v19, %v11294_v4 }
 0x568   : > { %v8733_v47 = vpop.eup %8732  ;;  %8758 = vrcp.f32 %v6109_v37  ;;  %v6107_v49 = vadd.f32 1.0, %v8731_v39  ;;  %v5943_v18 = vpop.f32.mrf.mxu1 }
 0x569   : > { %v8735_v44 = vpop.eup %8734  ;;  %6227 = vst [vmem:[%s11367_s12] sm:$0xff] %v6195_v20  ;;  %v6198_v30 = vmul.f32 %v8733_v47, %v11305_v45  ;;  %8760 = vpow2.f32 %v6956_v15  ;;  %v6959_v36 = vmul.f32 -1.442695, %v11378_v9  ;;  %v11384_v43 = vadd.f32 %v11294_v4, %v5943_v18 }
 0x56a   : > { %v8737_v7 = vpop.eup %8736  ;;  %8762 = vrcp.f32 %v6107_v49  ;;  %v6110_v26 = vadd.f32 1.0, %v8735_v44  ;;  %v8007_v35 = vpop.f32.mrf.mxu1 }
 0x56b   : > { %v8739_v52 = vpop.eup %8738  ;;  %6230 = vst [vmem:[%s11367_s12 + $0x18] sm:$0xff] %v6198_v30  ;;  %v6196_v57 = vmul.f32 %v8737_v7, %v11309_v23  ;;  %8764 = vpow2.f32 %v6959_v36  ;;  %v6957_v21 = vmul.f32 -1.442695, %v11384_v43  ;;  %v11390_v45 = vadd.f32 %v8007_v35, %v11294_v4 }
 0x56c   : > { %v8741_v48 = vpop.eup %8740  ;;  %8766 = vrcp.f32 %v6110_v26  ;;  %v6108_v3 = vadd.f32 1.0, %v8739_v52  ;;  %v5956_v29 = vpop.f32.mrf.mxu1 }
 0x56d   : > { %v8743_v62 = vpop.eup %8742  ;;  %6228 = vst [vmem:[%s11367_s12 + $0x8] sm:$0xff] %v6196_v57  ;;  %v6201_v17 = vmul.f32 %v8741_v48, %v11313_v60  ;;  %8768 = vpow2.f32 %v6957_v21  ;;  %v6962_v51 = vmul.f32 -1.442695, %v11390_v45  ;;  %v11396_v23 = vadd.f32 %v11294_v4, %v5956_v29 }
 0x56e   : > { %v8745_v11 = vpop.eup %8744  ;;  %8770 = vrcp.f32 %v6108_v3  ;;  %v6113_v13 = vadd.f32 1.0, %v8743_v62  ;;  %v8008_v63 = vpop.f32.mrf.mxu1 }
 0x56f   : > { %v8747_v41 = vpop.eup %8746  ;;  %6233 = vst [vmem:[%s11367_s12 + $0x30] sm:$0xff] %v6201_v17  ;;  %v6199_v61 = vmul.f32 %v8745_v11, %v11317_v14  ;;  %8772 = vpow2.f32 %v6962_v51  ;;  %v6960_v25 = vmul.f32 -1.442695, %v11396_v23  ;;  %v11402_v60 = vadd.f32 %v8008_v63, %v11294_v4 }
 0x570   : > { %v8749_v27 = vpop.eup %8748  ;;  %8774 = vrcp.f32 %v6113_v13  ;;  %v6111_v22 = vadd.f32 1.0, %v8747_v41  ;;  %v5959_v12 = vpop.f32.mrf.mxu1 }
 0x571   : > { %v8751_v24 = vpop.eup %8750  ;;  %6231 = vst [vmem:[%s11367_s12 + $0x20] sm:$0xff] %v6199_v61  ;;  %v6202_v42 = vmul.f32 %v8749_v27, %v11321_v58  ;;  %8776 = vpow2.f32 %v6960_v25  ;;  %v6963_v8 = vmul.f32 -1.442695, %v11402_v60  ;;  %v11408_v14 = vadd.f32 %v11294_v4, %v5959_v12 }
 0x572   : > { %v8753_v16 = vpop.eup %8752  ;;  %8778 = vrcp.f32 %v6111_v22  ;;  %v6114_v53 = vadd.f32 1.0, %v8751_v24  ;;  %v8011_v6 = vpop.f32.mrf.mxu1 }
 0x573   : > { %v8755_v1 = vpop.eup %8754  ;;  %6234 = vst [vmem:[%s11367_s12 + $0x38] sm:$0xff] %v6202_v42  ;;  %v6200_v0 = vmul.f32 %v8753_v16, %v11325_v32  ;;  %8780 = vpow2.f32 %v6963_v8  ;;  %v6961_v28 = vmul.f32 -1.442695, %v11408_v14  ;;  %v11414_v58 = vadd.f32 %v8011_v6, %v11294_v4 }
 0x574   : > { %v8757_v2 = vpop.eup %8756  ;;  %8782 = vrcp.f32 %v6114_v53  ;;  %v6112_v5 = vadd.f32 1.0, %v8755_v1  ;;  %v5972_v10 = vpop.f32.mrf.mxu1 }
 0x575   : > { %v8759_v31 = vpop.eup %8758  ;;  %6232 = vst [vmem:[%s11367_s12 + $0x28] sm:$0xff] %v6200_v0  ;;  %v6117_v37 = vadd.f32 1.0, %v8757_v2  ;;  %8784 = vpow2.f32 %v6961_v28  ;;  %v6966_v19 = vmul.f32 -1.442695, %v11414_v58  ;;  %v11419_v39 = vadd.f32 %v11294_v4, %v5972_v10 }
 0x576   : > { %v8761_v32 = vpop.eup %8760  ;;  %v6205_v20 = vmul.f32 %v8759_v31, %v11329_v55  ;;  %8786 = vrcp.f32 %v6112_v5  ;;  %v8012_v15 = vpop.f32.mrf.mxu1 }
 0x577   : > { %v8763_v47 = vpop.eup %8762  ;;  %8788 = vrcp.f32 %v6117_v37  ;;  %v6115_v49 = vadd.f32 1.0, %v8761_v32  ;;  %v6964_v18 = vmul.f32 -1.442695, %v11419_v39  ;;  %v11424_v44 = vadd.f32 %v8012_v15, %v11294_v4 }
 0x578   : > { %v8765_v30 = vpop.eup %8764  ;;  %6237 = vst [vmem:[%s11367_s12 + $0x50] sm:$0xff] %v6205_v20  ;;  %v6203_v36 = vmul.f32 %v8763_v47, %v11333_v33  ;;  %8790 = vpow2.f32 %v6966_v19  ;;  %v5975_v7 = vpop.f32.mrf.mxu1 }
 0x579   : > { %v8767_v26 = vpop.eup %8766  ;;  %8792 = vrcp.f32 %v6115_v49  ;;  %v6118_v55 = vadd.f32 1.0, %v8765_v30  ;;  %v6967_v35 = vmul.f32 -1.442695, %v11424_v44  ;;  %v11430_v52 = vadd.f32 %v11294_v4, %v5975_v7 }
 0x57a   : > { %v8769_v57 = vpop.eup %8768  ;;  %6235 = vst [vmem:[%s11367_s12 + $0x40] sm:$0xff] %v6203_v36  ;;  %v6206_v21 = vmul.f32 %v8767_v26, %v11337_v34  ;;  %8794 = vpow2.f32 %v6964_v18  ;;  %v8015_v48 = vpop.f32.mrf.mxu1 }
 0x57b   : > { %v8771_v3 = vpop.eup %8770  ;;  %8796 = vrcp.f32 %v6118_v55  ;;  %v6116_v33 = vadd.f32 1.0, %v8769_v57  ;;  %v6965_v29 = vmul.f32 -1.442695, %v11430_v52  ;;  %v11436_v62 = vadd.f32 %v8015_v48, %v11294_v4 }
 0x57c   : > { %v8773_v17 = vpop.eup %8772  ;;  %6238 = vst [vmem:[%s11367_s12 + $0x58] sm:$0xff] %v6206_v21  ;;  %v6204_v51 = vmul.f32 %v8771_v3, %v11341_v38  ;;  %8798 = vpow2.f32 %v6967_v35  ;;  %v5988_v11 = vpop.f32.mrf.mxu1 }
 0x57d   : > { %v8775_v13 = vpop.eup %8774  ;;  %8800 = vrcp.f32 %v6116_v33  ;;  %v6121_v34 = vadd.f32 1.0, %v8773_v17  ;;  %v6970_v63 = vmul.f32 -1.442695, %v11436_v62  ;;  %v11442_v41 = vadd.f32 %v11294_v4, %v5988_v11 }
 0x57e   : > { %v8777_v61 = vpop.eup %8776  ;;  %6236 = vst [vmem:[%s11367_s12 + $0x48] sm:$0xff] %v6204_v51  ;;  %v6209_v25 = vmul.f32 %v8775_v13, %v11345_v40  ;;  %8802 = vpow2.f32 %v6965_v29  ;;  %v8016_v27 = vpop.f32.mrf.mxu1 }
 0x57f   : > { %v8779_v22 = vpop.eup %8778  ;;  %8804 = vrcp.f32 %v6121_v34  ;;  %v6119_v38 = vadd.f32 1.0, %v8777_v61  ;;  %v6968_v12 = vmul.f32 -1.442695, %v11442_v41  ;;  %v11448_v24 = vadd.f32 %v8016_v27, %v11294_v4 }
 0x580   : > { %v8781_v42 = vpop.eup %8780  ;;  %6241 = vst [vmem:[%s11367_s12 + $0x70] sm:$0xff] %v6209_v25  ;;  %v6207_v8 = vmul.f32 %v8779_v22, %v11349_v56  ;;  %8806 = vpow2.f32 %v6970_v63  ;;  %v5991_v16 = vpop.f32.mrf.mxu1 }
 0x581   : > { %v8783_v53 = vpop.eup %8782  ;;  %8808 = vrcp.f32 %v6119_v38  ;;  %v6122_v40 = vadd.f32 1.0, %v8781_v42  ;;  %v6971_v6 = vmul.f32 -1.442695, %v11448_v24  ;;  %v11454_v1 = vadd.f32 %v11294_v4, %v5991_v16 }
 0x582   : > { %v8785_v0 = vpop.eup %8784  ;;  %6239 = vst [vmem:[%s11367_s12 + $0x60] sm:$0xff] %v6207_v8  ;;  %v6210_v28 = vmul.f32 %v8783_v53, %v11353_v50  ;;  %8810 = vpow2.f32 %v6968_v12 }
 0x583   : > { %v8787_v2 = vpop.eup %8786  ;;  %8812 = vrcp.f32 %v6122_v40  ;;  %v6120_v56 = vadd.f32 1.0, %v8785_v0  ;;  %v6969_v5 = vmul.f32 -1.442695, %v11454_v1 }
 0x584   : > { %v8789_v10 = vpop.eup %8788  ;;  %6242 = vst [vmem:[%s11367_s12 + $0x78] sm:$0xff] %v6210_v28  ;;  %v6208_v31 = vmul.f32 %v8787_v2, %v11358_v59  ;;  %8814 = vpow2.f32 %v6971_v6 }
 0x585   : > { %v8791_v4 = vpop.eup %8790  ;;  %v6213_v37 = vmul.f32 %v8789_v10, %v11362_v46  ;;  %8816 = vrcp.f32 %v6120_v56 }
 0x586   : > { %v8793_v19 = vpop.eup %8792  ;;  %6240 = vst [vmem:[%s11367_s12 + $0x68] sm:$0xff] %v6208_v31  ;;  %v6125_v50 = vadd.f32 1.0, %v8791_v4  ;;  %8818 = vpow2.f32 %v6969_v5 }
 0x587   : > { %v8795_v32 = vpop.eup %8794  ;;  %6245 = vst [vmem:[%s11367_s12 + $0x90] sm:$0xff] %v6213_v37  ;;  %v6211_v20 = vmul.f32 %v8793_v19, %v11372_v54 }
 0x588   : > { %v8797_v15 = vpop.eup %8796  ;;  %8820 = vrcp.f32 %v6125_v50  ;;  %v6123_v47 = vadd.f32 1.0, %v8795_v32 }
 0x589   : > { %v8799_v59 = vpop.eup %8798  ;;  %6243 = vst [vmem:[%s11367_s12 + $0x80] sm:$0xff] %v6211_v20  ;;  %v6214_v49 = vmul.f32 %v8797_v15, %v11378_v9 }
 0x58a   : > { %v8801_v18 = vpop.eup %8800  ;;  %8822 = vrcp.f32 %v6123_v47  ;;  %v6126_v46 = vadd.f32 1.0, %v8799_v59 }
 0x58b   : > { %v8803_v30 = vpop.eup %8802  ;;  %6246 = vst [vmem:[%s11367_s12 + $0x98] sm:$0xff] %v6214_v49  ;;  %v6212_v36 = vmul.f32 %v8801_v18, %v11384_v43 }
 0x58c   : > { %v8805_v7 = vpop.eup %8804  ;;  %8824 = vrcp.f32 %v6126_v46  ;;  %v6124_v54 = vadd.f32 1.0, %v8803_v30 }
 0x58d   : > { %v8807_v26 = vpop.eup %8806  ;;  %6244 = vst [vmem:[%s11367_s12 + $0x88] sm:$0xff] %v6212_v36  ;;  %v6217_v55 = vmul.f32 %v8805_v7, %v11390_v45 }
 0x58e   : > { %v8809_v35 = vpop.eup %8808  ;;  %8826 = vrcp.f32 %v6124_v54  ;;  %v6129_v9 = vadd.f32 1.0, %v8807_v26 }
 0x58f   : > { %v8811_v57 = vpop.eup %8810  ;;  %6249 = vst [vmem:[%s11367_s12 + $0xb0] sm:$0xff] %v6217_v55  ;;  %v6215_v21 = vmul.f32 %v8809_v35, %v11396_v23 }
 0x590   : > { %v8813_v48 = vpop.eup %8812  ;;  %8828 = vrcp.f32 %v6129_v9  ;;  %v6127_v43 = vadd.f32 1.0, %v8811_v57 }
 0x591   : > { %v8815_v3 = vpop.eup %8814  ;;  %6247 = vst [vmem:[%s11367_s12 + $0xa0] sm:$0xff] %v6215_v21  ;;  %v6218_v33 = vmul.f32 %v8813_v48, %v11402_v60 }
 0x592   : > { %v8817_v29 = vpop.eup %8816  ;;  %8830 = vrcp.f32 %v6127_v43  ;;  %v6130_v45 = vadd.f32 1.0, %v8815_v3 }
 0x593   : > { %v8819_v17 = vpop.eup %8818  ;;  %6250 = vst [vmem:[%s11367_s12 + $0xb8] sm:$0xff] %v6218_v33  ;;  %v6216_v51 = vmul.f32 %v8817_v29, %v11408_v14 }
 0x594   : > { %8832 = vrcp.f32 %v6130_v45  ;;  %v6128_v23 = vadd.f32 1.0, %v8819_v17 }
 0x595   : > { %v8821_v11 = vpop.eup %8820  ;;  %6248 = vst [vmem:[%s11367_s12 + $0xa8] sm:$0xff] %v6216_v51 }
 0x596   : > { %v6221_v13 = vmul.f32 %v8821_v11, %v11414_v58  ;;  %8834 = vrcp.f32 %v6128_v23 }
 0x597   : > { %v8823_v34 = vpop.eup %8822 }
 0x598   : > { %6253 = vst [vmem:[%s11367_s12 + $0xd0] sm:$0xff] %v6221_v13  ;;  %v6219_v60 = vmul.f32 %v8823_v34, %v11419_v39 }
 0x599   : > { %v8825_v63 = vpop.eup %8824 }
 0x59a   : > { %6251 = vst [vmem:[%s11367_s12 + $0xc0] sm:$0xff] %v6219_v60  ;;  %v6222_v61 = vmul.f32 %v8825_v63, %v11424_v44 }
 0x59b   : > { %v8827_v14 = vpop.eup %8826 }
 0x59c   : > { %6254 = vst [vmem:[%s11367_s12 + $0xd8] sm:$0xff] %v6222_v61  ;;  %v6220_v25 = vmul.f32 %v8827_v14, %v11430_v52 }
 0x59d   : > { %v8829_v27 = vpop.eup %8828 }
 0x59e   : > { %6252 = vst [vmem:[%s11367_s12 + $0xc8] sm:$0xff] %v6220_v25  ;;  %v6225_v58 = vmul.f32 %v8829_v27, %v11436_v62 }
 0x59f   : > { %v8831_v22 = vpop.eup %8830 }
 0x5a0   : > { %6257 = vst [vmem:[%s11367_s12 + $0xf0] sm:$0xff] %v6225_v58  ;;  %v6223_v38 = vmul.f32 %v8831_v22, %v11442_v41 }
 0x5a1   : > { %v8833_v12 = vpop.eup %8832 }
 0x5a2   : > { %6255 = vst [vmem:[%s11367_s12 + $0xe0] sm:$0xff] %v6223_v38  ;;  %v6226_v39 = vmul.f32 %v8833_v12, %v11448_v24 }
 0x5a3   : > { %v8835_v42 = vpop.eup %8834 }
 0x5a4   : > { %6258 = vst [vmem:[%s11367_s12 + $0xf8] sm:$0xff] %v6226_v39  ;;  %v6224_v44 = vmul.f32 %v8835_v42, %v11454_v1 }
 0x5a6   : > { %6256 = vst [vmem:[%s11367_s12 + $0xe8] sm:$0xff] %v6224_v44 }
 0x5a7 PF: > { %s21_s19 = sadd.s32 1, %s8860_s19   ;;  %s11704_s17 = smov %s8856_s18 }
 0x5a8   : > { %p18_p5 = scmp.ge.s32.totalorder %s21_s19, 4   ;;  %s11705_s18 = smov %s11707_s20 }
 0x5aa   :  { %20 = sbr.rel (!%p18_p5) target bundleno = 2 (0x2), region = 110 }

</bundles_post_ra>
